<compile_context>
chip_gen: v6e
topology: v6e:2x2x1
jax: 0.10.0
libtpu: 0.0.40
codegen_flags: <defaults>
</compile_context>

<pallas_src>
import functools
import math

import jax
import jax.numpy as jnp
from jax.experimental import pallas as pl
from jax.experimental.pallas import tpu as pltpu

# ----------------------------- model dimensions ---------------------------- #
HIDDEN = 128          # lane-dense hidden size (real wav2vec2-base would be 768)
N_HEADS = 4
HEAD_DIM = HIDDEN // N_HEADS
FFN = 256
CLS_HIDDEN = 128
N_CLASSES = 2
CLS_PAD = 128         # classifier logits padded to a lane-dense width, sliced outside

# conv feature extractor (2 layers)
K0, S0 = 8, 4         # conv0: Cin = 1
K1, S1 = 4, 2         # conv1: Cin = HIDDEN (stride must be 2 for even/odd split)

# --- row offsets inside the packed [_R_TOTAL, 128] bf16 weight slab ---------
# (every segment starts on a multiple of 16 sublanes -> aligned bf16 slices)
_R_C1W = 0
_R_FPW = _R_C1W + K1 * HIDDEN        # 512
_R_WO = _R_FPW + HIDDEN              # 640
_R_FFW2 = _R_WO + HIDDEN             # 768
_R_CLSW1 = _R_FFW2 + FFN             # 1024
_R_CLSW2 = _R_CLSW1 + CLS_HIDDEN     # 1152
_R_C0W = _R_CLSW2 + CLS_HIDDEN       # 1280
_R_TOTAL = _R_C0W + K0               # 1288

# --- row indices inside the packed [_V_TOTAL, 128] f32 vector slab ----------
_V_FP_G, _V_FP_B, _V_FP_BIAS = 0, 1, 2
_V_BQ, _V_BK, _V_BV = 3, 4, 5
_V_BO = 6
_V_LN1_G, _V_LN1_B = 7, 8
_V_FFB1_A, _V_FFB1_B = 9, 10
_V_FFB2 = 11
_V_LN2_G, _V_LN2_B = 12, 13
_V_CLS_B1, _V_CLS_B2 = 14, 15
_V_TOTAL = 16


def _gelu(x):
    # TODO(synk): HF/PyTorch wav2vec2 uses exact erf-GELU; the tanh approximation
    # is used because erf lowering in Mosaic is not guaranteed.
    return jax.nn.gelu(x, approximate=True)


def _layer_norm(x, g, b, eps=1e-5):
    mu = jnp.mean(x, axis=-1, keepdims=True)
    var = jnp.mean(jnp.square(x - mu), axis=-1, keepdims=True)
    return (x - mu) * jax.lax.rsqrt(var + eps) * g + b


# ------------------------------ fused kernel ------------------------------- #

def _fused_forward_kernel(patch_ref, wrow_ref, wcol_ref, vec_ref, out_ref,
                          *, b_blk, n_rows, t_out, n_heads, head_dim):
    H = n_heads * head_dim
    T = t_out
    bf = lambda v: v.astype(jnp.bfloat16)          # matmul operands only; math stays f32

    vec = vec_ref[...]                              # [_V_TOTAL, H] f32
    vrow = lambda i: vec[i:i + 1, :]                # [1, H] row of the bias/gain slab

    # ---- conv0: one im2col matmul over every (batch, parity, position) row ----
    c0 = _gelu(jnp.dot(bf(patch_ref[0]), wrow_ref[_R_C0W:_R_TOTAL, :],
                       preferred_element_type=jnp.float32))   # [b_blk*2*n_rows, H]

    # ---- conv1 (kernel 4, stride 2) as ONE deep-K matmul ----------------------
    # out[t] = sum_j conv0[2t+j] @ W1[j]; per batch element, the four shifted
    # even/odd conv0 slabs are lane-concatenated -> [T, 4H], stacked over batch.
    slabs = []
    for b in range(b_blk):
        e0 = (2 * b) * n_rows          # even conv0 rows of this batch element
        o0 = (2 * b + 1) * n_rows      # odd conv0 rows
        slabs.append(jnp.concatenate(
            [c0[e0:e0 + T], c0[o0:o0 + T],
             c0[e0 + 1:e0 + 1 + T], c0[o0 + 1:o0 + 1 + T]], axis=-1))
    x1 = jnp.concatenate(slabs, axis=0)                          # [b_blk*T, 4H]
    h = _gelu(jnp.dot(bf(x1), wrow_ref[_R_C1W:_R_FPW, :],
                      preferred_element_type=jnp.float32))       # [b_blk*T, H]
    # TODO(synk): real Wav2Vec2 GroupNorm after conv0 and the positional conv
    # embedding are omitted (pretrained backbone cannot be loaded here).

    # ---- feature projection: LayerNorm -> Linear ------------------------------
    h = _layer_norm(h, vrow(_V_FP_G), vrow(_V_FP_B))
    h = jnp.dot(bf(h), wrow_ref[_R_FPW:_R_WO, :],
                preferred_element_type=jnp.float32) + vrow(_V_FP_BIAS)

    # ---- one post-LN transformer encoder layer --------------------------------
    resid = h
    qkv = jnp.dot(bf(h), wcol_ref[:, 0:3 * H],                   # fused Q|K|V
                  preferred_element_type=jnp.float32)
    qkv = qkv + jnp.concatenate([vrow(_V_BQ), vrow(_V_BK), vrow(_V_BV)], axis=-1)
    scale = 1.0 / math.sqrt(head_dim)
    o_rows = []
    for b in range(b_blk):             # scores/softmax/PV need per-batch rows
        r0 = b * T
        o_heads = []
        for hh in range(n_heads):
            lo = hh * head_dim
            q = qkv[r0:r0 + T, lo:lo + head_dim]
            k = qkv[r0:r0 + T, H + lo:H + lo + head_dim]
            v = qkv[r0:r0 + T, 2 * H + lo:2 * H + lo + head_dim]
            s = jax.lax.dot_general(q, k, (((1,), (1,)), ((), ())),
                                    preferred_element_type=jnp.float32) * scale
            p = jnp.exp(s - jnp.max(s, axis=-1, keepdims=True))
            p = p * pl.reciprocal(jnp.sum(p, axis=-1, keepdims=True), approx=True)
            o_heads.append(jnp.dot(p, v, preferred_element_type=jnp.float32))
        o_rows.append(jnp.concatenate(o_heads, axis=-1))          # [T, H]
    o_all = jnp.concatenate(o_rows, axis=0)                       # [b_blk*T, H]
    attn = jnp.dot(bf(o_all), wrow_ref[_R_WO:_R_FFW2, :],         # single wo matmul
                   preferred_element_type=jnp.float32) + vrow(_V_BO)
    h = _layer_norm(resid + attn, vrow(_V_LN1_G), vrow(_V_LN1_B))

    resid = h
    ff_b1 = jnp.concatenate([vrow(_V_FFB1_A), vrow(_V_FFB1_B)], axis=-1)
    ff = _gelu(jnp.dot(bf(h), wcol_ref[:, 3 * H:3 * H + FFN],
                       preferred_element_type=jnp.float32) + ff_b1)
    ff = jnp.dot(bf(ff), wrow_ref[_R_FFW2:_R_CLSW1, :],
                 preferred_element_type=jnp.float32) + vrow(_V_FFB2)
    h = _layer_norm(resid + ff, vrow(_V_LN2_G), vrow(_V_LN2_B))   # last_hidden_state

    # ---- mean over time + classifier head --------------------------------------
    pooled = jnp.concatenate(
        [jnp.sum(h[b * T:(b + 1) * T], axis=0, keepdims=True) for b in range(b_blk)],
        axis=0) * (1.0 / T)                                        # [b_blk, H]
    y = jnp.dot(bf(pooled), wrow_ref[_R_CLSW1:_R_CLSW2, :],
                preferred_element_type=jnp.float32) + vrow(_V_CLS_B1)
    y = jnp.maximum(y, 0.0)        # ReLU; Dropout(0.2) is identity in eval mode
    out_ref[0] = jnp.dot(bf(y), wrow_ref[_R_CLSW2:_R_C0W, :],
                         preferred_element_type=jnp.float32) + vrow(_V_CLS_B2)


# ------------------------------- parameters -------------------------------- #

def init_params(key):
    ks = iter(jax.random.split(key, 32))

    def w(shape, scale=0.05):
        return (scale * jax.random.normal(next(ks), shape)).astype(jnp.float32)

    zeros = lambda s: jnp.zeros(s, jnp.float32)
    ones = lambda s: jnp.ones(s, jnp.float32)
    H, F = HIDDEN, FFN
    # NOTE: conv weights are K-major / Cin-minor ([K, Cin, Cout]); a ported
    # PyTorch Conv1d weight [Cout, Cin, K] must be transposed (2, 1, 0) to match.
    return {
        "c0w": w((K0, H)),                       # Cin = 1 -> [K0, H]
        "c1w": w((K1, H, H)),                    # [K1, Cin=H, Cout=H]
        "fp_g": ones((1, H)), "fp_b": zeros((1, H)),
        "fp_w": w((H, H)), "fp_bias": zeros((1, H)),
        "wqkv": w((H, 3 * H)), "bqkv": zeros((1, 3 * H)),   # fused Q|K|V
        "wo": w((H, H)), "bo": zeros((1, H)),
        "ln1_g": ones((1, H)), "ln1_b": zeros((1, H)),
        "ff_w1": w((H, F)), "ff_b1": zeros((1, F)),
        "ff_w2": w((F, H)), "ff_b2": zeros((1, H)),
        "ln2_g": ones((1, H)), "ln2_b": zeros((1, H)),
        "cls_w1": w((H, CLS_HIDDEN)), "cls_b1": zeros((1, CLS_HIDDEN)),
        # real Linear(128, 2): zero-padded to 128 output lanes (sliced outside)
        "cls_w2": jnp.pad(w((CLS_HIDDEN, N_CLASSES)),
                          ((0, 0), (0, CLS_PAD - N_CLASSES))),
        "cls_b2": zeros((1, CLS_PAD)),
    }


def _pack_params(params):
    """Collapse all weights into 3 slabs (2 bf16 matmul slabs + 1 f32 vector slab)."""
    wrow = jnp.concatenate([
        params["c1w"].reshape(K1 * HIDDEN, HIDDEN),
        params["fp_w"], params["wo"], params["ff_w2"],
        params["cls_w1"], params["cls_w2"], params["c0w"],
    ], axis=0).astype(jnp.bfloat16)                       # [_R_TOTAL, 128]
    wcol = jnp.concatenate([params["wqkv"], params["ff_w1"]],
                           axis=1).astype(jnp.bfloat16)   # [128, 3H + FFN]
    vec = jnp.concatenate([
        params["fp_g"], params["fp_b"], params["fp_bias"],
        params["bqkv"].reshape(3, HIDDEN),
        params["bo"], params["ln1_g"], params["ln1_b"],
        params["ff_b1"].reshape(2, HIDDEN),
        params["ff_b2"], params["ln2_g"], params["ln2_b"],
        params["cls_b1"], params["cls_b2"],
    ], axis=0).astype(jnp.float32)                        # [_V_TOTAL, 128]
    return wrow, wcol, vec


def _pick_b_blk(batch):
    """Largest divisor of `batch` <= 8 while keeping >= 2 grid steps (v7x megacore)."""
    best = 1
    for cand in range(1, min(batch, 8) + 1):
        if batch % cand == 0 and (batch // cand >= 2 or batch == 1):
            best = cand
    return best


# --------------------------------- wrapper --------------------------------- #

def wav2vec_classifier_forward(params, x):
    """x: [B, T_raw] raw waveform -> logits [B, 2]."""
    B, t_raw = x.shape
    H = HIDDEN
    t0 = (t_raw - K0) // S0 + 1          # conv0 output length
    t1 = (t0 - K1) // S1 + 1             # conv1 output length (= encoder seq len)
    n_rows = t1 + 1                      # conv0 rows needed per parity
    # tight bound (review fix): the odd branch reads conv0 position 2*t1 + 1
    assert S1 == 2 and K1 == 4 and t1 >= 1 and 2 * t1 + 1 <= t0 - 1

    b_blk = _pick_b_blk(B)
    n_blk = B // b_blk

    # Tiny glue gather: im2col patches of the raw waveform for the even / odd
    # conv0 output positions, row-ordered [batch-in-block, parity, position].
    j = jnp.arange(K0)[None, :]
    pe_idx = (2 * jnp.arange(n_rows))[:, None] * S0 + j           # [n_rows, K0]
    po_idx = (2 * jnp.arange(n_rows) + 1)[:, None] * S0 + j
    patches = jnp.stack([x[:, pe_idx], x[:, po_idx]], axis=1)     # [B, 2, n_rows, K0]
    patches = patches.reshape(n_blk, b_blk * 2 * n_rows, K0)

    wrow, wcol, vec = _pack_params(params)

    # advisory cost estimate
    def _mmf(m, k, n):
        return 2 * m * k * n
    bt = b_blk * t1
    flops = n_blk * (
        _mmf(b_blk * 2 * n_rows, K0, H)
        + _mmf(bt, K1 * H, H) + _mmf(bt, H, H) + _mmf(bt, H, 3 * H)
        + b_blk * N_HEADS * (_mmf(t1, HEAD_DIM, t1) + _mmf(t1, t1, HEAD_DIM))
        + _mmf(bt, H, H) + _mmf(bt, H, FFN) + _mmf(bt, FFN, H)
        + _mmf(b_blk, H, CLS_HIDDEN) + _mmf(b_blk, CLS_HIDDEN, CLS_PAD))
    transcendentals = n_blk * (b_blk * 2 * n_rows * H + bt * H + bt * FFN
                               + b_blk * N_HEADS * t1 * t1 + 3 * bt)
    bytes_accessed = (4 * int(patches.size) + 2 * int(wrow.size)
                      + 2 * int(wcol.size) + 4 * int(vec.size) + 4 * B * CLS_PAD)

    out = pl.pallas_call(
        functools.partial(_fused_forward_kernel, b_blk=b_blk, n_rows=n_rows,
                          t_out=t1, n_heads=N_HEADS, head_dim=HEAD_DIM),
        out_shape=jax.ShapeDtypeStruct((n_blk, b_blk, CLS_PAD), jnp.float32),
        grid=(n_blk,),
        in_specs=[
            pl.BlockSpec((1, b_blk * 2 * n_rows, K0), lambda i: (i, 0, 0)),
            pl.BlockSpec(wrow.shape, lambda i: (0, 0)),   # whole slab VMEM-resident
            pl.BlockSpec(wcol.shape, lambda i: (0, 0)),
            pl.BlockSpec(vec.shape, lambda i: (0, 0)),
        ],
        out_specs=pl.BlockSpec((1, b_blk, CLS_PAD), lambda i: (i, 0, 0)),
        compiler_params=pltpu.CompilerParams(
            dimension_semantics=("parallel",)),           # batch blocks across TCs (v7x)
        cost_estimate=pl.CostEstimate(flops=int(flops),
                                      transcendentals=int(transcendentals),
                                      bytes_accessed=int(bytes_accessed)),
    )(patches, wrow, wcol, vec)

    return out.reshape(B, CLS_PAD)[:, :N_CLASSES]


# --------------------------- pure-JAX reference ----------------------------- #

def _unfold(x, k, s):
    """x: [B, T, C] -> im2col patches [B, T_out, k*C] (K-major, Cin-minor)."""
    B, T, C = x.shape
    t_out = (T - k) // s + 1
    idx = jnp.arange(t_out)[:, None] * s + jnp.arange(k)[None, :]
    return x[:, idx, :].reshape(B, t_out, k * C)


def _mm_bf16(a, b):
    # mirror the kernel's bf16-operand / f32-accumulate matmuls
    return jax.lax.dot_general(a.astype(jnp.bfloat16), b.astype(jnp.bfloat16),
                               (((a.ndim - 1,), (0,)), ((), ())),
                               preferred_element_type=jnp.float32)


def reference_forward(params, x):
    B, _ = x.shape
    H = HIDDEN
    h = x[:, :, None]
    h = _gelu(_mm_bf16(_unfold(h, K0, S0), params["c0w"]))
    h = _gelu(_mm_bf16(_unfold(h, K1, S1), params["c1w"].reshape(K1 * H, H)))
    h = _layer_norm(h, params["fp_g"], params["fp_b"])
    h = _mm_bf16(h, params["fp_w"]) + params["fp_bias"]
    resid = h
    qkv = _mm_bf16(h, params["wqkv"]) + params["bqkv"]
    q, k, v = jnp.split(qkv, 3, axis=-1)
    sh = lambda t: t.reshape(B, -1, N_HEADS, HEAD_DIM).transpose(0, 2, 1, 3)
    s = jnp.einsum("bhqd,bhkd->bhqk", sh(q), sh(k)) / math.sqrt(HEAD_DIM)
    p = jax.nn.softmax(s, axis=-1)
    o = jnp.einsum("bhqk,bhkd->bhqd", p, sh(v)).transpose(0, 2, 1, 3).reshape(B, -1, H)
    h = _layer_norm(resid + _mm_bf16(o, params["wo"]) + params["bo"],
                    params["ln1_g"], params["ln1_b"])
    resid = h
    ff = _gelu(_mm_bf16(h, params["ff_w1"]) + params["ff_b1"])
    h = _layer_norm(resid + _mm_bf16(ff, params["ff_w2"]) + params["ff_b2"],
                    params["ln2_g"], params["ln2_b"])
    pooled = h.mean(axis=1)
    y = jnp.maximum(_mm_bf16(pooled, params["cls_w1"]) + params["cls_b1"], 0.0)
    return (_mm_bf16(y, params["cls_w2"]) + params["cls_b2"])[:, :N_CLASSES]


if __name__ == "__main__":
    key = jax.random.PRNGKey(0)
    pkey, xkey = jax.random.split(key)
    params = init_params(pkey)
    # B=8 so the batch-blocked grid has 2 steps of 4 batch elements each.
    x = jax.random.normal(xkey, (8, 128), dtype=jnp.float32)   # [B, T_raw] waveform

    logits = jax.jit(wav2vec_classifier_forward)(params, x)
    jax.block_until_ready(logits)
    assert logits.shape == (8, N_CLASSES) and logits.dtype == jnp.float32

    ref = reference_forward(params, x)
    assert bool(jnp.allclose(logits, ref, rtol=2e-2, atol=2e-3)), (logits, ref)
    print("KERNEL_OK")
</pallas_src>

<mosaic_0001>
module attributes {stable_mosaic.version = 11 : i64} {
  func.func @_fused_forward_kernel(%arg0: i32, %arg1: memref<1x120x8xf32, #tpu.memory_space<vmem>>, %arg2: memref<1288x128xbf16, #tpu.memory_space<vmem>>, %arg3: memref<128x640xbf16, #tpu.memory_space<vmem>>, %arg4: memref<16x128xf32, #tpu.memory_space<vmem>>, %arg5: memref<1x4x128xf32, #tpu.memory_space<vmem>>) attributes {dimension_semantics = [#tpu.dimension_semantics<parallel>], iteration_bounds = array<i64: 2>, scalar_prefetch = 0 : i64, scratch_operands = 0 : i64, tpu.core_type = #tpu.core_type<tc>, window_params = [{transform_indices = @transform_0, window_bounds = array<i64: 1, 120, 8>}, {pipeline_mode = #tpu.pipeline_mode<synchronous>, transform_indices = @transform_1, window_bounds = array<i64: 1288, 128>}, {pipeline_mode = #tpu.pipeline_mode<synchronous>, transform_indices = @transform_2, window_bounds = array<i64: 128, 640>}, {pipeline_mode = #tpu.pipeline_mode<synchronous>, transform_indices = @transform_3, window_bounds = array<i64: 16, 128>}, {transform_indices = @transform_4, window_bounds = array<i64: 1, 4, 128>}]} {
    %c0 = arith.constant 0 : index
    %c0_0 = arith.constant 0 : index
    %0 = vector.load %arg4[%c0, %c0_0] : memref<16x128xf32, #tpu.memory_space<vmem>>, vector<16x128xf32>
    %c0_1 = arith.constant 0 : index
    %c0_2 = arith.constant 0 : index
    %c0_3 = arith.constant 0 : index
    %1 = vector.load %arg1[%c0_1, %c0_2, %c0_3] : memref<1x120x8xf32, #tpu.memory_space<vmem>>, vector<1x120x8xf32>
    %2 = vector.shape_cast %1 : vector<1x120x8xf32> to vector<120x8xf32>
    %3 = arith.truncf %2 : vector<120x8xf32> to vector<120x8xbf16>
    %c1280 = arith.constant 1280 : index
    %c0_4 = arith.constant 0 : index
    %4 = vector.load %arg2[%c1280, %c0_4] : memref<1288x128xbf16, #tpu.memory_space<vmem>>, vector<8x128xbf16>
    %cst = arith.constant dense<0.000000e+00> : vector<120x128xf32>
    %5 = tpu.matmul %3, %4, %cst {dimension_numbers = #tpu.dot_dimension_numbers<[1], [0], [0], [1], [0, 0, 1, 1], [], []>} : vector<120x8xbf16>, vector<8x128xbf16>, vector<120x128xf32> -> vector<120x128xf32>
    %6 = arith.mulf %5, %5 : vector<120x128xf32>
    %7 = arith.mulf %5, %6 : vector<120x128xf32>
    %cst_5 = arith.constant 4.471500e-02 : f32
    %8 = vector.broadcast %cst_5 : f32 to vector<120x128xf32>
    %9 = arith.mulf %8, %7 : vector<120x128xf32>
    %10 = arith.addf %5, %9 : vector<120x128xf32>
    %cst_6 = arith.constant 0.797884583 : f32
    %11 = vector.broadcast %cst_6 : f32 to vector<120x128xf32>
    %12 = arith.mulf %11, %10 : vector<120x128xf32>
    %13 = math.tanh %12 : vector<120x128xf32>
    %cst_7 = arith.constant 1.000000e+00 : f32
    %14 = vector.broadcast %cst_7 : f32 to vector<120x128xf32>
    %15 = arith.addf %14, %13 : vector<120x128xf32>
    %cst_8 = arith.constant 5.000000e-01 : f32
    %16 = vector.broadcast %cst_8 : f32 to vector<120x128xf32>
    %17 = arith.mulf %16, %15 : vector<120x128xf32>
    %18 = arith.mulf %5, %17 : vector<120x128xf32>
    %19 = vector.extract_strided_slice %18 {offsets = [0, 0], sizes = [14, 128], strides = [1, 1]} : vector<120x128xf32> to vector<14x128xf32>
    %20 = vector.extract_strided_slice %18 {offsets = [15, 0], sizes = [14, 128], strides = [1, 1]} : vector<120x128xf32> to vector<14x128xf32>
    %21 = vector.extract_strided_slice %18 {offsets = [1, 0], sizes = [14, 128], strides = [1, 1]} : vector<120x128xf32> to vector<14x128xf32>
    %22 = vector.extract_strided_slice %18 {offsets = [16, 0], sizes = [14, 128], strides = [1, 1]} : vector<120x128xf32> to vector<14x128xf32>
    %23 = tpu.concatenate %19, %20, %21, %22 in 1 : vector<14x128xf32>, vector<14x128xf32>, vector<14x128xf32>, vector<14x128xf32> -> vector<14x512xf32>
    %24 = vector.extract_strided_slice %18 {offsets = [30, 0], sizes = [14, 128], strides = [1, 1]} : vector<120x128xf32> to vector<14x128xf32>
    %25 = vector.extract_strided_slice %18 {offsets = [45, 0], sizes = [14, 128], strides = [1, 1]} : vector<120x128xf32> to vector<14x128xf32>
    %26 = vector.extract_strided_slice %18 {offsets = [31, 0], sizes = [14, 128], strides = [1, 1]} : vector<120x128xf32> to vector<14x128xf32>
    %27 = vector.extract_strided_slice %18 {offsets = [46, 0], sizes = [14, 128], strides = [1, 1]} : vector<120x128xf32> to vector<14x128xf32>
    %28 = tpu.concatenate %24, %25, %26, %27 in 1 : vector<14x128xf32>, vector<14x128xf32>, vector<14x128xf32>, vector<14x128xf32> -> vector<14x512xf32>
    %29 = vector.extract_strided_slice %18 {offsets = [60, 0], sizes = [14, 128], strides = [1, 1]} : vector<120x128xf32> to vector<14x128xf32>
    %30 = vector.extract_strided_slice %18 {offsets = [75, 0], sizes = [14, 128], strides = [1, 1]} : vector<120x128xf32> to vector<14x128xf32>
    %31 = vector.extract_strided_slice %18 {offsets = [61, 0], sizes = [14, 128], strides = [1, 1]} : vector<120x128xf32> to vector<14x128xf32>
    %32 = vector.extract_strided_slice %18 {offsets = [76, 0], sizes = [14, 128], strides = [1, 1]} : vector<120x128xf32> to vector<14x128xf32>
    %33 = tpu.concatenate %29, %30, %31, %32 in 1 : vector<14x128xf32>, vector<14x128xf32>, vector<14x128xf32>, vector<14x128xf32> -> vector<14x512xf32>
    %34 = vector.extract_strided_slice %18 {offsets = [90, 0], sizes = [14, 128], strides = [1, 1]} : vector<120x128xf32> to vector<14x128xf32>
    %35 = vector.extract_strided_slice %18 {offsets = [105, 0], sizes = [14, 128], strides = [1, 1]} : vector<120x128xf32> to vector<14x128xf32>
    %36 = vector.extract_strided_slice %18 {offsets = [91, 0], sizes = [14, 128], strides = [1, 1]} : vector<120x128xf32> to vector<14x128xf32>
    %37 = vector.extract_strided_slice %18 {offsets = [106, 0], sizes = [14, 128], strides = [1, 1]} : vector<120x128xf32> to vector<14x128xf32>
    %38 = tpu.concatenate %34, %35, %36, %37 in 1 : vector<14x128xf32>, vector<14x128xf32>, vector<14x128xf32>, vector<14x128xf32> -> vector<14x512xf32>
    %39 = tpu.concatenate %23, %28, %33, %38 in 0 : vector<14x512xf32>, vector<14x512xf32>, vector<14x512xf32>, vector<14x512xf32> -> vector<56x512xf32>
    %40 = arith.truncf %39 : vector<56x512xf32> to vector<56x512xbf16>
    %c0_9 = arith.constant 0 : index
    %c0_10 = arith.constant 0 : index
    %41 = vector.load %arg2[%c0_9, %c0_10] : memref<1288x128xbf16, #tpu.memory_space<vmem>>, vector<512x128xbf16>
    %cst_11 = arith.constant dense<0.000000e+00> : vector<56x128xf32>
    %42 = tpu.matmul %40, %41, %cst_11 {dimension_numbers = #tpu.dot_dimension_numbers<[1], [0], [0], [1], [0, 0, 1, 1], [], []>} : vector<56x512xbf16>, vector<512x128xbf16>, vector<56x128xf32> -> vector<56x128xf32>
    %43 = arith.mulf %42, %42 : vector<56x128xf32>
    %44 = arith.mulf %42, %43 : vector<56x128xf32>
    %cst_12 = arith.constant 4.471500e-02 : f32
    %45 = vector.broadcast %cst_12 : f32 to vector<56x128xf32>
    %46 = arith.mulf %45, %44 : vector<56x128xf32>
    %47 = arith.addf %42, %46 : vector<56x128xf32>
    %cst_13 = arith.constant 0.797884583 : f32
    %48 = vector.broadcast %cst_13 : f32 to vector<56x128xf32>
    %49 = arith.mulf %48, %47 : vector<56x128xf32>
    %50 = math.tanh %49 : vector<56x128xf32>
    %cst_14 = arith.constant 1.000000e+00 : f32
    %51 = vector.broadcast %cst_14 : f32 to vector<56x128xf32>
    %52 = arith.addf %51, %50 : vector<56x128xf32>
    %cst_15 = arith.constant 5.000000e-01 : f32
    %53 = vector.broadcast %cst_15 : f32 to vector<56x128xf32>
    %54 = arith.mulf %53, %52 : vector<56x128xf32>
    %55 = arith.mulf %42, %54 : vector<56x128xf32>
    %56 = vector.extract_strided_slice %0 {offsets = [0, 0], sizes = [1, 128], strides = [1, 1]} : vector<16x128xf32> to vector<1x128xf32>
    %57 = vector.extract_strided_slice %0 {offsets = [1, 0], sizes = [1, 128], strides = [1, 1]} : vector<16x128xf32> to vector<1x128xf32>
    %cst_16 = arith.constant dense<0.000000e+00> : vector<56xf32>
    %58 = vector.multi_reduction <add>, %55, %cst_16 [1] : vector<56x128xf32> to vector<56xf32>
    %59 = vector.shape_cast %58 : vector<56xf32> to vector<56x1xf32>
    %cst_17 = arith.constant 1.280000e+02 : f32
    %60 = vector.broadcast %cst_17 : f32 to vector<56x1xf32>
    %61 = arith.divf %59, %60 : vector<56x1xf32>
    %62 = vector.broadcast %61 : vector<56x1xf32> to vector<56x128xf32>
    %63 = arith.subf %55, %62 : vector<56x128xf32>
    %64 = arith.mulf %63, %63 : vector<56x128xf32>
    %cst_18 = arith.constant dense<0.000000e+00> : vector<56xf32>
    %65 = vector.multi_reduction <add>, %64, %cst_18 [1] : vector<56x128xf32> to vector<56xf32>
    %66 = vector.shape_cast %65 : vector<56xf32> to vector<56x1xf32>
    %cst_19 = arith.constant 1.280000e+02 : f32
    %67 = vector.broadcast %cst_19 : f32 to vector<56x1xf32>
    %68 = arith.divf %66, %67 : vector<56x1xf32>
    %69 = vector.broadcast %61 : vector<56x1xf32> to vector<56x128xf32>
    %70 = arith.subf %55, %69 : vector<56x128xf32>
    %cst_20 = arith.constant 9.99999974E-6 : f32
    %71 = vector.broadcast %cst_20 : f32 to vector<56x1xf32>
    %72 = arith.addf %68, %71 : vector<56x1xf32>
    %73 = math.rsqrt %72 : vector<56x1xf32>
    %74 = vector.broadcast %73 : vector<56x1xf32> to vector<56x128xf32>
    %75 = arith.mulf %70, %74 : vector<56x128xf32>
    %76 = vector.broadcast %56 : vector<1x128xf32> to vector<56x128xf32>
    %77 = arith.mulf %75, %76 : vector<56x128xf32>
    %78 = vector.broadcast %57 : vector<1x128xf32> to vector<56x128xf32>
    %79 = arith.addf %77, %78 : vector<56x128xf32>
    %80 = arith.truncf %79 : vector<56x128xf32> to vector<56x128xbf16>
    %c512 = arith.constant 512 : index
    %c0_21 = arith.constant 0 : index
    %81 = vector.load %arg2[%c512, %c0_21] : memref<1288x128xbf16, #tpu.memory_space<vmem>>, vector<128x128xbf16>
    %cst_22 = arith.constant dense<0.000000e+00> : vector<56x128xf32>
    %82 = tpu.matmul %80, %81, %cst_22 {dimension_numbers = #tpu.dot_dimension_numbers<[1], [0], [0], [1], [0, 0, 1, 1], [], []>} : vector<56x128xbf16>, vector<128x128xbf16>, vector<56x128xf32> -> vector<56x128xf32>
    %83 = vector.extract_strided_slice %0 {offsets = [2, 0], sizes = [1, 128], strides = [1, 1]} : vector<16x128xf32> to vector<1x128xf32>
    %84 = vector.broadcast %83 : vector<1x128xf32> to vector<56x128xf32>
    %85 = arith.addf %82, %84 : vector<56x128xf32>
    %86 = arith.truncf %85 : vector<56x128xf32> to vector<56x128xbf16>
    %c0_23 = arith.constant 0 : index
    %c0_24 = arith.constant 0 : index
    %87 = vector.load %arg3[%c0_23, %c0_24] : memref<128x640xbf16, #tpu.memory_space<vmem>>, vector<128x384xbf16>
    %cst_25 = arith.constant dense<0.000000e+00> : vector<56x384xf32>
    %88 = tpu.matmul %86, %87, %cst_25 {dimension_numbers = #tpu.dot_dimension_numbers<[1], [0], [0], [1], [0, 0, 1, 1], [], []>} : vector<56x128xbf16>, vector<128x384xbf16>, vector<56x384xf32> -> vector<56x384xf32>
    %89 = vector.extract_strided_slice %0 {offsets = [3, 0], sizes = [1, 128], strides = [1, 1]} : vector<16x128xf32> to vector<1x128xf32>
    %90 = vector.extract_strided_slice %0 {offsets = [4, 0], sizes = [1, 128], strides = [1, 1]} : vector<16x128xf32> to vector<1x128xf32>
    %91 = vector.extract_strided_slice %0 {offsets = [5, 0], sizes = [1, 128], strides = [1, 1]} : vector<16x128xf32> to vector<1x128xf32>
    %92 = tpu.concatenate %89, %90, %91 in 1 : vector<1x128xf32>, vector<1x128xf32>, vector<1x128xf32> -> vector<1x384xf32>
    %93 = vector.broadcast %92 : vector<1x384xf32> to vector<56x384xf32>
    %94 = arith.addf %88, %93 : vector<56x384xf32>
    %95 = vector.extract_strided_slice %94 {offsets = [0, 0], sizes = [14, 32], strides = [1, 1]} : vector<56x384xf32> to vector<14x32xf32>
    %96 = vector.extract_strided_slice %94 {offsets = [0, 128], sizes = [14, 32], strides = [1, 1]} : vector<56x384xf32> to vector<14x32xf32>
    %97 = vector.extract_strided_slice %94 {offsets = [0, 256], sizes = [14, 32], strides = [1, 1]} : vector<56x384xf32> to vector<14x32xf32>
    %cst_26 = arith.constant dense<0.000000e+00> : vector<14x14xf32>
    %98 = tpu.matmul %95, %96, %cst_26 {dimension_numbers = #tpu.dot_dimension_numbers<[1], [1], [0], [0], [0, 0, 1, 0], [], []>} : vector<14x32xf32>, vector<14x32xf32>, vector<14x14xf32> -> vector<14x14xf32>
    %cst_27 = arith.constant 0.176776692 : f32
    %99 = vector.broadcast %cst_27 : f32 to vector<14x14xf32>
    %100 = arith.mulf %98, %99 : vector<14x14xf32>
    %cst_28 = arith.constant dense<0xFF800000> : vector<14xf32>
    %101 = vector.multi_reduction <maximumf>, %100, %cst_28 [1] : vector<14x14xf32> to vector<14xf32>
    %102 = vector.shape_cast %101 : vector<14xf32> to vector<14x1xf32>
    %103 = vector.broadcast %102 : vector<14x1xf32> to vector<14x14xf32>
    %104 = arith.subf %100, %103 : vector<14x14xf32>
    %105 = math.exp %104 : vector<14x14xf32>
    %cst_29 = arith.constant dense<0.000000e+00> : vector<14xf32>
    %106 = vector.multi_reduction <add>, %105, %cst_29 [1] : vector<14x14xf32> to vector<14xf32>
    %107 = vector.shape_cast %106 : vector<14xf32> to vector<14x1xf32>
    %108 = tpu.reciprocal %107 {approx = true} : vector<14x1xf32> -> vector<14x1xf32>
    %109 = vector.broadcast %108 : vector<14x1xf32> to vector<14x14xf32>
    %110 = arith.mulf %105, %109 : vector<14x14xf32>
    %cst_30 = arith.constant dense<0.000000e+00> : vector<14x32xf32>
    %111 = tpu.matmul %110, %97, %cst_30 {dimension_numbers = #tpu.dot_dimension_numbers<[1], [0], [0], [1], [0, 0, 1, 1], [], []>} : vector<14x14xf32>, vector<14x32xf32>, vector<14x32xf32> -> vector<14x32xf32>
    %112 = vector.extract_strided_slice %94 {offsets = [0, 32], sizes = [14, 32], strides = [1, 1]} : vector<56x384xf32> to vector<14x32xf32>
    %113 = vector.extract_strided_slice %94 {offsets = [0, 160], sizes = [14, 32], strides = [1, 1]} : vector<56x384xf32> to vector<14x32xf32>
    %114 = vector.extract_strided_slice %94 {offsets = [0, 288], sizes = [14, 32], strides = [1, 1]} : vector<56x384xf32> to vector<14x32xf32>
    %cst_31 = arith.constant dense<0.000000e+00> : vector<14x14xf32>
    %115 = tpu.matmul %112, %113, %cst_31 {dimension_numbers = #tpu.dot_dimension_numbers<[1], [1], [0], [0], [0, 0, 1, 0], [], []>} : vector<14x32xf32>, vector<14x32xf32>, vector<14x14xf32> -> vector<14x14xf32>
    %cst_32 = arith.constant 0.176776692 : f32
    %116 = vector.broadcast %cst_32 : f32 to vector<14x14xf32>
    %117 = arith.mulf %115, %116 : vector<14x14xf32>
    %cst_33 = arith.constant dense<0xFF800000> : vector<14xf32>
    %118 = vector.multi_reduction <maximumf>, %117, %cst_33 [1] : vector<14x14xf32> to vector<14xf32>
    %119 = vector.shape_cast %118 : vector<14xf32> to vector<14x1xf32>
    %120 = vector.broadcast %119 : vector<14x1xf32> to vector<14x14xf32>
    %121 = arith.subf %117, %120 : vector<14x14xf32>
    %122 = math.exp %121 : vector<14x14xf32>
    %cst_34 = arith.constant dense<0.000000e+00> : vector<14xf32>
    %123 = vector.multi_reduction <add>, %122, %cst_34 [1] : vector<14x14xf32> to vector<14xf32>
    %124 = vector.shape_cast %123 : vector<14xf32> to vector<14x1xf32>
    %125 = tpu.reciprocal %124 {approx = true} : vector<14x1xf32> -> vector<14x1xf32>
    %126 = vector.broadcast %125 : vector<14x1xf32> to vector<14x14xf32>
    %127 = arith.mulf %122, %126 : vector<14x14xf32>
    %cst_35 = arith.constant dense<0.000000e+00> : vector<14x32xf32>
    %128 = tpu.matmul %127, %114, %cst_35 {dimension_numbers = #tpu.dot_dimension_numbers<[1], [0], [0], [1], [0, 0, 1, 1], [], []>} : vector<14x14xf32>, vector<14x32xf32>, vector<14x32xf32> -> vector<14x32xf32>
    %129 = vector.extract_strided_slice %94 {offsets = [0, 64], sizes = [14, 32], strides = [1, 1]} : vector<56x384xf32> to vector<14x32xf32>
    %130 = vector.extract_strided_slice %94 {offsets = [0, 192], sizes = [14, 32], strides = [1, 1]} : vector<56x384xf32> to vector<14x32xf32>
    %131 = vector.extract_strided_slice %94 {offsets = [0, 320], sizes = [14, 32], strides = [1, 1]} : vector<56x384xf32> to vector<14x32xf32>
    %cst_36 = arith.constant dense<0.000000e+00> : vector<14x14xf32>
    %132 = tpu.matmul %129, %130, %cst_36 {dimension_numbers = #tpu.dot_dimension_numbers<[1], [1], [0], [0], [0, 0, 1, 0], [], []>} : vector<14x32xf32>, vector<14x32xf32>, vector<14x14xf32> -> vector<14x14xf32>
    %cst_37 = arith.constant 0.176776692 : f32
    %133 = vector.broadcast %cst_37 : f32 to vector<14x14xf32>
    %134 = arith.mulf %132, %133 : vector<14x14xf32>
    %cst_38 = arith.constant dense<0xFF800000> : vector<14xf32>
    %135 = vector.multi_reduction <maximumf>, %134, %cst_38 [1] : vector<14x14xf32> to vector<14xf32>
    %136 = vector.shape_cast %135 : vector<14xf32> to vector<14x1xf32>
    %137 = vector.broadcast %136 : vector<14x1xf32> to vector<14x14xf32>
    %138 = arith.subf %134, %137 : vector<14x14xf32>
    %139 = math.exp %138 : vector<14x14xf32>
    %cst_39 = arith.constant dense<0.000000e+00> : vector<14xf32>
    %140 = vector.multi_reduction <add>, %139, %cst_39 [1] : vector<14x14xf32> to vector<14xf32>
    %141 = vector.shape_cast %140 : vector<14xf32> to vector<14x1xf32>
    %142 = tpu.reciprocal %141 {approx = true} : vector<14x1xf32> -> vector<14x1xf32>
    %143 = vector.broadcast %142 : vector<14x1xf32> to vector<14x14xf32>
    %144 = arith.mulf %139, %143 : vector<14x14xf32>
    %cst_40 = arith.constant dense<0.000000e+00> : vector<14x32xf32>
    %145 = tpu.matmul %144, %131, %cst_40 {dimension_numbers = #tpu.dot_dimension_numbers<[1], [0], [0], [1], [0, 0, 1, 1], [], []>} : vector<14x14xf32>, vector<14x32xf32>, vector<14x32xf32> -> vector<14x32xf32>
    %146 = vector.extract_strided_slice %94 {offsets = [0, 96], sizes = [14, 32], strides = [1, 1]} : vector<56x384xf32> to vector<14x32xf32>
    %147 = vector.extract_strided_slice %94 {offsets = [0, 224], sizes = [14, 32], strides = [1, 1]} : vector<56x384xf32> to vector<14x32xf32>
    %148 = vector.extract_strided_slice %94 {offsets = [0, 352], sizes = [14, 32], strides = [1, 1]} : vector<56x384xf32> to vector<14x32xf32>
    %cst_41 = arith.constant dense<0.000000e+00> : vector<14x14xf32>
    %149 = tpu.matmul %146, %147, %cst_41 {dimension_numbers = #tpu.dot_dimension_numbers<[1], [1], [0], [0], [0, 0, 1, 0], [], []>} : vector<14x32xf32>, vector<14x32xf32>, vector<14x14xf32> -> vector<14x14xf32>
    %cst_42 = arith.constant 0.176776692 : f32
    %150 = vector.broadcast %cst_42 : f32 to vector<14x14xf32>
    %151 = arith.mulf %149, %150 : vector<14x14xf32>
    %cst_43 = arith.constant dense<0xFF800000> : vector<14xf32>
    %152 = vector.multi_reduction <maximumf>, %151, %cst_43 [1] : vector<14x14xf32> to vector<14xf32>
    %153 = vector.shape_cast %152 : vector<14xf32> to vector<14x1xf32>
    %154 = vector.broadcast %153 : vector<14x1xf32> to vector<14x14xf32>
    %155 = arith.subf %151, %154 : vector<14x14xf32>
    %156 = math.exp %155 : vector<14x14xf32>
    %cst_44 = arith.constant dense<0.000000e+00> : vector<14xf32>
    %157 = vector.multi_reduction <add>, %156, %cst_44 [1] : vector<14x14xf32> to vector<14xf32>
    %158 = vector.shape_cast %157 : vector<14xf32> to vector<14x1xf32>
    %159 = tpu.reciprocal %158 {approx = true} : vector<14x1xf32> -> vector<14x1xf32>
    %160 = vector.broadcast %159 : vector<14x1xf32> to vector<14x14xf32>
    %161 = arith.mulf %156, %160 : vector<14x14xf32>
    %cst_45 = arith.constant dense<0.000000e+00> : vector<14x32xf32>
    %162 = tpu.matmul %161, %148, %cst_45 {dimension_numbers = #tpu.dot_dimension_numbers<[1], [0], [0], [1], [0, 0, 1, 1], [], []>} : vector<14x14xf32>, vector<14x32xf32>, vector<14x32xf32> -> vector<14x32xf32>
    %163 = tpu.concatenate %111, %128, %145, %162 in 1 : vector<14x32xf32>, vector<14x32xf32>, vector<14x32xf32>, vector<14x32xf32> -> vector<14x128xf32>
    %164 = vector.extract_strided_slice %94 {offsets = [14, 0], sizes = [14, 32], strides = [1, 1]} : vector<56x384xf32> to vector<14x32xf32>
    %165 = vector.extract_strided_slice %94 {offsets = [14, 128], sizes = [14, 32], strides = [1, 1]} : vector<56x384xf32> to vector<14x32xf32>
    %166 = vector.extract_strided_slice %94 {offsets = [14, 256], sizes = [14, 32], strides = [1, 1]} : vector<56x384xf32> to vector<14x32xf32>
    %cst_46 = arith.constant dense<0.000000e+00> : vector<14x14xf32>
    %167 = tpu.matmul %164, %165, %cst_46 {dimension_numbers = #tpu.dot_dimension_numbers<[1], [1], [0], [0], [0, 0, 1, 0], [], []>} : vector<14x32xf32>, vector<14x32xf32>, vector<14x14xf32> -> vector<14x14xf32>
    %cst_47 = arith.constant 0.176776692 : f32
    %168 = vector.broadcast %cst_47 : f32 to vector<14x14xf32>
    %169 = arith.mulf %167, %168 : vector<14x14xf32>
    %cst_48 = arith.constant dense<0xFF800000> : vector<14xf32>
    %170 = vector.multi_reduction <maximumf>, %169, %cst_48 [1] : vector<14x14xf32> to vector<14xf32>
    %171 = vector.shape_cast %170 : vector<14xf32> to vector<14x1xf32>
    %172 = vector.broadcast %171 : vector<14x1xf32> to vector<14x14xf32>
    %173 = arith.subf %169, %172 : vector<14x14xf32>
    %174 = math.exp %173 : vector<14x14xf32>
    %cst_49 = arith.constant dense<0.000000e+00> : vector<14xf32>
    %175 = vector.multi_reduction <add>, %174, %cst_49 [1] : vector<14x14xf32> to vector<14xf32>
    %176 = vector.shape_cast %175 : vector<14xf32> to vector<14x1xf32>
    %177 = tpu.reciprocal %176 {approx = true} : vector<14x1xf32> -> vector<14x1xf32>
    %178 = vector.broadcast %177 : vector<14x1xf32> to vector<14x14xf32>
    %179 = arith.mulf %174, %178 : vector<14x14xf32>
    %cst_50 = arith.constant dense<0.000000e+00> : vector<14x32xf32>
    %180 = tpu.matmul %179, %166, %cst_50 {dimension_numbers = #tpu.dot_dimension_numbers<[1], [0], [0], [1], [0, 0, 1, 1], [], []>} : vector<14x14xf32>, vector<14x32xf32>, vector<14x32xf32> -> vector<14x32xf32>
    %181 = vector.extract_strided_slice %94 {offsets = [14, 32], sizes = [14, 32], strides = [1, 1]} : vector<56x384xf32> to vector<14x32xf32>
    %182 = vector.extract_strided_slice %94 {offsets = [14, 160], sizes = [14, 32], strides = [1, 1]} : vector<56x384xf32> to vector<14x32xf32>
    %183 = vector.extract_strided_slice %94 {offsets = [14, 288], sizes = [14, 32], strides = [1, 1]} : vector<56x384xf32> to vector<14x32xf32>
    %cst_51 = arith.constant dense<0.000000e+00> : vector<14x14xf32>
    %184 = tpu.matmul %181, %182, %cst_51 {dimension_numbers = #tpu.dot_dimension_numbers<[1], [1], [0], [0], [0, 0, 1, 0], [], []>} : vector<14x32xf32>, vector<14x32xf32>, vector<14x14xf32> -> vector<14x14xf32>
    %cst_52 = arith.constant 0.176776692 : f32
    %185 = vector.broadcast %cst_52 : f32 to vector<14x14xf32>
    %186 = arith.mulf %184, %185 : vector<14x14xf32>
    %cst_53 = arith.constant dense<0xFF800000> : vector<14xf32>
    %187 = vector.multi_reduction <maximumf>, %186, %cst_53 [1] : vector<14x14xf32> to vector<14xf32>
    %188 = vector.shape_cast %187 : vector<14xf32> to vector<14x1xf32>
    %189 = vector.broadcast %188 : vector<14x1xf32> to vector<14x14xf32>
    %190 = arith.subf %186, %189 : vector<14x14xf32>
    %191 = math.exp %190 : vector<14x14xf32>
    %cst_54 = arith.constant dense<0.000000e+00> : vector<14xf32>
    %192 = vector.multi_reduction <add>, %191, %cst_54 [1] : vector<14x14xf32> to vector<14xf32>
    %193 = vector.shape_cast %192 : vector<14xf32> to vector<14x1xf32>
    %194 = tpu.reciprocal %193 {approx = true} : vector<14x1xf32> -> vector<14x1xf32>
    %195 = vector.broadcast %194 : vector<14x1xf32> to vector<14x14xf32>
    %196 = arith.mulf %191, %195 : vector<14x14xf32>
    %cst_55 = arith.constant dense<0.000000e+00> : vector<14x32xf32>
    %197 = tpu.matmul %196, %183, %cst_55 {dimension_numbers = #tpu.dot_dimension_numbers<[1], [0], [0], [1], [0, 0, 1, 1], [], []>} : vector<14x14xf32>, vector<14x32xf32>, vector<14x32xf32> -> vector<14x32xf32>
    %198 = vector.extract_strided_slice %94 {offsets = [14, 64], sizes = [14, 32], strides = [1, 1]} : vector<56x384xf32> to vector<14x32xf32>
    %199 = vector.extract_strided_slice %94 {offsets = [14, 192], sizes = [14, 32], strides = [1, 1]} : vector<56x384xf32> to vector<14x32xf32>
    %200 = vector.extract_strided_slice %94 {offsets = [14, 320], sizes = [14, 32], strides = [1, 1]} : vector<56x384xf32> to vector<14x32xf32>
    %cst_56 = arith.constant dense<0.000000e+00> : vector<14x14xf32>
    %201 = tpu.matmul %198, %199, %cst_56 {dimension_numbers = #tpu.dot_dimension_numbers<[1], [1], [0], [0], [0, 0, 1, 0], [], []>} : vector<14x32xf32>, vector<14x32xf32>, vector<14x14xf32> -> vector<14x14xf32>
    %cst_57 = arith.constant 0.176776692 : f32
    %202 = vector.broadcast %cst_57 : f32 to vector<14x14xf32>
    %203 = arith.mulf %201, %202 : vector<14x14xf32>
    %cst_58 = arith.constant dense<0xFF800000> : vector<14xf32>
    %204 = vector.multi_reduction <maximumf>, %203, %cst_58 [1] : vector<14x14xf32> to vector<14xf32>
    %205 = vector.shape_cast %204 : vector<14xf32> to vector<14x1xf32>
    %206 = vector.broadcast %205 : vector<14x1xf32> to vector<14x14xf32>
    %207 = arith.subf %203, %206 : vector<14x14xf32>
    %208 = math.exp %207 : vector<14x14xf32>
    %cst_59 = arith.constant dense<0.000000e+00> : vector<14xf32>
    %209 = vector.multi_reduction <add>, %208, %cst_59 [1] : vector<14x14xf32> to vector<14xf32>
    %210 = vector.shape_cast %209 : vector<14xf32> to vector<14x1xf32>
    %211 = tpu.reciprocal %210 {approx = true} : vector<14x1xf32> -> vector<14x1xf32>
    %212 = vector.broadcast %211 : vector<14x1xf32> to vector<14x14xf32>
    %213 = arith.mulf %208, %212 : vector<14x14xf32>
    %cst_60 = arith.constant dense<0.000000e+00> : vector<14x32xf32>
    %214 = tpu.matmul %213, %200, %cst_60 {dimension_numbers = #tpu.dot_dimension_numbers<[1], [0], [0], [1], [0, 0, 1, 1], [], []>} : vector<14x14xf32>, vector<14x32xf32>, vector<14x32xf32> -> vector<14x32xf32>
    %215 = vector.extract_strided_slice %94 {offsets = [14, 96], sizes = [14, 32], strides = [1, 1]} : vector<56x384xf32> to vector<14x32xf32>
    %216 = vector.extract_strided_slice %94 {offsets = [14, 224], sizes = [14, 32], strides = [1, 1]} : vector<56x384xf32> to vector<14x32xf32>
    %217 = vector.extract_strided_slice %94 {offsets = [14, 352], sizes = [14, 32], strides = [1, 1]} : vector<56x384xf32> to vector<14x32xf32>
    %cst_61 = arith.constant dense<0.000000e+00> : vector<14x14xf32>
    %218 = tpu.matmul %215, %216, %cst_61 {dimension_numbers = #tpu.dot_dimension_numbers<[1], [1], [0], [0], [0, 0, 1, 0], [], []>} : vector<14x32xf32>, vector<14x32xf32>, vector<14x14xf32> -> vector<14x14xf32>
    %cst_62 = arith.constant 0.176776692 : f32
    %219 = vector.broadcast %cst_62 : f32 to vector<14x14xf32>
    %220 = arith.mulf %218, %219 : vector<14x14xf32>
    %cst_63 = arith.constant dense<0xFF800000> : vector<14xf32>
    %221 = vector.multi_reduction <maximumf>, %220, %cst_63 [1] : vector<14x14xf32> to vector<14xf32>
    %222 = vector.shape_cast %221 : vector<14xf32> to vector<14x1xf32>
    %223 = vector.broadcast %222 : vector<14x1xf32> to vector<14x14xf32>
    %224 = arith.subf %220, %223 : vector<14x14xf32>
    %225 = math.exp %224 : vector<14x14xf32>
    %cst_64 = arith.constant dense<0.000000e+00> : vector<14xf32>
    %226 = vector.multi_reduction <add>, %225, %cst_64 [1] : vector<14x14xf32> to vector<14xf32>
    %227 = vector.shape_cast %226 : vector<14xf32> to vector<14x1xf32>
    %228 = tpu.reciprocal %227 {approx = true} : vector<14x1xf32> -> vector<14x1xf32>
    %229 = vector.broadcast %228 : vector<14x1xf32> to vector<14x14xf32>
    %230 = arith.mulf %225, %229 : vector<14x14xf32>
    %cst_65 = arith.constant dense<0.000000e+00> : vector<14x32xf32>
    %231 = tpu.matmul %230, %217, %cst_65 {dimension_numbers = #tpu.dot_dimension_numbers<[1], [0], [0], [1], [0, 0, 1, 1], [], []>} : vector<14x14xf32>, vector<14x32xf32>, vector<14x32xf32> -> vector<14x32xf32>
    %232 = tpu.concatenate %180, %197, %214, %231 in 1 : vector<14x32xf32>, vector<14x32xf32>, vector<14x32xf32>, vector<14x32xf32> -> vector<14x128xf32>
    %233 = vector.extract_strided_slice %94 {offsets = [28, 0], sizes = [14, 32], strides = [1, 1]} : vector<56x384xf32> to vector<14x32xf32>
    %234 = vector.extract_strided_slice %94 {offsets = [28, 128], sizes = [14, 32], strides = [1, 1]} : vector<56x384xf32> to vector<14x32xf32>
    %235 = vector.extract_strided_slice %94 {offsets = [28, 256], sizes = [14, 32], strides = [1, 1]} : vector<56x384xf32> to vector<14x32xf32>
    %cst_66 = arith.constant dense<0.000000e+00> : vector<14x14xf32>
    %236 = tpu.matmul %233, %234, %cst_66 {dimension_numbers = #tpu.dot_dimension_numbers<[1], [1], [0], [0], [0, 0, 1, 0], [], []>} : vector<14x32xf32>, vector<14x32xf32>, vector<14x14xf32> -> vector<14x14xf32>
    %cst_67 = arith.constant 0.176776692 : f32
    %237 = vector.broadcast %cst_67 : f32 to vector<14x14xf32>
    %238 = arith.mulf %236, %237 : vector<14x14xf32>
    %cst_68 = arith.constant dense<0xFF800000> : vector<14xf32>
    %239 = vector.multi_reduction <maximumf>, %238, %cst_68 [1] : vector<14x14xf32> to vector<14xf32>
    %240 = vector.shape_cast %239 : vector<14xf32> to vector<14x1xf32>
    %241 = vector.broadcast %240 : vector<14x1xf32> to vector<14x14xf32>
    %242 = arith.subf %238, %241 : vector<14x14xf32>
    %243 = math.exp %242 : vector<14x14xf32>
    %cst_69 = arith.constant dense<0.000000e+00> : vector<14xf32>
    %244 = vector.multi_reduction <add>, %243, %cst_69 [1] : vector<14x14xf32> to vector<14xf32>
    %245 = vector.shape_cast %244 : vector<14xf32> to vector<14x1xf32>
    %246 = tpu.reciprocal %245 {approx = true} : vector<14x1xf32> -> vector<14x1xf32>
    %247 = vector.broadcast %246 : vector<14x1xf32> to vector<14x14xf32>
    %248 = arith.mulf %243, %247 : vector<14x14xf32>
    %cst_70 = arith.constant dense<0.000000e+00> : vector<14x32xf32>
    %249 = tpu.matmul %248, %235, %cst_70 {dimension_numbers = #tpu.dot_dimension_numbers<[1], [0], [0], [1], [0, 0, 1, 1], [], []>} : vector<14x14xf32>, vector<14x32xf32>, vector<14x32xf32> -> vector<14x32xf32>
    %250 = vector.extract_strided_slice %94 {offsets = [28, 32], sizes = [14, 32], strides = [1, 1]} : vector<56x384xf32> to vector<14x32xf32>
    %251 = vector.extract_strided_slice %94 {offsets = [28, 160], sizes = [14, 32], strides = [1, 1]} : vector<56x384xf32> to vector<14x32xf32>
    %252 = vector.extract_strided_slice %94 {offsets = [28, 288], sizes = [14, 32], strides = [1, 1]} : vector<56x384xf32> to vector<14x32xf32>
    %cst_71 = arith.constant dense<0.000000e+00> : vector<14x14xf32>
    %253 = tpu.matmul %250, %251, %cst_71 {dimension_numbers = #tpu.dot_dimension_numbers<[1], [1], [0], [0], [0, 0, 1, 0], [], []>} : vector<14x32xf32>, vector<14x32xf32>, vector<14x14xf32> -> vector<14x14xf32>
    %cst_72 = arith.constant 0.176776692 : f32
    %254 = vector.broadcast %cst_72 : f32 to vector<14x14xf32>
    %255 = arith.mulf %253, %254 : vector<14x14xf32>
    %cst_73 = arith.constant dense<0xFF800000> : vector<14xf32>
    %256 = vector.multi_reduction <maximumf>, %255, %cst_73 [1] : vector<14x14xf32> to vector<14xf32>
    %257 = vector.shape_cast %256 : vector<14xf32> to vector<14x1xf32>
    %258 = vector.broadcast %257 : vector<14x1xf32> to vector<14x14xf32>
    %259 = arith.subf %255, %258 : vector<14x14xf32>
    %260 = math.exp %259 : vector<14x14xf32>
    %cst_74 = arith.constant dense<0.000000e+00> : vector<14xf32>
    %261 = vector.multi_reduction <add>, %260, %cst_74 [1] : vector<14x14xf32> to vector<14xf32>
    %262 = vector.shape_cast %261 : vector<14xf32> to vector<14x1xf32>
    %263 = tpu.reciprocal %262 {approx = true} : vector<14x1xf32> -> vector<14x1xf32>
    %264 = vector.broadcast %263 : vector<14x1xf32> to vector<14x14xf32>
    %265 = arith.mulf %260, %264 : vector<14x14xf32>
    %cst_75 = arith.constant dense<0.000000e+00> : vector<14x32xf32>
    %266 = tpu.matmul %265, %252, %cst_75 {dimension_numbers = #tpu.dot_dimension_numbers<[1], [0], [0], [1], [0, 0, 1, 1], [], []>} : vector<14x14xf32>, vector<14x32xf32>, vector<14x32xf32> -> vector<14x32xf32>
    %267 = vector.extract_strided_slice %94 {offsets = [28, 64], sizes = [14, 32], strides = [1, 1]} : vector<56x384xf32> to vector<14x32xf32>
    %268 = vector.extract_strided_slice %94 {offsets = [28, 192], sizes = [14, 32], strides = [1, 1]} : vector<56x384xf32> to vector<14x32xf32>
    %269 = vector.extract_strided_slice %94 {offsets = [28, 320], sizes = [14, 32], strides = [1, 1]} : vector<56x384xf32> to vector<14x32xf32>
    %cst_76 = arith.constant dense<0.000000e+00> : vector<14x14xf32>
    %270 = tpu.matmul %267, %268, %cst_76 {dimension_numbers = #tpu.dot_dimension_numbers<[1], [1], [0], [0], [0, 0, 1, 0], [], []>} : vector<14x32xf32>, vector<14x32xf32>, vector<14x14xf32> -> vector<14x14xf32>
    %cst_77 = arith.constant 0.176776692 : f32
    %271 = vector.broadcast %cst_77 : f32 to vector<14x14xf32>
    %272 = arith.mulf %270, %271 : vector<14x14xf32>
    %cst_78 = arith.constant dense<0xFF800000> : vector<14xf32>
    %273 = vector.multi_reduction <maximumf>, %272, %cst_78 [1] : vector<14x14xf32> to vector<14xf32>
    %274 = vector.shape_cast %273 : vector<14xf32> to vector<14x1xf32>
    %275 = vector.broadcast %274 : vector<14x1xf32> to vector<14x14xf32>
    %276 = arith.subf %272, %275 : vector<14x14xf32>
    %277 = math.exp %276 : vector<14x14xf32>
    %cst_79 = arith.constant dense<0.000000e+00> : vector<14xf32>
    %278 = vector.multi_reduction <add>, %277, %cst_79 [1] : vector<14x14xf32> to vector<14xf32>
    %279 = vector.shape_cast %278 : vector<14xf32> to vector<14x1xf32>
    %280 = tpu.reciprocal %279 {approx = true} : vector<14x1xf32> -> vector<14x1xf32>
    %281 = vector.broadcast %280 : vector<14x1xf32> to vector<14x14xf32>
    %282 = arith.mulf %277, %281 : vector<14x14xf32>
    %cst_80 = arith.constant dense<0.000000e+00> : vector<14x32xf32>
    %283 = tpu.matmul %282, %269, %cst_80 {dimension_numbers = #tpu.dot_dimension_numbers<[1], [0], [0], [1], [0, 0, 1, 1], [], []>} : vector<14x14xf32>, vector<14x32xf32>, vector<14x32xf32> -> vector<14x32xf32>
    %284 = vector.extract_strided_slice %94 {offsets = [28, 96], sizes = [14, 32], strides = [1, 1]} : vector<56x384xf32> to vector<14x32xf32>
    %285 = vector.extract_strided_slice %94 {offsets = [28, 224], sizes = [14, 32], strides = [1, 1]} : vector<56x384xf32> to vector<14x32xf32>
    %286 = vector.extract_strided_slice %94 {offsets = [28, 352], sizes = [14, 32], strides = [1, 1]} : vector<56x384xf32> to vector<14x32xf32>
    %cst_81 = arith.constant dense<0.000000e+00> : vector<14x14xf32>
    %287 = tpu.matmul %284, %285, %cst_81 {dimension_numbers = #tpu.dot_dimension_numbers<[1], [1], [0], [0], [0, 0, 1, 0], [], []>} : vector<14x32xf32>, vector<14x32xf32>, vector<14x14xf32> -> vector<14x14xf32>
    %cst_82 = arith.constant 0.176776692 : f32
    %288 = vector.broadcast %cst_82 : f32 to vector<14x14xf32>
    %289 = arith.mulf %287, %288 : vector<14x14xf32>
    %cst_83 = arith.constant dense<0xFF800000> : vector<14xf32>
    %290 = vector.multi_reduction <maximumf>, %289, %cst_83 [1] : vector<14x14xf32> to vector<14xf32>
    %291 = vector.shape_cast %290 : vector<14xf32> to vector<14x1xf32>
    %292 = vector.broadcast %291 : vector<14x1xf32> to vector<14x14xf32>
    %293 = arith.subf %289, %292 : vector<14x14xf32>
    %294 = math.exp %293 : vector<14x14xf32>
    %cst_84 = arith.constant dense<0.000000e+00> : vector<14xf32>
    %295 = vector.multi_reduction <add>, %294, %cst_84 [1] : vector<14x14xf32> to vector<14xf32>
    %296 = vector.shape_cast %295 : vector<14xf32> to vector<14x1xf32>
    %297 = tpu.reciprocal %296 {approx = true} : vector<14x1xf32> -> vector<14x1xf32>
    %298 = vector.broadcast %297 : vector<14x1xf32> to vector<14x14xf32>
    %299 = arith.mulf %294, %298 : vector<14x14xf32>
    %cst_85 = arith.constant dense<0.000000e+00> : vector<14x32xf32>
    %300 = tpu.matmul %299, %286, %cst_85 {dimension_numbers = #tpu.dot_dimension_numbers<[1], [0], [0], [1], [0, 0, 1, 1], [], []>} : vector<14x14xf32>, vector<14x32xf32>, vector<14x32xf32> -> vector<14x32xf32>
    %301 = tpu.concatenate %249, %266, %283, %300 in 1 : vector<14x32xf32>, vector<14x32xf32>, vector<14x32xf32>, vector<14x32xf32> -> vector<14x128xf32>
    %302 = vector.extract_strided_slice %94 {offsets = [42, 0], sizes = [14, 32], strides = [1, 1]} : vector<56x384xf32> to vector<14x32xf32>
    %303 = vector.extract_strided_slice %94 {offsets = [42, 128], sizes = [14, 32], strides = [1, 1]} : vector<56x384xf32> to vector<14x32xf32>
    %304 = vector.extract_strided_slice %94 {offsets = [42, 256], sizes = [14, 32], strides = [1, 1]} : vector<56x384xf32> to vector<14x32xf32>
    %cst_86 = arith.constant dense<0.000000e+00> : vector<14x14xf32>
    %305 = tpu.matmul %302, %303, %cst_86 {dimension_numbers = #tpu.dot_dimension_numbers<[1], [1], [0], [0], [0, 0, 1, 0], [], []>} : vector<14x32xf32>, vector<14x32xf32>, vector<14x14xf32> -> vector<14x14xf32>
    %cst_87 = arith.constant 0.176776692 : f32
    %306 = vector.broadcast %cst_87 : f32 to vector<14x14xf32>
    %307 = arith.mulf %305, %306 : vector<14x14xf32>
    %cst_88 = arith.constant dense<0xFF800000> : vector<14xf32>
    %308 = vector.multi_reduction <maximumf>, %307, %cst_88 [1] : vector<14x14xf32> to vector<14xf32>
    %309 = vector.shape_cast %308 : vector<14xf32> to vector<14x1xf32>
    %310 = vector.broadcast %309 : vector<14x1xf32> to vector<14x14xf32>
    %311 = arith.subf %307, %310 : vector<14x14xf32>
    %312 = math.exp %311 : vector<14x14xf32>
    %cst_89 = arith.constant dense<0.000000e+00> : vector<14xf32>
    %313 = vector.multi_reduction <add>, %312, %cst_89 [1] : vector<14x14xf32> to vector<14xf32>
    %314 = vector.shape_cast %313 : vector<14xf32> to vector<14x1xf32>
    %315 = tpu.reciprocal %314 {approx = true} : vector<14x1xf32> -> vector<14x1xf32>
    %316 = vector.broadcast %315 : vector<14x1xf32> to vector<14x14xf32>
    %317 = arith.mulf %312, %316 : vector<14x14xf32>
    %cst_90 = arith.constant dense<0.000000e+00> : vector<14x32xf32>
    %318 = tpu.matmul %317, %304, %cst_90 {dimension_numbers = #tpu.dot_dimension_numbers<[1], [0], [0], [1], [0, 0, 1, 1], [], []>} : vector<14x14xf32>, vector<14x32xf32>, vector<14x32xf32> -> vector<14x32xf32>
    %319 = vector.extract_strided_slice %94 {offsets = [42, 32], sizes = [14, 32], strides = [1, 1]} : vector<56x384xf32> to vector<14x32xf32>
    %320 = vector.extract_strided_slice %94 {offsets = [42, 160], sizes = [14, 32], strides = [1, 1]} : vector<56x384xf32> to vector<14x32xf32>
    %321 = vector.extract_strided_slice %94 {offsets = [42, 288], sizes = [14, 32], strides = [1, 1]} : vector<56x384xf32> to vector<14x32xf32>
    %cst_91 = arith.constant dense<0.000000e+00> : vector<14x14xf32>
    %322 = tpu.matmul %319, %320, %cst_91 {dimension_numbers = #tpu.dot_dimension_numbers<[1], [1], [0], [0], [0, 0, 1, 0], [], []>} : vector<14x32xf32>, vector<14x32xf32>, vector<14x14xf32> -> vector<14x14xf32>
    %cst_92 = arith.constant 0.176776692 : f32
    %323 = vector.broadcast %cst_92 : f32 to vector<14x14xf32>
    %324 = arith.mulf %322, %323 : vector<14x14xf32>
    %cst_93 = arith.constant dense<0xFF800000> : vector<14xf32>
    %325 = vector.multi_reduction <maximumf>, %324, %cst_93 [1] : vector<14x14xf32> to vector<14xf32>
    %326 = vector.shape_cast %325 : vector<14xf32> to vector<14x1xf32>
    %327 = vector.broadcast %326 : vector<14x1xf32> to vector<14x14xf32>
    %328 = arith.subf %324, %327 : vector<14x14xf32>
    %329 = math.exp %328 : vector<14x14xf32>
    %cst_94 = arith.constant dense<0.000000e+00> : vector<14xf32>
    %330 = vector.multi_reduction <add>, %329, %cst_94 [1] : vector<14x14xf32> to vector<14xf32>
    %331 = vector.shape_cast %330 : vector<14xf32> to vector<14x1xf32>
    %332 = tpu.reciprocal %331 {approx = true} : vector<14x1xf32> -> vector<14x1xf32>
    %333 = vector.broadcast %332 : vector<14x1xf32> to vector<14x14xf32>
    %334 = arith.mulf %329, %333 : vector<14x14xf32>
    %cst_95 = arith.constant dense<0.000000e+00> : vector<14x32xf32>
    %335 = tpu.matmul %334, %321, %cst_95 {dimension_numbers = #tpu.dot_dimension_numbers<[1], [0], [0], [1], [0, 0, 1, 1], [], []>} : vector<14x14xf32>, vector<14x32xf32>, vector<14x32xf32> -> vector<14x32xf32>
    %336 = vector.extract_strided_slice %94 {offsets = [42, 64], sizes = [14, 32], strides = [1, 1]} : vector<56x384xf32> to vector<14x32xf32>
    %337 = vector.extract_strided_slice %94 {offsets = [42, 192], sizes = [14, 32], strides = [1, 1]} : vector<56x384xf32> to vector<14x32xf32>
    %338 = vector.extract_strided_slice %94 {offsets = [42, 320], sizes = [14, 32], strides = [1, 1]} : vector<56x384xf32> to vector<14x32xf32>
    %cst_96 = arith.constant dense<0.000000e+00> : vector<14x14xf32>
    %339 = tpu.matmul %336, %337, %cst_96 {dimension_numbers = #tpu.dot_dimension_numbers<[1], [1], [0], [0], [0, 0, 1, 0], [], []>} : vector<14x32xf32>, vector<14x32xf32>, vector<14x14xf32> -> vector<14x14xf32>
    %cst_97 = arith.constant 0.176776692 : f32
    %340 = vector.broadcast %cst_97 : f32 to vector<14x14xf32>
    %341 = arith.mulf %339, %340 : vector<14x14xf32>
    %cst_98 = arith.constant dense<0xFF800000> : vector<14xf32>
    %342 = vector.multi_reduction <maximumf>, %341, %cst_98 [1] : vector<14x14xf32> to vector<14xf32>
    %343 = vector.shape_cast %342 : vector<14xf32> to vector<14x1xf32>
    %344 = vector.broadcast %343 : vector<14x1xf32> to vector<14x14xf32>
    %345 = arith.subf %341, %344 : vector<14x14xf32>
    %346 = math.exp %345 : vector<14x14xf32>
    %cst_99 = arith.constant dense<0.000000e+00> : vector<14xf32>
    %347 = vector.multi_reduction <add>, %346, %cst_99 [1] : vector<14x14xf32> to vector<14xf32>
    %348 = vector.shape_cast %347 : vector<14xf32> to vector<14x1xf32>
    %349 = tpu.reciprocal %348 {approx = true} : vector<14x1xf32> -> vector<14x1xf32>
    %350 = vector.broadcast %349 : vector<14x1xf32> to vector<14x14xf32>
    %351 = arith.mulf %346, %350 : vector<14x14xf32>
    %cst_100 = arith.constant dense<0.000000e+00> : vector<14x32xf32>
    %352 = tpu.matmul %351, %338, %cst_100 {dimension_numbers = #tpu.dot_dimension_numbers<[1], [0], [0], [1], [0, 0, 1, 1], [], []>} : vector<14x14xf32>, vector<14x32xf32>, vector<14x32xf32> -> vector<14x32xf32>
    %353 = vector.extract_strided_slice %94 {offsets = [42, 96], sizes = [14, 32], strides = [1, 1]} : vector<56x384xf32> to vector<14x32xf32>
    %354 = vector.extract_strided_slice %94 {offsets = [42, 224], sizes = [14, 32], strides = [1, 1]} : vector<56x384xf32> to vector<14x32xf32>
    %355 = vector.extract_strided_slice %94 {offsets = [42, 352], sizes = [14, 32], strides = [1, 1]} : vector<56x384xf32> to vector<14x32xf32>
    %cst_101 = arith.constant dense<0.000000e+00> : vector<14x14xf32>
    %356 = tpu.matmul %353, %354, %cst_101 {dimension_numbers = #tpu.dot_dimension_numbers<[1], [1], [0], [0], [0, 0, 1, 0], [], []>} : vector<14x32xf32>, vector<14x32xf32>, vector<14x14xf32> -> vector<14x14xf32>
    %cst_102 = arith.constant 0.176776692 : f32
    %357 = vector.broadcast %cst_102 : f32 to vector<14x14xf32>
    %358 = arith.mulf %356, %357 : vector<14x14xf32>
    %cst_103 = arith.constant dense<0xFF800000> : vector<14xf32>
    %359 = vector.multi_reduction <maximumf>, %358, %cst_103 [1] : vector<14x14xf32> to vector<14xf32>
    %360 = vector.shape_cast %359 : vector<14xf32> to vector<14x1xf32>
    %361 = vector.broadcast %360 : vector<14x1xf32> to vector<14x14xf32>
    %362 = arith.subf %358, %361 : vector<14x14xf32>
    %363 = math.exp %362 : vector<14x14xf32>
    %cst_104 = arith.constant dense<0.000000e+00> : vector<14xf32>
    %364 = vector.multi_reduction <add>, %363, %cst_104 [1] : vector<14x14xf32> to vector<14xf32>
    %365 = vector.shape_cast %364 : vector<14xf32> to vector<14x1xf32>
    %366 = tpu.reciprocal %365 {approx = true} : vector<14x1xf32> -> vector<14x1xf32>
    %367 = vector.broadcast %366 : vector<14x1xf32> to vector<14x14xf32>
    %368 = arith.mulf %363, %367 : vector<14x14xf32>
    %cst_105 = arith.constant dense<0.000000e+00> : vector<14x32xf32>
    %369 = tpu.matmul %368, %355, %cst_105 {dimension_numbers = #tpu.dot_dimension_numbers<[1], [0], [0], [1], [0, 0, 1, 1], [], []>} : vector<14x14xf32>, vector<14x32xf32>, vector<14x32xf32> -> vector<14x32xf32>
    %370 = tpu.concatenate %318, %335, %352, %369 in 1 : vector<14x32xf32>, vector<14x32xf32>, vector<14x32xf32>, vector<14x32xf32> -> vector<14x128xf32>
    %371 = tpu.concatenate %163, %232, %301, %370 in 0 : vector<14x128xf32>, vector<14x128xf32>, vector<14x128xf32>, vector<14x128xf32> -> vector<56x128xf32>
    %372 = arith.truncf %371 : vector<56x128xf32> to vector<56x128xbf16>
    %c640 = arith.constant 640 : index
    %c0_106 = arith.constant 0 : index
    %373 = vector.load %arg2[%c640, %c0_106] : memref<1288x128xbf16, #tpu.memory_space<vmem>>, vector<128x128xbf16>
    %cst_107 = arith.constant dense<0.000000e+00> : vector<56x128xf32>
    %374 = tpu.matmul %372, %373, %cst_107 {dimension_numbers = #tpu.dot_dimension_numbers<[1], [0], [0], [1], [0, 0, 1, 1], [], []>} : vector<56x128xbf16>, vector<128x128xbf16>, vector<56x128xf32> -> vector<56x128xf32>
    %375 = vector.extract_strided_slice %0 {offsets = [6, 0], sizes = [1, 128], strides = [1, 1]} : vector<16x128xf32> to vector<1x128xf32>
    %376 = vector.broadcast %375 : vector<1x128xf32> to vector<56x128xf32>
    %377 = arith.addf %374, %376 : vector<56x128xf32>
    %378 = arith.addf %85, %377 : vector<56x128xf32>
    %379 = vector.extract_strided_slice %0 {offsets = [7, 0], sizes = [1, 128], strides = [1, 1]} : vector<16x128xf32> to vector<1x128xf32>
    %380 = vector.extract_strided_slice %0 {offsets = [8, 0], sizes = [1, 128], strides = [1, 1]} : vector<16x128xf32> to vector<1x128xf32>
    %cst_108 = arith.constant dense<0.000000e+00> : vector<56xf32>
    %381 = vector.multi_reduction <add>, %378, %cst_108 [1] : vector<56x128xf32> to vector<56xf32>
    %382 = vector.shape_cast %381 : vector<56xf32> to vector<56x1xf32>
    %cst_109 = arith.constant 1.280000e+02 : f32
    %383 = vector.broadcast %cst_109 : f32 to vector<56x1xf32>
    %384 = arith.divf %382, %383 : vector<56x1xf32>
    %385 = vector.broadcast %384 : vector<56x1xf32> to vector<56x128xf32>
    %386 = arith.subf %378, %385 : vector<56x128xf32>
    %387 = arith.mulf %386, %386 : vector<56x128xf32>
    %cst_110 = arith.constant dense<0.000000e+00> : vector<56xf32>
    %388 = vector.multi_reduction <add>, %387, %cst_110 [1] : vector<56x128xf32> to vector<56xf32>
    %389 = vector.shape_cast %388 : vector<56xf32> to vector<56x1xf32>
    %cst_111 = arith.constant 1.280000e+02 : f32
    %390 = vector.broadcast %cst_111 : f32 to vector<56x1xf32>
    %391 = arith.divf %389, %390 : vector<56x1xf32>
    %392 = vector.broadcast %384 : vector<56x1xf32> to vector<56x128xf32>
    %393 = arith.subf %378, %392 : vector<56x128xf32>
    %cst_112 = arith.constant 9.99999974E-6 : f32
    %394 = vector.broadcast %cst_112 : f32 to vector<56x1xf32>
    %395 = arith.addf %391, %394 : vector<56x1xf32>
    %396 = math.rsqrt %395 : vector<56x1xf32>
    %397 = vector.broadcast %396 : vector<56x1xf32> to vector<56x128xf32>
    %398 = arith.mulf %393, %397 : vector<56x128xf32>
    %399 = vector.broadcast %379 : vector<1x128xf32> to vector<56x128xf32>
    %400 = arith.mulf %398, %399 : vector<56x128xf32>
    %401 = vector.broadcast %380 : vector<1x128xf32> to vector<56x128xf32>
    %402 = arith.addf %400, %401 : vector<56x128xf32>
    %403 = vector.extract_strided_slice %0 {offsets = [9, 0], sizes = [1, 128], strides = [1, 1]} : vector<16x128xf32> to vector<1x128xf32>
    %404 = vector.extract_strided_slice %0 {offsets = [10, 0], sizes = [1, 128], strides = [1, 1]} : vector<16x128xf32> to vector<1x128xf32>
    %405 = tpu.concatenate %403, %404 in 1 : vector<1x128xf32>, vector<1x128xf32> -> vector<1x256xf32>
    %406 = arith.truncf %402 : vector<56x128xf32> to vector<56x128xbf16>
    %c0_113 = arith.constant 0 : index
    %c384 = arith.constant 384 : index
    %407 = vector.load %arg3[%c0_113, %c384] : memref<128x640xbf16, #tpu.memory_space<vmem>>, vector<128x256xbf16>
    %cst_114 = arith.constant dense<0.000000e+00> : vector<56x256xf32>
    %408 = tpu.matmul %406, %407, %cst_114 {dimension_numbers = #tpu.dot_dimension_numbers<[1], [0], [0], [1], [0, 0, 1, 1], [], []>} : vector<56x128xbf16>, vector<128x256xbf16>, vector<56x256xf32> -> vector<56x256xf32>
    %409 = vector.broadcast %405 : vector<1x256xf32> to vector<56x256xf32>
    %410 = arith.addf %408, %409 : vector<56x256xf32>
    %411 = arith.mulf %410, %410 : vector<56x256xf32>
    %412 = arith.mulf %410, %411 : vector<56x256xf32>
    %cst_115 = arith.constant 4.471500e-02 : f32
    %413 = vector.broadcast %cst_115 : f32 to vector<56x256xf32>
    %414 = arith.mulf %413, %412 : vector<56x256xf32>
    %415 = arith.addf %410, %414 : vector<56x256xf32>
    %cst_116 = arith.constant 0.797884583 : f32
    %416 = vector.broadcast %cst_116 : f32 to vector<56x256xf32>
    %417 = arith.mulf %416, %415 : vector<56x256xf32>
    %418 = math.tanh %417 : vector<56x256xf32>
    %cst_117 = arith.constant 1.000000e+00 : f32
    %419 = vector.broadcast %cst_117 : f32 to vector<56x256xf32>
    %420 = arith.addf %419, %418 : vector<56x256xf32>
    %cst_118 = arith.constant 5.000000e-01 : f32
    %421 = vector.broadcast %cst_118 : f32 to vector<56x256xf32>
    %422 = arith.mulf %421, %420 : vector<56x256xf32>
    %423 = arith.mulf %410, %422 : vector<56x256xf32>
    %424 = arith.truncf %423 : vector<56x256xf32> to vector<56x256xbf16>
    %c768 = arith.constant 768 : index
    %c0_119 = arith.constant 0 : index
    %425 = vector.load %arg2[%c768, %c0_119] : memref<1288x128xbf16, #tpu.memory_space<vmem>>, vector<256x128xbf16>
    %cst_120 = arith.constant dense<0.000000e+00> : vector<56x128xf32>
    %426 = tpu.matmul %424, %425, %cst_120 {dimension_numbers = #tpu.dot_dimension_numbers<[1], [0], [0], [1], [0, 0, 1, 1], [], []>} : vector<56x256xbf16>, vector<256x128xbf16>, vector<56x128xf32> -> vector<56x128xf32>
    %427 = vector.extract_strided_slice %0 {offsets = [11, 0], sizes = [1, 128], strides = [1, 1]} : vector<16x128xf32> to vector<1x128xf32>
    %428 = vector.broadcast %427 : vector<1x128xf32> to vector<56x128xf32>
    %429 = arith.addf %426, %428 : vector<56x128xf32>
    %430 = arith.addf %402, %429 : vector<56x128xf32>
    %431 = vector.extract_strided_slice %0 {offsets = [12, 0], sizes = [1, 128], strides = [1, 1]} : vector<16x128xf32> to vector<1x128xf32>
    %432 = vector.extract_strided_slice %0 {offsets = [13, 0], sizes = [1, 128], strides = [1, 1]} : vector<16x128xf32> to vector<1x128xf32>
    %cst_121 = arith.constant dense<0.000000e+00> : vector<56xf32>
    %433 = vector.multi_reduction <add>, %430, %cst_121 [1] : vector<56x128xf32> to vector<56xf32>
    %434 = vector.shape_cast %433 : vector<56xf32> to vector<56x1xf32>
    %cst_122 = arith.constant 1.280000e+02 : f32
    %435 = vector.broadcast %cst_122 : f32 to vector<56x1xf32>
    %436 = arith.divf %434, %435 : vector<56x1xf32>
    %437 = vector.broadcast %436 : vector<56x1xf32> to vector<56x128xf32>
    %438 = arith.subf %430, %437 : vector<56x128xf32>
    %439 = arith.mulf %438, %438 : vector<56x128xf32>
    %cst_123 = arith.constant dense<0.000000e+00> : vector<56xf32>
    %440 = vector.multi_reduction <add>, %439, %cst_123 [1] : vector<56x128xf32> to vector<56xf32>
    %441 = vector.shape_cast %440 : vector<56xf32> to vector<56x1xf32>
    %cst_124 = arith.constant 1.280000e+02 : f32
    %442 = vector.broadcast %cst_124 : f32 to vector<56x1xf32>
    %443 = arith.divf %441, %442 : vector<56x1xf32>
    %444 = vector.broadcast %436 : vector<56x1xf32> to vector<56x128xf32>
    %445 = arith.subf %430, %444 : vector<56x128xf32>
    %cst_125 = arith.constant 9.99999974E-6 : f32
    %446 = vector.broadcast %cst_125 : f32 to vector<56x1xf32>
    %447 = arith.addf %443, %446 : vector<56x1xf32>
    %448 = math.rsqrt %447 : vector<56x1xf32>
    %449 = vector.broadcast %448 : vector<56x1xf32> to vector<56x128xf32>
    %450 = arith.mulf %445, %449 : vector<56x128xf32>
    %451 = vector.broadcast %431 : vector<1x128xf32> to vector<56x128xf32>
    %452 = arith.mulf %450, %451 : vector<56x128xf32>
    %453 = vector.broadcast %432 : vector<1x128xf32> to vector<56x128xf32>
    %454 = arith.addf %452, %453 : vector<56x128xf32>
    %455 = vector.extract_strided_slice %454 {offsets = [0, 0], sizes = [14, 128], strides = [1, 1]} : vector<56x128xf32> to vector<14x128xf32>
    %cst_126 = arith.constant dense<0.000000e+00> : vector<128xf32>
    %456 = vector.multi_reduction <add>, %455, %cst_126 [0] : vector<14x128xf32> to vector<128xf32>
    %457 = vector.shape_cast %456 : vector<128xf32> to vector<1x128xf32>
    %458 = vector.extract_strided_slice %454 {offsets = [14, 0], sizes = [14, 128], strides = [1, 1]} : vector<56x128xf32> to vector<14x128xf32>
    %cst_127 = arith.constant dense<0.000000e+00> : vector<128xf32>
    %459 = vector.multi_reduction <add>, %458, %cst_127 [0] : vector<14x128xf32> to vector<128xf32>
    %460 = vector.shape_cast %459 : vector<128xf32> to vector<1x128xf32>
    %461 = vector.extract_strided_slice %454 {offsets = [28, 0], sizes = [14, 128], strides = [1, 1]} : vector<56x128xf32> to vector<14x128xf32>
    %cst_128 = arith.constant dense<0.000000e+00> : vector<128xf32>
    %462 = vector.multi_reduction <add>, %461, %cst_128 [0] : vector<14x128xf32> to vector<128xf32>
    %463 = vector.shape_cast %462 : vector<128xf32> to vector<1x128xf32>
    %464 = vector.extract_strided_slice %454 {offsets = [42, 0], sizes = [14, 128], strides = [1, 1]} : vector<56x128xf32> to vector<14x128xf32>
    %cst_129 = arith.constant dense<0.000000e+00> : vector<128xf32>
    %465 = vector.multi_reduction <add>, %464, %cst_129 [0] : vector<14x128xf32> to vector<128xf32>
    %466 = vector.shape_cast %465 : vector<128xf32> to vector<1x128xf32>
    %467 = tpu.concatenate %457, %460, %463, %466 in 0 : vector<1x128xf32>, vector<1x128xf32>, vector<1x128xf32>, vector<1x128xf32> -> vector<4x128xf32>
    %cst_130 = arith.constant 0.0714285746 : f32
    %468 = vector.broadcast %cst_130 : f32 to vector<4x128xf32>
    %469 = arith.mulf %467, %468 : vector<4x128xf32>
    %470 = arith.truncf %469 : vector<4x128xf32> to vector<4x128xbf16>
    %c1024 = arith.constant 1024 : index
    %c0_131 = arith.constant 0 : index
    %471 = vector.load %arg2[%c1024, %c0_131] : memref<1288x128xbf16, #tpu.memory_space<vmem>>, vector<128x128xbf16>
    %cst_132 = arith.constant dense<0.000000e+00> : vector<4x128xf32>
    %472 = tpu.matmul %470, %471, %cst_132 {dimension_numbers = #tpu.dot_dimension_numbers<[1], [0], [0], [1], [0, 0, 1, 1], [], []>} : vector<4x128xbf16>, vector<128x128xbf16>, vector<4x128xf32> -> vector<4x128xf32>
    %473 = vector.extract_strided_slice %0 {offsets = [14, 0], sizes = [1, 128], strides = [1, 1]} : vector<16x128xf32> to vector<1x128xf32>
    %474 = vector.broadcast %473 : vector<1x128xf32> to vector<4x128xf32>
    %475 = arith.addf %472, %474 : vector<4x128xf32>
    %cst_133 = arith.constant 0.000000e+00 : f32
    %476 = vector.broadcast %cst_133 : f32 to vector<4x128xf32>
    %477 = arith.maximumf %475, %476 : vector<4x128xf32>
    %478 = arith.truncf %477 : vector<4x128xf32> to vector<4x128xbf16>
    %c1152 = arith.constant 1152 : index
    %c0_134 = arith.constant 0 : index
    %479 = vector.load %arg2[%c1152, %c0_134] : memref<1288x128xbf16, #tpu.memory_space<vmem>>, vector<128x128xbf16>
    %cst_135 = arith.constant dense<0.000000e+00> : vector<4x128xf32>
    %480 = tpu.matmul %478, %479, %cst_135 {dimension_numbers = #tpu.dot_dimension_numbers<[1], [0], [0], [1], [0, 0, 1, 1], [], []>} : vector<4x128xbf16>, vector<128x128xbf16>, vector<4x128xf32> -> vector<4x128xf32>
    %481 = vector.extract_strided_slice %0 {offsets = [15, 0], sizes = [1, 128], strides = [1, 1]} : vector<16x128xf32> to vector<1x128xf32>
    %482 = vector.broadcast %481 : vector<1x128xf32> to vector<4x128xf32>
    %483 = arith.addf %480, %482 : vector<4x128xf32>
    %c0_136 = arith.constant 0 : index
    %c0_137 = arith.constant 0 : index
    %c0_138 = arith.constant 0 : index
    %484 = vector.load %arg5[%c0_136, %c0_137, %c0_138] : memref<1x4x128xf32, #tpu.memory_space<vmem>>, vector<1x4x128xf32>
    %485 = vector.shape_cast %484 : vector<1x4x128xf32> to vector<4x128xf32>
    %486 = vector.shape_cast %483 : vector<4x128xf32> to vector<1x4x128xf32>
    tpu.vector_store %arg5[%c0_136, %c0_137, %c0_138], %486 {strides = array<i32>} : memref<1x4x128xf32, #tpu.memory_space<vmem>>, vector<1x4x128xf32>,
    return
  }
  func.func @transform_0(%arg0: i32) -> (i32, i32, i32) {
    %c0_i32 = arith.constant 0 : i32
    %c0_i32_0 = arith.constant 0 : i32
    %c0_i32_1 = arith.constant 0 : i32
    return %arg0, %c0_i32, %c0_i32_0 : i32, i32, i32
  }
  func.func @transform_1(%arg0: i32) -> (i32, i32) {
    %c0_i32 = arith.constant 0 : i32
    %c0_i32_0 = arith.constant 0 : i32
    %c0_i32_1 = arith.constant 0 : i32
    return %c0_i32, %c0_i32_0 : i32, i32
  }
  func.func @transform_2(%arg0: i32) -> (i32, i32) {
    %c0_i32 = arith.constant 0 : i32
    %c0_i32_0 = arith.constant 0 : i32
    %c0_i32_1 = arith.constant 0 : i32
    return %c0_i32, %c0_i32_0 : i32, i32
  }
  func.func @transform_3(%arg0: i32) -> (i32, i32) {
    %c0_i32 = arith.constant 0 : i32
    %c0_i32_0 = arith.constant 0 : i32
    %c0_i32_1 = arith.constant 0 : i32
    return %c0_i32, %c0_i32_0 : i32, i32
  }
  func.func @transform_4(%arg0: i32) -> (i32, i32, i32) {
    %c0_i32 = arith.constant 0 : i32
    %c0_i32_0 = arith.constant 0 : i32
    %c0_i32_1 = arith.constant 0 : i32
    return %arg0, %c0_i32, %c0_i32_0 : i32, i32, i32
  }
}

</mosaic_0001>

<bundles_post_ra>
// kernel: wav2vec_classifier_forward.1
= control target key start
LH: loop header
LB: loop body
LE: loop exit
PB: predicated region body
PF: predicated region fallthrough
CT: control target
= control target key end

     0   :  { %s7589_s15 = smov 0   ;;  %s9259_s0 = inlined_call_operand.vmem [shape: f32[2,120,8], index: 0, kind: input, shape index: {}]   ;;  %s9260_s1 = inlined_call_operand.vmem [shape: bf16[1288,128], index: 1, kind: input, shape index: {}]   ;;  %s9261_s2 = inlined_call_operand.vmem [shape: bf16[128,640], index: 2, kind: input, shape index: {}]   ;;  %s9262_s3 = inlined_call_operand.vmem [shape: f32[16,128], index: 3, kind: input, shape index: {}]   ;;  %s9263_s4 = inlined_call_operand.vmem [shape: f32[2,4,128], index: 4, kind: output, shape index: {}]  }
   0x1 LB: > { %s6190_s16 = sadd.s32 4294967295, %s7556_s15   ;;  %p6194_p0 = scmp.ge.s32.totalorder %s7556_s15, 1  ;;  %s7556_s15 = sphi %s7589_s15, %s14_s15  }
   0x2   : > { %p162_p1 = scmp.lt.s32.totalorder %s7556_s15, 3 }
   0x4   : > { %p163_p2 = pnand %p6194_p0, %p162_p1 }
   0x5   : > { %p187_p3 = scmp.lt.s32.totalorder (!%p163_p2), %s6190_s16, 1  ;;  %s7559_s7 = smov (!%p163_p2), 96  }
   0x6   : > { %166 = sbr.rel (%p163_p2) target bundleno = 11130 (0x2b7a), region = 36  ;;  %s7560_s8 = smov (!%p163_p2), 64  }
   0x7   : > { %s7561_s9 = smov (!%p163_p2), 32  }
   0xb   : > { %v222_v0 = vld [vmem:[%s9260_s1 + $0x280] sm:$0xf]  ;;  %vm248_vm0 = vcmask 1043456   ;;  %s9265_s16 = smov (!%p187_p3, %s6190_s16), 1  ;;  %vm223_vm1 = vcmask 64512   ;;  %v7170_v25 = vld [vmem:[%s9260_s1 + $0xf8] sm:$0xff]  }
   0xc   : > { %7104 = vmatprep.subr.msk.bf16.mxu0 %vm248_vm0, %v222_v0  ;;  %v250_v1 = vsel %vm248_vm0, %v222_v0, 0  ;;  %s7105_s19 = smul.u32 120, %s9265_s16  ;;  %v7171_v26 = vld [vmem:[%s9260_s1 + $0xb8] sm:$0xff]   ;;  %v7174_v29 = vld [vmem:[%s9260_s1 + $0xf0] sm:$0xff]   ;;  %v7178_v33 = vld [vmem:[%s9260_s1 + $0xe8] sm:$0xff]   ;;  %vm556_vm2 = vcmask 1045504  }
   0xd   : > { %6751 = vmatpush3.bf16.msra.mxu0 %v250_v1  ;;  %v7172_v27 = vld [vmem:[%s9260_s1 + $0x78] sm:$0xff]   ;;  %v7175_v30 = vld [vmem:[%s9260_s1 + $0xb0] sm:$0xff]   ;;  %v7179_v34 = vld [vmem:[%s9260_s1 + $0xa8] sm:$0xff]   ;;  %vm486_vm3 = vcmask 1040384   ;;  %vm495_vm4 = vcmask 1046528   ;;  %vm565_vm5 = vcmask 1041408  }
   0xe   : > { %s191_s22 = scalar_lea.vmem %s9259_s0, %s7105_s19  ;;  %6488 = vmatprep.subr.bf16.mxu0 %v7170_v25  ;;  %v7173_v28 = vld [vmem:[%s9260_s1 + $0x38] sm:$0xff]   ;;  %6448 = vmatprep.subr.bf16.mxu1 %v7172_v27  ;;  %v7176_v31 = vld [vmem:[%s9260_s1 + $0x70] sm:$0xff]   ;;  %v7180_v35 = vld [vmem:[%s9260_s1 + $0x68] sm:$0xff]   ;;  %vm1585_vm6 = vcmask 261120   ;;  %vm1679_vm7 = vcmask 111616   ;;  %vm1675_vm8 = vcmask 113664  }
   0xf   : > { %v199_v2 = vld [vmem:[%s191_s22] sm:$0xff]  ;;  %v200_v3 = vld [vmem:[%s191_s22 + $0x8] sm:$0xff]  ;;  %v201_v4 = vld [vmem:[%s191_s22 + $0x10] sm:$0xff]  ;;  %6449 = vmatpush3.bf16.msra.mxu1 %v7173_v28  ;;  %vm2419_vm9 = vcmask 523264   ;;  %vm2422_vm10 = vcmask 785408   ;;  %vm7563_vm11 = vmmov 0  }
  0x10   : > { %v214_v5 = vpack.c.bf16 %v200_v3, %v199_v2  ;;  %v202_v6 = vld [vmem:[%s191_s22 + $0x18] sm:$0xff]  ;;  %v203_v7 = vld [vmem:[%s191_s22 + $0x20] sm:$0xff]  ;;  %v204_v8 = vld [vmem:[%s191_s22 + $0x28] sm:$0xff]  ;;  %6450 = vmatprep.subr.bf16.mxu1 %v7176_v31  ;;  %vm5914_vm12 = vcmask 1042432  }
  0x11   : > { %v215_v9 = vpack.c.bf16 %v202_v6, %v201_v4  ;;  %v216_v10 = vpack.c.bf16 %v204_v8, %v203_v7  ;;  %v205_v11 = vld [vmem:[%s191_s22 + $0x30] sm:$0xff]  ;;  %v206_v12 = vld [vmem:[%s191_s22 + $0x38] sm:$0xff]  ;;  %v207_v13 = vld [vmem:[%s191_s22 + $0x40] sm:$0xff] }
  0x12   : > { %6752 = vmatprep.mubr.msk.bf16.mxu0 %vm223_vm1, %v214_v5  ;;  %v208_v14 = vld [vmem:[%s191_s22 + $0x48] sm:$0xff]  ;;  %v217_v15 = vpack.c.bf16 %v206_v12, %v205_v11  ;;  %v209_v17 = vld [vmem:[%s191_s22 + $0x50] sm:$0xff]  ;;  %v210_v18 = vld [vmem:[%s191_s22 + $0x58] sm:$0xff] }
  0x13   : > { %6753 = vmatmul.mubr.msk.bf16.vlgmr.msra.gmra.mxu0 %vm223_vm1, %v215_v9  ;;  %v218_v16 = vpack.c.bf16 %v208_v14, %v207_v13  ;;  %v211_v19 = vld [vmem:[%s191_s22 + $0x60] sm:$0xff]  ;;  %v212_v20 = vld [vmem:[%s191_s22 + $0x68] sm:$0xff]  ;;  %v219_v21 = vpack.c.bf16 %v210_v18, %v209_v17  ;;  %v213_v23 = vld [vmem:[%s191_s22 + $0x70] sm:$0xff] }
  0x14   : > { %6756 = vmatprep.mubr.msk.bf16.mxu0 %vm223_vm1, %v216_v10  ;;  %v220_v22 = vpack.c.bf16 %v212_v20, %v211_v19  ;;  %v221_v24 = vpack.c.bf16 %v213_v23, %v213_v23  ;;  %6489 = vmatpush3.bf16.msra.mxu0 %v7171_v26  ;;  %v7177_v32 = vld [vmem:[%s9260_s1 + $0x30] sm:$0xff]   ;;  %v7181_v36 = vld [vmem:[%s9260_s1 + $0x28] sm:$0xff]   ;;  %v7182_v37 = vld [vmem:[%s9260_s1 + $0xe0] sm:$0xff]  }
  0x15   : > { %6490 = vmatprep.subr.bf16.mxu0 %v7174_v29  ;;  %6451 = vmatpush3.bf16.msra.mxu1 %v7177_v32  ;;  %v7183_v38 = vld [vmem:[%s9260_s1 + $0xa0] sm:$0xff]   ;;  %v7186_v41 = vld [vmem:[%s9260_s1 + $0xd8] sm:$0xff]   ;;  %v7190_v45 = vld [vmem:[%s9260_s1 + $0xd0] sm:$0xff]  }
  0x16   : > { %6452 = vmatprep.subr.bf16.mxu1 %v7180_v35  ;;  %v7184_v39 = vld [vmem:[%s9260_s1 + $0x60] sm:$0xff]   ;;  %v7187_v42 = vld [vmem:[%s9260_s1 + $0x98] sm:$0xff]   ;;  %v7191_v46 = vld [vmem:[%s9260_s1 + $0x90] sm:$0xff]  }
  0x17   : > { %v7185_v40 = vld [vmem:[%s9260_s1 + $0x20] sm:$0xff]   ;;  %v7188_v43 = vld [vmem:[%s9260_s1 + $0x58] sm:$0xff]   ;;  %v7192_v47 = vld [vmem:[%s9260_s1 + $0x50] sm:$0xff]  }
  0x18   : > { %6491 = vmatpush3.bf16.msra.mxu0 %v7175_v30  ;;  %v7189_v44 = vld [vmem:[%s9260_s1 + $0x18] sm:$0xff]   ;;  %v7193_v48 = vld [vmem:[%s9260_s1 + $0x10] sm:$0xff]   ;;  %v7194_v49 = vld [vmem:[%s9260_s1 + $0xc8] sm:$0xff]  }
  0x19   : > { %6492 = vmatprep.subr.bf16.mxu0 %v7178_v33  ;;  %6453 = vmatpush3.bf16.msra.mxu1 %v7181_v36  ;;  %v7195_v50 = vld [vmem:[%s9260_s1 + $0x88] sm:$0xff]   ;;  %v7198_v53 = vld [vmem:[%s9260_s1 + $0xc0] sm:$0xff]  }
  0x1a   : > { %6454 = vmatprep.subr.bf16.mxu1 %v7184_v39  ;;  %v7196_v51 = vld [vmem:[%s9260_s1 + $0x48] sm:$0xff]   ;;  %v7199_v54 = vld [vmem:[%s9260_s1 + $0x80] sm:$0xff]  }
  0x1b   : > { %6757 = vmatmul.mubr.msk.bf16.gmra.mxu0 %vm223_vm1, %v217_v15  ;;  %v7197_v52 = vld [vmem:[%s9260_s1 + $0x8] sm:$0xff]   ;;  %v7200_v55 = vld [vmem:[%s9260_s1 + $0x40] sm:$0xff]  }
  0x1c   : > { %6760 = vmatprep.mubr.msk.bf16.mxu0 %vm223_vm1, %v218_v16  ;;  %6493 = vmatpush3.bf16.msra.mxu0 %v7179_v34  ;;  %v7201_v56 = vld [vmem:[%s9260_s1] sm:$0xff]  }
  0x1d   : > { %6494 = vmatprep.subr.bf16.mxu0 %v7182_v37  ;;  %6455 = vmatpush3.bf16.msra.mxu1 %v7185_v40 }
  0x1e   : > { %6456 = vmatprep.subr.bf16.mxu1 %v7188_v43 }
  0x20   : > { %6495 = vmatpush3.bf16.msra.mxu0 %v7183_v38 }
  0x21   : > { %6496 = vmatprep.subr.bf16.mxu0 %v7186_v41  ;;  %6457 = vmatpush3.bf16.msra.mxu1 %v7189_v44 }
  0x22   : > { %6458 = vmatprep.subr.bf16.mxu1 %v7192_v47 }
  0x23   : > { %6761 = vmatmul.mubr.msk.bf16.gmra.mxu0 %vm223_vm1, %v219_v21 }
  0x24   : > { %6764 = vmatprep.mubr.msk.bf16.mxu0 %vm223_vm1, %v220_v22  ;;  %6497 = vmatpush3.bf16.msra.mxu0 %v7187_v42 }
  0x25   : > { %6498 = vmatprep.subr.bf16.mxu0 %v7190_v45  ;;  %6459 = vmatpush3.bf16.msra.mxu1 %v7193_v48 }
  0x26   : > { %6460 = vmatprep.subr.bf16.mxu1 %v7196_v51 }
  0x28   : > { %6499 = vmatpush3.bf16.msra.mxu0 %v7191_v46 }
  0x29   : > { %6500 = vmatprep.subr.bf16.mxu0 %v7194_v49  ;;  %6461 = vmatpush3.bf16.msra.mxu1 %v7197_v52 }
  0x2a   : > { %6462 = vmatprep.subr.bf16.mxu1 %v7200_v55 }
  0x2b   : > { %6765 = vmatmul.mubr.msk.bf16.gmra.mxu0 %vm223_vm1, %v221_v24 }
  0x2c   : > { %6501 = vmatpush3.bf16.msra.mxu0 %v7195_v50 }
  0x2d   : > { %6502 = vmatprep.subr.bf16.mxu0 %v7198_v53  ;;  %6463 = vmatpush3.bf16.msra.mxu1 %v7201_v56 }
  0x30   : > { %6503 = vmatpush3.bf16.msra.mxu0 %v7199_v54 }
  0xd3   : > { %v7712_v57 = vpop.f32.mrf.mxu0 }
  0xd4   : > { %v350_v58 = vmul.f32 %v7712_v57, %v7712_v57 }
  0xd5   : > { %v7716_v59 = vpop.f32.mrf.mxu0 }
  0xd6   : > { %v365_v60 = vmul.f32 %v7712_v57, %v350_v58  ;;  %v348_v61 = vmul.f32 %v7716_v59, %v7716_v59 }
  0xd7   : > { %v7721_v62 = vpop.f32.mrf.mxu0 }
  0xd8   : > { %v380_v63 = vmul.f32 0.044715, %v365_v60  ;;  %v363_v0 = vmul.f32 %v348_v61, %v7716_v59  ;;  %v351_v1 = vmul.f32 %v7721_v62, %v7721_v62 }
  0xd9   : > { %v7726_v2 = vpop.f32.mrf.mxu0 }
  0xda   : > { %v395_v3 = vadd.f32 %v7712_v57, %v380_v63  ;;  %v378_v4 = vmul.f32 0.044715, %v363_v0  ;;  %v366_v5 = vmul.f32 %v7721_v62, %v351_v1  ;;  %v349_v6 = vmul.f32 %v7726_v2, %v7726_v2 }
  0xdb   : > { %v7732_v7 = vpop.f32.mrf.mxu0 }
  0xdc   : > { %v393_v8 = vadd.f32 %v378_v4, %v7716_v59  ;;  %v381_v9 = vmul.f32 0.044715, %v366_v5  ;;  %v364_v10 = vmul.f32 %v349_v6, %v7726_v2  ;;  %v410_v11 = vmul.f32 0.7978846, %v395_v3 }
  0xdd   : > { %v354_v12 = vmul.f32 %v7732_v7, %v7732_v7  ;;  %v7738_v13 = vpop.f32.mrf.mxu0 }
  0xde   : > { %v408_v14 = vmul.f32 0.7978846, %v393_v8  ;;  %v396_v15 = vadd.f32 %v7721_v62, %v381_v9  ;;  %v379_v16 = vmul.f32 0.044715, %v364_v10  ;;  %v352_v18 = vmul.f32 %v7738_v13, %v7738_v13 }
  0xdf   : > { %v369_v17 = vmul.f32 %v7732_v7, %v354_v12  ;;  %v7744_v19 = vpop.f32.mrf.mxu0 }
  0xe0   : > { %7306 = vtanh.f32 %v408_v14  ;;  %v411_v20 = vmul.f32 0.7978846, %v396_v15  ;;  %v394_v21 = vadd.f32 %v379_v16, %v7726_v2  ;;  %v355_v22 = vmul.f32 %v7744_v19, %v7744_v19 }
  0xe1   : > { %7308 = vtanh.f32 %v410_v11  ;;  %v384_v23 = vmul.f32 0.044715, %v369_v17  ;;  %v367_v24 = vmul.f32 %v352_v18, %v7738_v13  ;;  %v7750_v25 = vpop.f32.mrf.mxu0 }
  0xe2   : > { %7310 = vtanh.f32 %v411_v20  ;;  %v409_v26 = vmul.f32 0.7978846, %v394_v21  ;;  %v370_v27 = vmul.f32 %v7744_v19, %v355_v22  ;;  %v353_v28 = vmul.f32 %v7750_v25, %v7750_v25 }
  0xe3   : > { %v399_v29 = vadd.f32 %v7732_v7, %v384_v23  ;;  %v382_v30 = vmul.f32 0.044715, %v367_v24  ;;  %v7756_v31 = vpop.f32.mrf.mxu0 }
  0xe4   : > { %7312 = vtanh.f32 %v409_v26  ;;  %v385_v32 = vmul.f32 0.044715, %v370_v27  ;;  %v368_v33 = vmul.f32 %v353_v28, %v7750_v25  ;;  %v358_v34 = vmul.f32 %v7756_v31, %v7756_v31 }
  0xe5   : > { %v414_v35 = vmul.f32 0.7978846, %v399_v29  ;;  %v397_v36 = vadd.f32 %v382_v30, %v7738_v13  ;;  %v7762_v37 = vpop.f32.mrf.mxu0 }
  0xe6   : > { %v400_v38 = vadd.f32 %v7744_v19, %v385_v32  ;;  %v383_v39 = vmul.f32 0.044715, %v368_v33  ;;  %v373_v40 = vmul.f32 %v7756_v31, %v358_v34  ;;  %v356_v41 = vmul.f32 %v7762_v37, %v7762_v37 }
  0xe7   : > { %7314 = vtanh.f32 %v414_v35  ;;  %v412_v42 = vmul.f32 0.7978846, %v397_v36  ;;  %v7768_v43 = vpop.f32.mrf.mxu0 }
  0xe8   : > { %v415_v44 = vmul.f32 0.7978846, %v400_v38  ;;  %v398_v45 = vadd.f32 %v383_v39, %v7750_v25  ;;  %v388_v46 = vmul.f32 0.044715, %v373_v40  ;;  %v371_v47 = vmul.f32 %v356_v41, %v7762_v37 }
  0xe9   : > { %7316 = vtanh.f32 %v412_v42  ;;  %v359_v48 = vmul.f32 %v7768_v43, %v7768_v43  ;;  %v7774_v49 = vpop.f32.mrf.mxu0 }
  0xea   : > { %7318 = vtanh.f32 %v415_v44  ;;  %v413_v50 = vmul.f32 0.7978846, %v398_v45  ;;  %v403_v51 = vadd.f32 %v7756_v31, %v388_v46  ;;  %v386_v52 = vmul.f32 0.044715, %v371_v47 }
  0xeb   : > { %v374_v53 = vmul.f32 %v7768_v43, %v359_v48  ;;  %v357_v54 = vmul.f32 %v7774_v49, %v7774_v49  ;;  %v7780_v55 = vpop.f32.mrf.mxu0 }
  0xec   : > { %7320 = vtanh.f32 %v413_v50  ;;  %v418_v56 = vmul.f32 0.7978846, %v403_v51  ;;  %v401_v58 = vadd.f32 %v386_v52, %v7762_v37  ;;  %v362_v0 = vmul.f32 %v7780_v55, %v7780_v55 }
  0xed   : > { %v7307_v60 = vpop.eup %7306  ;;  %v389_v61 = vmul.f32 0.044715, %v374_v53  ;;  %v372_v63 = vmul.f32 %v357_v54, %v7774_v49  ;;  %v7786_v1 = vpop.f32.mrf.mxu0 }
  0xee   : > { %v7309_v3 = vpop.eup %7308  ;;  %7322 = vtanh.f32 %v418_v56  ;;  %v416_v4 = vmul.f32 0.7978846, %v401_v58  ;;  %v377_v9 = vmul.f32 %v7780_v55, %v362_v0  ;;  %v360_v10 = vmul.f32 %v7786_v1, %v7786_v1 }
  0xef   : > { %v7311_v5 = vpop.eup %7310  ;;  %v404_v6 = vadd.f32 %v7768_v43, %v389_v61  ;;  %v387_v8 = vmul.f32 0.044715, %v372_v63  ;;  %v6767_v11 = vpop.f32.mrf.mxu0  ;;  %v438_v12 = vadd.f32 1.0, %v7307_v60  ;;  %v440_v22 = vadd.f32 1.0, %v7309_v3 }
  0xf0   : > { %v441_v14 = vadd.f32 1.0, %v7311_v5  ;;  %7324 = vtanh.f32 %v416_v4  ;;  %v392_v18 = vmul.f32 0.044715, %v377_v9  ;;  %v375_v20 = vmul.f32 %v360_v10, %v7786_v1 }
  0xf1   : > { %v7313_v15 = vpop.eup %7312  ;;  %v419_v16 = vmul.f32 0.7978846, %v404_v6  ;;  %v402_v17 = vadd.f32 %v387_v8, %v7774_v49  ;;  %v7794_v21 = vpop.f32.mrf.mxu0  ;;  %v453_v30 = vmul.f32 0.5, %v438_v12  ;;  %v455_v39 = vmul.f32 0.5, %v440_v22 }
  0xf2   : > { %v439_v23 = vadd.f32 1.0, %v7313_v15  ;;  %v361_v24 = vmul.f32 %v7794_v21, %v7794_v21  ;;  %v407_v27 = vadd.f32 %v7780_v55, %v392_v18  ;;  %v390_v28 = vmul.f32 0.044715, %v375_v20 }
  0xf3   : > { %7326 = vtanh.f32 %v419_v16  ;;  %v417_v26 = vmul.f32 0.7978846, %v402_v17  ;;  %v456_v34 = vmul.f32 0.5, %v441_v14  ;;  %v7804_v51 = vmul.f32 %v453_v30, %v7716_v59 }
  0xf4   : > { %v7315_v29 = vpop.eup %7314  ;;  %v454_v32 = vmul.f32 0.5, %v439_v23  ;;  %v376_v33 = vmul.f32 %v361_v24, %v7794_v21  ;;  %v422_v35 = vmul.f32 0.7978846, %v407_v27  ;;  %v405_v36 = vadd.f32 %v390_v28, %v7786_v1 }
  0xf5   : > { %7328 = vtanh.f32 %v417_v26  ;;  %v444_v42 = vadd.f32 1.0, %v7315_v29  ;;  %v471_v52 = vmul.f32 %v7721_v62, %v456_v34  ;;  %v470_v54 = vmul.f32 %v7712_v57, %v455_v39 }
  0xf6   : > { %v7317_v38 = vpop.eup %7316  ;;  %v391_v40 = vmul.f32 0.044715, %v376_v33  ;;  %7330 = vtanh.f32 %v422_v35  ;;  %v420_v45 = vmul.f32 0.7978846, %v405_v36  ;;  %v469_v46 = vmul.f32 %v454_v32, %v7726_v2 }
  0xf7   : > { %v7319_v41 = vpop.eup %7318  ;;  %v442_v44 = vadd.f32 1.0, %v7317_v38  ;;  %v459_v61 = vmul.f32 0.5, %v444_v42  ;;  %v496_v62 = vrot.slane %v7804_v51, 1  ;;  %v513_v4 = vrot.slane %v471_v52, 1 }
  0xf8   : > { %v445_v47 = vadd.f32 1.0, %v7319_v41  ;;  %v406_v48 = vadd.f32 %v391_v40, %v7794_v21  ;;  %7332 = vtanh.f32 %v420_v45  ;;  %v497_v0 = vrot.slane %v469_v46, 1 }
  0xf9   : > { %v7321_v50 = vpop.eup %7320  ;;  %v457_v53 = vmul.f32 0.5, %v442_v44  ;;  %v487_v5 = vrot.slane %v469_v46, 7  ;;  %v488_v9 = vrot.slane %v470_v54, 7  ;;  %v490_v10 = vrot.slane %v471_v52, 7 }
  0xfa   : > { %v443_v56 = vadd.f32 1.0, %v7321_v50  ;;  %v421_v58 = vmul.f32 0.7978846, %v406_v48  ;;  %v460_v63 = vmul.f32 0.5, %v445_v47  ;;  %v498_v18 = vsel %vm495_vm4, %v496_v62, %v497_v0 }
  0xfb   : > { %v7323_v60 = vpop.eup %7322  ;;  %v7809_v2 = vmul.f32 %v457_v53, %v7738_v13  ;;  %v474_v13 = vmul.f32 %v7732_v7, %v459_v61  ;;  %v489_v23 = vsel %vm486_vm3, %v487_v5, %v488_v9  ;;  %v557_v28 = vsel %vm556_vm2, %v469_v46, %v471_v52 }
  0xfc   : > { %v458_v59 = vmul.f32 0.5, %v443_v56  ;;  %7334 = vtanh.f32 %v421_v58  ;;  %v475_v12 = vmul.f32 %v7744_v19, %v460_v63  ;;  %v448_v14 = vadd.f32 1.0, %v7323_v60 }
  0xfd   : > { %v7325_v3 = vpop.eup %7324  ;;  %v514_v57 = vrot.slane %v7809_v2, 1  ;;  %v491_v19 = vsel %vm486_vm3, %v488_v9, %v490_v10  ;;  %v570_v41 = vpack.c.bf16 %v557_v28, %v7804_v51  ;;  %v505_v45 = vrot.slane %v474_v13, 7 }
  0xfe   : > { %v473_v6 = vmul.f32 %v458_v59, %v7750_v25  ;;  %v446_v8 = vadd.f32 1.0, %v7325_v3  ;;  %v463_v29 = vmul.f32 0.5, %v448_v14  ;;  %v533_v33 = vrot.slane %v475_v12, 1 }
  0xff   : > { %v515_v11 = vsel %vm495_vm4, %v513_v4, %v514_v57  ;;  %v507_v39 = vrot.slane %v475_v12, 7 }
 0x100   : > { %v7327_v15 = vpop.eup %7326  ;;  %v461_v16 = vmul.f32 0.5, %v446_v8  ;;  %v560_v17 = vsel %vm556_vm2, %v471_v52, %v473_v6  ;;  %v559_v20 = vsel %vm556_vm2, %v497_v0, %v515_v11  ;;  %v504_v24 = vrot.slane %v473_v6, 7 }
 0x101   : > { %v449_v22 = vadd.f32 1.0, %v7327_v15  ;;  %v573_v25 = vpack.c.bf16 %v560_v17, %v470_v54  ;;  %v572_v27 = vpack.c.bf16 %v559_v20, %v498_v18  ;;  %v516_v42 = vrot.slane %v473_v6, 1 }
 0x102   : > { %v7329_v26 = vpop.eup %7328  ;;  %v7822_v7 = vmul.f32 %v461_v16, %v7762_v37  ;;  %v558_v32 = vsel %vm556_vm2, %v491_v19, %v504_v24  ;;  %v478_v52 = vmul.f32 %v7756_v31, %v463_v29  ;;  %v508_v56 = vsel %vm486_vm3, %v505_v45, %v507_v39 }
 0x103   : > { %v447_v30 = vadd.f32 1.0, %v7329_v26  ;;  %938 = vmatprep.mubr.bf16.mxu0 %v573_v25  ;;  %v7331_v34 = vpop.eup %7330  ;;  %v464_v36 = vmul.f32 0.5, %v449_v22  ;;  %v571_v38 = vpack.c.bf16 %v558_v32, %v489_v23  ;;  %v517_v61 = vsel %vm495_vm4, %v514_v57, %v516_v42 }
 0x104   : > { %v534_v35 = vrot.slane %v7822_v7, 1  ;;  %939 = vmatmul.mubr.bf16.vlgmr.msra.gmra.mxu0 %v572_v27  ;;  %v452_v40 = vadd.f32 1.0, %v7331_v34  ;;  %v561_v3 = vsel %vm248_vm0, %v473_v6, %v475_v12  ;;  %v506_v62 = vsel %vm486_vm3, %v504_v24, %v505_v45 }
 0x105   : > { %v462_v37 = vmul.f32 0.5, %v447_v30  ;;  %v7333_v44 = vpop.eup %7332  ;;  %874 = vmatprep.mubr.bf16.mxu1 %v571_v38  ;;  %v479_v53 = vmul.f32 %v7768_v43, %v464_v36  ;;  %v574_v57 = vpack.c.bf16 %v561_v3, %v7809_v2 }
 0x106   : > { %v535_v46 = vsel %vm495_vm4, %v533_v33, %v534_v35  ;;  %v467_v48 = vmul.f32 0.5, %v452_v40  ;;  %v450_v50 = vadd.f32 1.0, %v7333_v44  ;;  %875 = vmatmul.mubr.bf16.vlgmr.msra.gmra.mxu1 %v570_v41 }
 0x107   : > { %v477_v47 = vmul.f32 %v462_v37, %v7774_v49  ;;  %v563_v54 = vsel %vm248_vm0, %v516_v42, %v535_v46  ;;  %v527_v9 = vrot.slane %v479_v53, 7  ;;  %v549_v11 = vrot.slane %v479_v53, 1 }
 0x108   : > { %v465_v58 = vmul.f32 0.5, %v450_v50  ;;  %v482_v49 = vmul.f32 %v7780_v55, %v467_v48  ;;  %v576_v43 = vpack.c.bf16 %v563_v54, %v517_v61 }
 0x109   : > { %v7335_v51 = vpop.eup %7334  ;;  %v564_v60 = vsel %vm248_vm0, %v475_v12, %v477_v47  ;;  %v524_v63 = vrot.slane %v477_v47, 7  ;;  %v536_v55 = vrot.slane %v477_v47, 1  ;;  %v566_v22 = vsel %vm565_vm5, %v477_v47, %v479_v53 }
 0x10a   : > { %v451_v0 = vadd.f32 1.0, %v7335_v51  ;;  %v577_v59 = vpack.c.bf16 %v564_v60, %v474_v13  ;;  %v480_v31 = vmul.f32 %v465_v58, %v7786_v1  ;;  %v525_v13 = vrot.slane %v478_v52, 7 }
 0x10b   : > { %v562_v4 = vsel %vm248_vm0, %v508_v56, %v524_v63  ;;  %v544_v14 = vrot.slane %v482_v49, 7  ;;  %v537_v2 = vsel %vm495_vm4, %v534_v35, %v536_v55  ;;  %v585_v23 = vpack.c.bf16 %v482_v49, %v482_v49 }
 0x10c   : > { %v466_v5 = vmul.f32 0.5, %v451_v0  ;;  %946 = vmatprep.mubr.bf16.mxu0 %v577_v59  ;;  %v575_v8 = vpack.c.bf16 %v562_v4, %v506_v62  ;;  %v550_v10 = vrot.slane %v480_v31, 1  ;;  %v528_v16 = vsel %vm486_vm3, %v525_v13, %v527_v9 }
 0x10d   : > { %947 = vmatmul.mubr.bf16.gmra.mxu0 %v576_v43  ;;  %v526_v20 = vsel %vm486_vm3, %v524_v63, %v525_v13  ;;  %v578_v28 = vpack.c.bf16 %v566_v22, %v7822_v7  ;;  %v582_v32 = vpack.c.bf16 %v480_v31, %v480_v31 }
 0x10e   : > { %v481_v6 = vmul.f32 %v466_v5, %v7794_v21  ;;  %882 = vmatprep.mubr.bf16.mxu1 %v575_v8  ;;  %v551_v1 = vsel %vm495_vm4, %v549_v11, %v550_v10 }
 0x10f   : > { %883 = vmatmul.mubr.bf16.gmra.mxu1 %v574_v57  ;;  %v568_v15 = vsel %vm565_vm5, %v536_v55, %v551_v1 }
 0x110   : > { %v569_v12 = vsel %vm565_vm5, %v479_v53, %v481_v6  ;;  %v543_v17 = vrot.slane %v481_v6, 7  ;;  %v552_v24 = vrot.slane %v481_v6, 1  ;;  %v580_v26 = vpack.c.bf16 %v568_v15, %v537_v2 }
 0x111   : > { %v581_v18 = vpack.c.bf16 %v569_v12, %v478_v52 }
 0x112   : > { %v567_v21 = vsel %vm565_vm5, %v528_v16, %v543_v17  ;;  %v545_v25 = vsel %vm486_vm3, %v543_v17, %v544_v14  ;;  %v553_v29 = vsel %vm495_vm4, %v550_v10, %v552_v24 }
 0x113   : > { %954 = vmatprep.mubr.bf16.mxu0 %v581_v18  ;;  %v579_v27 = vpack.c.bf16 %v567_v21, %v526_v20  ;;  %v583_v19 = vpack.c.bf16 %v545_v25, %v545_v25  ;;  %v584_v30 = vpack.c.bf16 %v553_v29, %v553_v29 }
 0x115   : > { %955 = vmatmul.mubr.bf16.gmra.mxu0 %v580_v26  ;;  %890 = vmatprep.mubr.bf16.mxu1 %v579_v27 }
 0x116   : > { %962 = vmatprep.mubr.bf16.mxu0 %v585_v23 }
 0x117   : > { %891 = vmatmul.mubr.bf16.gmra.mxu1 %v578_v28 }
 0x118   : > { %898 = vmatprep.mubr.bf16.mxu1 %v583_v19 }
 0x11d   : > { %963 = vmatmul.mubr.bf16.gmra.mxu0 %v584_v30 }
 0x11f   : > { %899 = vmatmul.mubr.bf16.gmra.mxu1 %v582_v32 }
 0x1c4   : > { %v6504_v33 = vpop.f32.mrf.mxu0 }
 0x1c6   : > { %v6505_v34 = vpop.f32.mrf.mxu0  ;;  %v6464_v35 = vpop.f32.mrf.mxu1 }
 0x1c7   : > { %v6506_v39 = vadd.f32 %v6505_v34, %v6504_v33 }
 0x1c8   : > { %v6507_v36 = vpop.f32.mrf.mxu0  ;;  %v6465_v38 = vpop.f32.mrf.mxu1 }
 0x1c9   : > { %v6466_v37 = vadd.f32 %v6465_v38, %v6464_v35 }
 0x1ca   : > { %v6508_v40 = vpop.f32.mrf.mxu0  ;;  %v6467_v41 = vpop.f32.mrf.mxu1 }
 0x1cb   : > { %v7855_v42 = vadd.f32 %v6506_v39, %v6466_v37  ;;  %v6509_v46 = vadd.f32 %v6508_v40, %v6507_v36 }
 0x1cc   : > { %v6468_v7 = vpop.f32.mrf.mxu1 }
 0x1cd   : > { %v6510_v44 = vpop.f32.mrf.mxu0  ;;  %v970_v45 = vmul.f32 %v7855_v42, %v7855_v42  ;;  %v6469_v47 = vadd.f32 %v6468_v7, %v6467_v41 }
 0x1cf   : > { %v6470_v48 = vpop.f32.mrf.mxu1  ;;  %v6511_v50 = vpop.f32.mrf.mxu0  ;;  %v977_v52 = vmul.f32 %v970_v45, %v7855_v42  ;;  %v7860_v53 = vadd.f32 %v6509_v46, %v6469_v47 }
 0x1d0   : > { %v6512_v58 = vadd.f32 %v6511_v50, %v6510_v44 }
 0x1d1   : > { %v6471_v54 = vpop.f32.mrf.mxu1  ;;  %v6513_v56 = vpop.f32.mrf.mxu0  ;;  %v971_v51 = vmul.f32 %v7860_v53, %v7860_v53  ;;  %v984_v61 = vmul.f32 0.044715, %v977_v52 }
 0x1d2   : > { %v6472_v60 = vadd.f32 %v6471_v54, %v6470_v48 }
 0x1d3   : > { %v6473_v63 = vpop.f32.mrf.mxu1  ;;  %v6514_v49 = vpop.f32.mrf.mxu0  ;;  %v978_v0 = vmul.f32 %v971_v51, %v7860_v53  ;;  %v991_v3 = vadd.f32 %v984_v61, %v7855_v42 }
 0x1d4   : > { %v7865_v59 = vadd.f32 %v6512_v58, %v6472_v60  ;;  %v6515_v31 = vadd.f32 %v6514_v49, %v6513_v56 }
 0x1d5   : > { %v6474_v43 = vpop.f32.mrf.mxu1  ;;  %v6516_v62 = vpop.f32.mrf.mxu0  ;;  %v998_v8 = vmul.f32 0.7978846, %v991_v3  ;;  %v985_v9 = vmul.f32 0.044715, %v978_v0 }
 0x1d6   : > { %v972_v4 = vmul.f32 %v7865_v59, %v7865_v59  ;;  %v6475_v5 = vadd.f32 %v6474_v43, %v6473_v63 }
 0x1d7   : > { %v6476_v10 = vpop.f32.mrf.mxu1  ;;  %v6517_v57 = vpop.f32.mrf.mxu0  ;;  %7336 = vtanh.f32 %v998_v8  ;;  %v992_v1 = vadd.f32 %v985_v9, %v7860_v53 }
 0x1d8   : > { %v979_v55 = vmul.f32 %v972_v4, %v7865_v59  ;;  %v952_v11 = vadd.f32 %v6515_v31, %v6475_v5  ;;  %v6518_v13 = vadd.f32 %v6517_v57, %v6516_v62 }
 0x1d9   : > { %v6477_v14 = vpop.f32.mrf.mxu1  ;;  %v6519_v6 = vpop.f32.mrf.mxu0  ;;  %v999_v2 = vmul.f32 0.7978846, %v992_v1 }
 0x1da   : > { %v973_v12 = vmul.f32 %v952_v11, %v952_v11  ;;  %v6478_v15 = vadd.f32 %v6477_v14, %v6476_v10  ;;  %v986_v16 = vmul.f32 0.044715, %v979_v55 }
 0x1db   : > { %v6479_v17 = vpop.f32.mrf.mxu1  ;;  %v6520_v18 = vpop.f32.mrf.mxu0  ;;  %7338 = vtanh.f32 %v999_v2 }
 0x1dc   : > { %v980_v20 = vmul.f32 %v973_v12, %v952_v11  ;;  %v7872_v22 = vadd.f32 %v6518_v13, %v6478_v15  ;;  %v6521_v21 = vadd.f32 %v6520_v18, %v6519_v6  ;;  %v993_v25 = vadd.f32 %v986_v16, %v7865_v59 }
 0x1dd   : > { %v6480_v23 = vpop.f32.mrf.mxu1  ;;  %v6522_v24 = vpop.f32.mrf.mxu0 }
 0x1de   : > { %v6481_v26 = vadd.f32 %v6480_v23, %v6479_v17  ;;  %v1000_v27 = vmul.f32 0.7978846, %v993_v25  ;;  %v987_v19 = vmul.f32 0.044715, %v980_v20 }
 0x1df   : > { %v6482_v28 = vpop.f32.mrf.mxu1  ;;  %v6523_v29 = vpop.f32.mrf.mxu0 }
 0x1e0   : > { %v7875_v30 = vadd.f32 %v6521_v21, %v6481_v26  ;;  %7340 = vtanh.f32 %v1000_v27  ;;  %v994_v32 = vadd.f32 %v987_v19, %v952_v11  ;;  %v6524_v34 = vadd.f32 %v6523_v29, %v6522_v24 }
 0x1e1   : > { %v6483_v33 = vpop.f32.mrf.mxu1  ;;  %v6525_v35 = vpop.f32.mrf.mxu0 }
 0x1e2   : > { %v1001_v36 = vmul.f32 0.7978846, %v994_v32  ;;  %v6484_v38 = vadd.f32 %v6483_v33, %v6482_v28 }
 0x1e3   : > { %v6485_v39 = vpop.f32.mrf.mxu1  ;;  %v6526_v37 = vpop.f32.mrf.mxu0 }
 0x1e4   : > { %7342 = vtanh.f32 %v1001_v36  ;;  %v7877_v40 = vadd.f32 %v6524_v34, %v6484_v38  ;;  %v7337_v41 = vpop.eup %7336  ;;  %v7202_v37 = vld [vmem:[%s9260_s1 + $0x138] sm:$0xff]  }
 0x1e5   : > { %v6486_v7 = vpop.f32.mrf.mxu1  ;;  %v1012_v44 = vadd.f32 1.0, %v7337_v41  ;;  %6768 = vmatprep.subr.bf16.mxu1 %v7202_v37  ;;  %v7203_v41 = vld [vmem:[%s9260_s1 + $0x130] sm:$0xff]  }
 0x1e6   : > { %v976_v0 = vmul.f32 %v7877_v40, %v7877_v40  ;;  %6769 = vmatpush3.bf16.msra.mxu1 %v7202_v37  ;;  %v7207_v7 = vld [vmem:[%s9260_s1 + $0x110] sm:$0xff]  }
 0x1e7   : > { %v1019_v45 = vmul.f32 0.5, %v1012_v44  ;;  %6770 = vmatprep.subr.bf16.mxu1 %v7203_v41  ;;  %v7208_v44 = vld [vmem:[%s9260_s1 + $0x108] sm:$0xff]   ;;  %v7221_v37 = vld [vmem:[%s9261_s2 + $0xd0] ss:$20 sps:$4 sm:$0xff]  }
 0x1e8   : > { %v7339_v46 = vpop.eup %7338  ;;  %v983_v31 = vmul.f32 %v976_v0, %v7877_v40 }
 0x1e9   : > { %v1026_v47 = vmul.f32 %v1019_v45, %v7855_v42  ;;  %v1013_v48 = vadd.f32 1.0, %v7339_v46  ;;  %v974_v42 = vmul.f32 %v7872_v22, %v7872_v22  ;;  %v7209_v45 = vld [vmem:[%s9260_s1 + $0x100] sm:$0xff]  }
 0x1ea   : > { %v990_v62 = vmul.f32 0.044715, %v983_v31  ;;  %6771 = vmatpush3.bf16.msra.mxu1 %v7203_v41  ;;  %v7218_v41 = vld [vmem:[%s9261_s2 + $0xc8] ss:$20 sps:$4 sm:$0xff]  }
 0x1eb   : > { %1033 = vadd.xlane.f32.xlu0 %v1026_v47  ;;  %v1020_v52 = vmul.f32 0.5, %v1013_v48  ;;  %v981_v3 = vmul.f32 %v974_v42, %v7872_v22 }
 0x1ec   : > { %v997_v8 = vadd.f32 %v990_v62, %v7877_v40 }
 0x1ed   : > { %v7341_v50 = vpop.eup %7340  ;;  %v1027_v56 = vmul.f32 %v1020_v52, %v7860_v53  ;;  %v975_v53 = vmul.f32 %v7875_v30, %v7875_v30  ;;  %v988_v43 = vmul.f32 0.044715, %v981_v3 }
 0x1ee   : > { %v1014_v54 = vadd.f32 1.0, %v7341_v50  ;;  %v1004_v57 = vmul.f32 0.7978846, %v997_v8  ;;  %v7947_v8 = vld [vmem:[%s9262_s3] sm:$0xff] }
 0x1ef   : > { %1035 = vadd.xlane.f32.xlu0 %v1027_v56  ;;  %v995_v4 = vadd.f32 %v988_v43, %v7872_v22 }
 0x1f0   : > { %v1021_v51 = vmul.f32 0.5, %v1014_v54 }
 0x1f1   : > { %v7343_v58 = vpop.eup %7342  ;;  %v1002_v9 = vmul.f32 0.7978846, %v995_v4 }
 0x1f2   : > { %v1028_v60 = vmul.f32 %v1021_v51, %v7865_v59  ;;  %v1015_v61 = vadd.f32 1.0, %v7343_v58  ;;  %v982_v59 = vmul.f32 %v975_v53, %v7875_v30  ;;  %v1111_v51 = vlaneseq }
 0x1f3   : > { %7344 = vtanh.f32 %v1002_v9 }
 0x1f4   : > { %1037 = vadd.xlane.f32.xlu1 %v1028_v60  ;;  %v1022_v63 = vmul.f32 0.5, %v1015_v61  ;;  %v989_v5 = vmul.f32 0.044715, %v982_v59  ;;  %7346 = vtanh.f32 %v1004_v57 }
 0x1f6   : > { %v1029_v49 = vmul.f32 %v1022_v63, %v952_v11  ;;  %v996_v10 = vadd.f32 %v989_v5, %v7875_v30 }
 0x1f8   : > { %1039 = vadd.xlane.f32.xlu1 %v1029_v49  ;;  %v1003_v55 = vmul.f32 0.7978846, %v996_v10 }
 0x1fa   : > { %7348 = vtanh.f32 %v1003_v55 }
 0x200   : > { %v7345_v12 = vpop.eup %7344 }
 0x201   : > { %v7347_v16 = vpop.eup %7346  ;;  %v1016_v20 = vadd.f32 1.0, %v7345_v12 }
 0x202   : > { %v1018_v24 = vadd.f32 1.0, %v7347_v16 }
 0x203   : > { %v1023_v28 = vmul.f32 0.5, %v1016_v20 }
 0x204   : > { %v1025_v33 = vmul.f32 0.5, %v1018_v24 }
 0x205   : > { %v1030_v35 = vmul.f32 %v1023_v28, %v7872_v22  ;;  %v7204_v22 = vld [vmem:[%s9260_s1 + $0x128] sm:$0xff]  }
 0x206   : > { %v1032_v38 = vmul.f32 %v1025_v33, %v7877_v40  ;;  %6772 = vmatprep.subr.bf16.mxu1 %v7204_v22  ;;  %v7206_v40 = vld [vmem:[%s9260_s1 + $0x118] sm:$0xff]  }
 0x207   : > { %v7349_v21 = vpop.eup %7348  ;;  %6773 = vmatpush3.bf16.msra.mxu1 %v7204_v22  ;;  %v7224_v22 = vld [vmem:[%s9261_s2 + $0xa4] ss:$20 sps:$4 sm:$0xff]  }
 0x208   : > { %v1017_v29 = vadd.f32 1.0, %v7349_v21 }
 0x20a   : > { %v1024_v36 = vmul.f32 0.5, %v1017_v29 }
 0x20c   : > { %v1031_v39 = vmul.f32 %v1024_v36, %v7875_v30  ;;  %v7205_v30 = vld [vmem:[%s9260_s1 + $0x120] sm:$0xff]   ;;  %v7217_v36 = vld [vmem:[%s9261_s2 + $0xf8] ss:$20 sps:$4 sm:$0xff]  }
 0x20d   : > { %6774 = vmatprep.subr.bf16.mxu1 %v7205_v30 }
 0x20e   : > { %6775 = vmatpush3.bf16.msra.mxu1 %v7205_v30  ;;  %v7225_v30 = vld [vmem:[%s9261_s2 + $0xa8] ss:$20 sps:$4 sm:$0xff]  }
 0x20f   : > { %6776 = vmatprep.subr.bf16.mxu1 %v7206_v40 }
 0x212   : > { %6777 = vmatpush3.bf16.msra.mxu1 %v7206_v40  ;;  %v7222_v40 = vld [vmem:[%s9261_s2 + $0xa0] ss:$20 sps:$4 sm:$0xff]  }
 0x213   : > { %6778 = vmatprep.subr.bf16.mxu1 %v7207_v7 }
 0x216   : > { %6779 = vmatpush3.bf16.msra.mxu1 %v7207_v7  ;;  %v7228_v7 = vld [vmem:[%s9261_s2 + $0x7c] ss:$20 sps:$4 sm:$0xff]  }
 0x217   : > { %6780 = vmatprep.subr.bf16.mxu1 %v7208_v44 }
 0x21a   : > { %6781 = vmatpush3.bf16.msra.mxu1 %v7208_v44  ;;  %v7229_v44 = vld [vmem:[%s9261_s2 + $0x80] ss:$20 sps:$4 sm:$0xff]  }
 0x21b   : > { %6782 = vmatprep.subr.bf16.mxu1 %v7209_v45 }
 0x21e   : > { %6783 = vmatpush3.bf16.msra.mxu1 %v7209_v45  ;;  %v7226_v45 = vld [vmem:[%s9261_s2 + $0x78] ss:$20 sps:$4 sm:$0xff]  }
 0x274   : > { %v1034_v11 = vpop.xlane.xlu0 %1033 }
 0x275   : > { %v1048_v13 = vmul.f32 0.0078125, %v1034_v11 }
 0x277   : > { %v7894_v14 = vsub.f32 %v1026_v47, %v1048_v13 }
 0x278   : > { %v1036_v6 = vpop.xlane.xlu0 %1035 }
 0x279   : > { %v1062_v1 = vmul.f32 %v7894_v14, %v7894_v14  ;;  %v1049_v15 = vmul.f32 0.0078125, %v1036_v6 }
 0x27b   : > { %1069 = vadd.xlane.f32.xlu0 %v1062_v1  ;;  %v7898_v18 = vsub.f32 %v1027_v56, %v1049_v15 }
 0x27d   : > { %v1038_v17 = vpop.xlane.xlu1 %1037  ;;  %v1063_v25 = vmul.f32 %v7898_v18, %v7898_v18 }
 0x27e   : > { %v1050_v2 = vmul.f32 0.0078125, %v1038_v17 }
 0x27f   : > { %1071 = vadd.xlane.f32.xlu1 %v1063_v25 }
 0x280   : > { %v7902_v23 = vsub.f32 %v1028_v60, %v1050_v2 }
 0x281   : > { %v1040_v26 = vpop.xlane.xlu1 %1039 }
 0x282   : > { %v1051_v27 = vmul.f32 0.0078125, %v1040_v26  ;;  %v1064_v19 = vmul.f32 %v7902_v23, %v7902_v23 }
 0x284   : > { %1073 = vadd.xlane.f32.xlu0 %v1064_v19  ;;  %v7906_v32 = vsub.f32 %v1029_v49, %v1051_v27  ;;  %v7937_v49 = vshrl.u32 %v1111_v51, 7  ;;  %v7240_v51 = vld [vmem:[%s9261_s2 + $0x4] ss:$20 sps:$4 sm:$0xff]  }
 0x286   : > { %v1065_v34 = vmul.f32 %v7906_v32, %v7906_v32  ;;  %v1113_v43 = vsub.s32 0, %v7937_v49  ;;  %v7960_v13 = vsub.s32 1, %v7937_v49 }
 0x288   : > { %1075 = vadd.xlane.f32.xlu1 %v1065_v34  ;;  %1041 = vadd.xlane.f32.xlu0 %v1030_v35  ;;  %v7957_v11 = vrot.slane %v7947_v8, %v1113_v43  ;;  %v7970_v16 = vrot.slane %v7947_v8, %v7960_v13  ;;  %v7212_v34 = vld [vmem:[%s9261_s2 + $0x11c] ss:$20 sps:$4 sm:$0xff]  }
 0x289   : > { %1450 = vmatprep.subr.bf16.mxu0 %v7212_v34 }
 0x28c   : > { %1043 = vadd.xlane.f32.xlu1 %v1031_v39  ;;  %1045 = vadd.xlane.f32.xlu0 %v1032_v38 }
 0x304   : > { %v1070_v46 = vpop.xlane.xlu0 %1069 }
 0x305   : > { %v1083_v47 = vmul.f32 0.0078125, %v1070_v46  ;;  %v7232_v46 = vld [vmem:[%s9261_s2 + $0x54] ss:$20 sps:$4 sm:$0xff]  }
 0x307   : > { %v1090_v48 = vadd.f32 1e-05, %v1083_v47  ;;  %v7230_v47 = vld [vmem:[%s9261_s2 + $0x50] ss:$20 sps:$4 sm:$0xff]  }
 0x308   : > { %v1072_v50 = vpop.xlane.xlu1 %1071 }
 0x309   : > { %7350 = vrsqrt.f32 %v1090_v48  ;;  %v1084_v52 = vmul.f32 0.0078125, %v1072_v50  ;;  %v7233_v48 = vld [vmem:[%s9261_s2 + $0x58] ss:$20 sps:$4 sm:$0xff]   ;;  %v7234_v50 = vld [vmem:[%s9261_s2 + $0x28] ss:$20 sps:$4 sm:$0xff]  }
 0x30b   : > { %v1091_v54 = vadd.f32 1e-05, %v1084_v52  ;;  %v7236_v52 = vld [vmem:[%s9261_s2 + $0x2c] ss:$20 sps:$4 sm:$0xff]  }
 0x30d   : > { %v1074_v56 = vpop.xlane.xlu0 %1073  ;;  %7352 = vrsqrt.f32 %v1091_v54  ;;  %v7237_v54 = vld [vmem:[%s9261_s2 + $0x30] ss:$20 sps:$4 sm:$0xff]  }
 0x30e   : > { %v1085_v58 = vmul.f32 0.0078125, %v1074_v56  ;;  %v7238_v56 = vld [vmem:[%s9261_s2] ss:$20 sps:$4 sm:$0xff]  }
 0x310   : > { %v1092_v60 = vadd.f32 1e-05, %v1085_v58  ;;  %v7241_v58 = vld [vmem:[%s9261_s2 + $0x8] ss:$20 sps:$4 sm:$0xff]  }
 0x311   : > { %v1076_v61 = vpop.xlane.xlu1 %1075  ;;  %v1042_v63 = vpop.xlane.xlu0 %1041 }
 0x312   : > { %7354 = vrsqrt.f32 %v1092_v60  ;;  %v1086_v42 = vmul.f32 0.0078125, %v1076_v61  ;;  %v1052_v0 = vmul.f32 0.0078125, %v1042_v63  ;;  %v7558_v60 = vmov 0  }
 0x313   : > { %1482 = vmatprep.mubr.bf16.mxu0 %v7558_v60 }
 0x314   : > { %v1093_v3 = vadd.f32 1e-05, %v1086_v42  ;;  %v7939_v53 = vsub.f32 %v1030_v35, %v1052_v0  ;;  %v7216_v35 = vld [vmem:[%s9261_s2 + $0xf4] ss:$20 sps:$4 sm:$0xff]  }
 0x315   : > { %v1044_v31 = vpop.xlane.xlu1 %1043  ;;  %v1046_v59 = vpop.xlane.xlu0 %1045 }
 0x316   : > { %7356 = vrsqrt.f32 %v1093_v3  ;;  %v1053_v62 = vmul.f32 0.0078125, %v1044_v31  ;;  %v1054_v4 = vmul.f32 0.0078125, %v1046_v59  ;;  %v1066_v5 = vmul.f32 %v7939_v53, %v7939_v53  ;;  %v7351_v9 = vpop.eup %7350 }
 0x317   : > { %v1104_v55 = vmul.f32 %v7351_v9, %v7894_v14 }
 0x318   : > { %1077 = vadd.xlane.f32.xlu1 %v1066_v5  ;;  %v7949_v10 = vsub.f32 %v1031_v39, %v1053_v62  ;;  %v7951_v57 = vsub.f32 %v1032_v38, %v1054_v4  ;;  %v7214_v38 = vld [vmem:[%s9261_s2 + $0xf0] ss:$20 sps:$4 sm:$0xff]   ;;  %v7220_v39 = vld [vmem:[%s9261_s2 + $0xcc] ss:$20 sps:$4 sm:$0xff]  }
 0x319   : > { %v1115_v14 = vmul.f32 %v7957_v11, %v1104_v55 }
 0x31a   : > { %v1067_v6 = vmul.f32 %v7949_v10, %v7949_v10  ;;  %v1068_v1 = vmul.f32 %v7951_v57, %v7951_v57  ;;  %v7353_v12 = vpop.eup %7352 }
 0x31b   : > { %v1105_v15 = vmul.f32 %v7353_v12, %v7898_v18  ;;  %v1126_v21 = vadd.f32 %v7970_v16, %v1115_v14 }
 0x31c   : > { %1079 = vadd.xlane.f32.xlu0 %v1067_v6  ;;  %1081 = vadd.xlane.f32.xlu1 %v1068_v1 }
 0x31d   : > { %v1116_v2 = vmul.f32 %v7957_v11, %v1105_v15 }
 0x31f   : > { %v7355_v17 = vpop.eup %7354  ;;  %v1127_v25 = vadd.f32 %v7970_v16, %v1116_v2 }
 0x320   : > { %v1106_v20 = vmul.f32 %v7355_v17, %v7902_v23  ;;  %v7210_v23 = vld [vmem:[%s9261_s2 + $0x118] ss:$20 sps:$4 sm:$0xff]  }
 0x321   : > { %v1133_v26 = vpack.c.bf16 %v1127_v25, %v1126_v21  ;;  %1451 = vmatpush1.bf16.msra.mxu0 %v7210_v23 }
 0x322   : > { %v1117_v18 = vmul.f32 %v7957_v11, %v1106_v20  ;;  %1452 = vmatprep.subr.bf16.mxu0 %v7216_v35 }
 0x323   : > { %v7357_v24 = vpop.eup %7356  ;;  %6784 = vmatprep.mubr.bf16.mxu1 %v1133_v26 }
 0x324   : > { %v1107_v27 = vmul.f32 %v7357_v24, %v7906_v32  ;;  %v1128_v28 = vadd.f32 %v7970_v16, %v1117_v18  ;;  %v7213_v32 = vld [vmem:[%s9261_s2 + $0x120] ss:$20 sps:$4 sm:$0xff]  }
 0x325   : > { %6792 = vmatprep.subr.bf16.mxu1 %v7213_v32  ;;  %1453 = vmatpush1.bf16.msra.mxu0 %v7214_v38 }
 0x326   : > { %v1118_v19 = vmul.f32 %v7957_v11, %v1107_v27  ;;  %1454 = vmatprep.subr.bf16.mxu0 %v7220_v39 }
 0x328   : > { %v1129_v29 = vadd.f32 %v7970_v16, %v1118_v19 }
 0x329   : > { %1455 = vmatpush1.bf16.msra.mxu0 %v7218_v41 }
 0x32a   : > { %v1134_v33 = vpack.c.bf16 %v1129_v29, %v1128_v28  ;;  %1456 = vmatprep.subr.bf16.mxu0 %v7224_v22  ;;  %v8091_v22 = vsub.s32 3, %v7937_v49 }
 0x32c   : > { %6785 = vmatmul.mubr.bf16.vlgmr.msra.gmra.mxu1 %v1134_v33 }
 0x32d   : > { %6793 = vmatpush3.bf16.msra.mxu1 %v7213_v32  ;;  %1457 = vmatpush1.bf16.msra.mxu0 %v7222_v40  ;;  %v1308_v40 = vrot.slane %v7947_v8, 2 }
 0x32e   : > { %6794 = vmatprep.subr.bf16.mxu1 %v7217_v36  ;;  %1458 = vmatprep.subr.bf16.mxu0 %v7228_v7  ;;  %v8097_v7 = vrot.slane %v7947_v8, %v8091_v22 }
 0x331   : > { %6795 = vmatpush3.bf16.msra.mxu1 %v7217_v36  ;;  %1459 = vmatpush1.bf16.msra.mxu0 %v7226_v45 }
 0x332   : > { %6796 = vmatprep.subr.bf16.mxu1 %v7221_v37  ;;  %1460 = vmatprep.subr.bf16.mxu0 %v7232_v46  ;;  %v8103_v46 = vrot.slane %v1308_v40, %v8091_v22 }
 0x335   : > { %6797 = vmatpush3.bf16.msra.mxu1 %v7221_v37  ;;  %1461 = vmatpush1.bf16.msra.mxu0 %v7230_v47 }
 0x336   : > { %6798 = vmatprep.subr.bf16.mxu1 %v7225_v30  ;;  %1462 = vmatprep.subr.bf16.mxu0 %v7236_v52 }
 0x339   : > { %6799 = vmatpush3.bf16.msra.mxu1 %v7225_v30  ;;  %1463 = vmatpush1.bf16.msra.mxu0 %v7234_v50  ;;  %v1306_v30 = vrot.slane %v7947_v8, 1 }
 0x33a   : > { %6800 = vmatprep.subr.bf16.mxu1 %v7229_v44  ;;  %1464 = vmatprep.subr.bf16.mxu0 %v7240_v51 }
 0x33d   : > { %6801 = vmatpush3.bf16.msra.mxu1 %v7229_v44  ;;  %1465 = vmatpush1.bf16.msra.mxu0 %v7238_v56  ;;  %v8100_v44 = vrot.slane %v1306_v30, %v8091_v22 }
 0x33e   : > { %6802 = vmatprep.subr.bf16.mxu1 %v7233_v48 }
 0x341   : > { %6803 = vmatpush3.bf16.msra.mxu1 %v7233_v48 }
 0x342   : > { %6804 = vmatprep.subr.bf16.mxu1 %v7237_v54 }
 0x345   : > { %6805 = vmatpush3.bf16.msra.mxu1 %v7237_v54 }
 0x346   : > { %6806 = vmatprep.subr.bf16.mxu1 %v7241_v58 }
 0x349   : > { %6807 = vmatpush3.bf16.msra.mxu1 %v7241_v58 }
 0x3a1   : > { %v1078_v61 = vpop.xlane.xlu1 %1077 }
 0x3a2   : > { %v1087_v63 = vmul.f32 0.0078125, %v1078_v61 }
 0x3a4   : > { %v1094_v42 = vadd.f32 1e-05, %v1087_v63 }
 0x3a5   : > { %v1082_v0 = vpop.xlane.xlu1 %1081  ;;  %v1080_v3 = vpop.xlane.xlu0 %1079 }
 0x3a6   : > { %7358 = vrsqrt.f32 %v1094_v42  ;;  %v1089_v31 = vmul.f32 0.0078125, %v1082_v0  ;;  %v1088_v59 = vmul.f32 0.0078125, %v1080_v3 }
 0x3a8   : > { %v1096_v62 = vadd.f32 1e-05, %v1089_v31  ;;  %v1095_v4 = vadd.f32 1e-05, %v1088_v59 }
 0x3aa   : > { %7360 = vrsqrt.f32 %v1096_v62 }
 0x3ab   : > { %7362 = vrsqrt.f32 %v1095_v4 }
 0x3b3   : > { %v7359_v5 = vpop.eup %7358 }
 0x3b4   : > { %v1108_v9 = vmul.f32 %v7359_v5, %v7939_v53 }
 0x3b6   : > { %v1119_v15 = vmul.f32 %v7957_v11, %v1108_v9 }
 0x3b7   : > { %v7361_v55 = vpop.eup %7360 }
 0x3b8   : > { %v7363_v6 = vpop.eup %7362  ;;  %v1110_v1 = vmul.f32 %v7361_v55, %v7951_v57  ;;  %v1130_v20 = vadd.f32 %v7970_v16, %v1119_v15  ;;  %v1155_v57 = vsub.s32 2, %v7937_v49 }
 0x3b9   : > { %v1109_v12 = vmul.f32 %v7363_v6, %v7949_v10 }
 0x3ba   : > { %v1121_v14 = vmul.f32 %v7957_v11, %v1110_v1  ;;  %v1156_v26 = vrot.slane %v7947_v8, %v1155_v57 }
 0x3bb   : > { %v1120_v17 = vmul.f32 %v7957_v11, %v1109_v12 }
 0x3bc   : > { %v1132_v2 = vadd.f32 %v7970_v16, %v1121_v14 }
 0x3bd   : > { %v1131_v21 = vadd.f32 %v7970_v16, %v1120_v17 }
 0x3be   : > { %v1136_v25 = vpack.c.bf16 %v1132_v2, %v1132_v2 }
 0x3bf   : > { %v1135_v53 = vpack.c.bf16 %v1131_v21, %v1130_v20 }
 0x3c1   : > { %6788 = vmatprep.mubr.bf16.mxu1 %v1135_v53 }
 0x3c2   : > { %6789 = vmatmul.mubr.bf16.gmra.mxu1 %v1136_v25 }
 0x3ec   : > { %v6786_v24 = vpop.f32.mrf.mxu1 }
 0x3ed   : > { %v8071_v29 = vadd.f32 %v6786_v24, %v1156_v26 }
 0x3ee   : > { %v1239_v10 = vpop.f32.mrf.mxu1 }
 0x3ef   : > { %v8067_v19 = vadd.f32 %v1239_v10, %v1156_v26 }
 0x3f0   : > { %v6787_v27 = vpop.f32.mrf.mxu1 }
 0x3f1   : > { %v8065_v18 = vadd.f32 %v6787_v27, %v1156_v26 }
 0x3f2   : > { %v1242_v11 = vpop.f32.mrf.mxu1 }
 0x3f3   : > { %v8069_v28 = vadd.f32 %v1242_v11, %v1156_v26  ;;  %v1270_v33 = vpack.c.bf16 %v8065_v18, %v8071_v29 }
 0x3f5   : > { %v1269_v16 = vpack.c.bf16 %v8069_v28, %v8067_v19 }
 0x3f7   : > { %1483 = vmatmul.mubr.bf16.vlgmr.msra.gmra.mxu0 %v1269_v16  ;;  %6808 = vmatprep.mubr.bf16.mxu1 %v1269_v16 }
 0x3f8   : > { %6809 = vmatmul.mubr.bf16.vlgmr.msra.gmra.mxu1 %v1270_v33  ;;  %1492 = vmatprep.mubr.bf16.mxu0 %v7558_v60 }
 0x3ff   : > { %1493 = vmatmul.mubr.bf16.gmra.mxu0 %v1270_v33 }
 0x400   : > { %1502 = vmatprep.mubr.bf16.mxu0 %v7558_v60 }
 0x482   : > { %v6790_v23 = vpop.f32.mrf.mxu1 }
 0x483   : > { %v8079_v35 = vadd.f32 %v6790_v23, %v1156_v26 }
 0x484   : > { %v1255_v34 = vpop.f32.mrf.mxu1 }
 0x485   : > { %v8081_v38 = vadd.f32 %v1255_v34, %v1156_v26  ;;  %v1272_v41 = vpack.c.bf16 %v8079_v35, %v8079_v35 }
 0x486   : > { %v6791_v32 = vpop.f32.mrf.mxu1 }
 0x488   : > { %v1258_v36 = vpop.f32.mrf.mxu1 }
 0x489   : > { %v8083_v39 = vadd.f32 %v1258_v36, %v1156_v26 }
 0x48b   : > { %v1271_v37 = vpack.c.bf16 %v8083_v39, %v8081_v38 }
 0x48d   : > { %1503 = vmatmul.mubr.bf16.gmra.mxu0 %v1271_v37  ;;  %6812 = vmatprep.mubr.bf16.mxu1 %v1271_v37 }
 0x48e   : > { %6813 = vmatmul.mubr.bf16.gmra.mxu1 %v1272_v41  ;;  %1512 = vmatprep.mubr.bf16.mxu0 %v7558_v60 }
 0x495   : > { %1513 = vmatmul.mubr.bf16.gmra.mxu0 %v1272_v41 }
 0x4b7   : > { %v1484_v45 = vpop.f32.mrf.mxu0 }
 0x4b8   : > { %v8106_v47 = vadd.f32 %v1484_v45, %v8097_v7  ;;  %v6810_v48 = vpop.f32.mrf.mxu1 }
 0x4b9   : > { %v1486_v50 = vpop.f32.mrf.mxu0  ;;  %v8114_v8 = vadd.f32 %v6810_v48, %v8103_v46 }
 0x4ba   : > { %v8109_v52 = vadd.f32 %v1486_v50, %v8100_v44  ;;  %v1555_v54 = vpop.f32.mrf.mxu1  ;;  %6820 = vmatprep.mubr.msk.f32.mxu0 %vm1585_vm6, %v8106_v47 }
 0x4bb   : > { %v1488_v56 = vpop.f32.mrf.mxu0  ;;  %v2549_v42 = vrot.slane %v8114_v8, 6  ;;  %v8161_v15 = vadd.f32 %v1555_v54, %v8103_v46 }
 0x4bc   : > { %1787 = vrot.lane.b32.xlu1 %v8109_v52, %s7559_s7  ;;  %v6811_v51 = vpop.f32.mrf.mxu1  ;;  %v8147_v5 = vadd.f32 %v1488_v56, %v8097_v7 }
 0x4bd   : > { %v8119_v58 = vadd.f32 %v6811_v51, %v8103_v46  ;;  %v1490_v61 = vpop.f32.mrf.mxu0 }
 0x4be   : > { %v8122_v63 = vadd.f32 %v1490_v61, %v8100_v44  ;;  %v1558_v31 = vpop.f32.mrf.mxu1 }
 0x4bf   : > { %v2551_v0 = vrot.slane %v8119_v58, 6  ;;  %v1494_v3 = vpop.f32.mrf.mxu0  ;;  %v8150_v55 = vadd.f32 %v1558_v31, %v8103_v46  ;;  %v3399_v40 = vrot.slane %v8119_v58, 4 }
 0x4c0   : > { %6816 = vmatprep.subr.msk.mxu0 %vm1585_vm6, %v8122_v63  ;;  %1789 = vrot.lane.b32.xlu0 %v8122_v63, %s7559_s7  ;;  %v8142_v4 = vadd.f32 %v1494_v3, %v8097_v7 }
 0x4c1   : > { %1783 = vrot.lane.b32.xlu1 %v8106_v47, %s7559_s7  ;;  %v8132_v59 = vpop.f32.mrf.mxu0  ;;  %6817 = vmatpush3.xpose.msk.msra.mxu0 %vm1585_vm6, %v8122_v63  ;;  %v8139_v62 = vsel %vm565_vm5, %v2549_v42, %v2551_v0 }
 0x4c2   : > { %6818 = vmatprep.subr.msk.mxu0 %vm1585_vm6, %v8109_v52  ;;  %v2428_v1 = vrot.slane %v8142_v4, 6 }
 0x4c3   : > { %v1498_v9 = vpop.f32.mrf.mxu0 }
 0x4c4   : > { %v1499_v6 = vadd.f32 %v1498_v9, %v8097_v7 }
 0x4c5   : > { %1785 = vrot.lane.b32.xlu1 %v8147_v5, %s7559_s7  ;;  %6819 = vmatpush3.xpose.msk.msra.mxu0 %vm1585_vm6, %v8109_v52  ;;  %v1500_v25 = vpop.f32.mrf.mxu0 }
 0x4c6   : > { %v2430_v12 = vrot.slane %v1499_v6, 6  ;;  %6823 = vmatprep.subr.msk.mxu0 %vm556_vm2, %v8150_v55  ;;  %v8181_v57 = vadd.f32 %v1500_v25, %v8100_v44  ;;  %v3278_v27 = vrot.slane %v1499_v6, 4 }
 0x4c8   : > { %6821 = vmatmul.mubr.msk.f32.vlgmr.msra.gmra.mxu0 %vm1585_vm6, %v8147_v5  ;;  %v8168_v14 = vsel %vm565_vm5, %v2428_v1, %v2430_v12  ;;  %v3285_v32 = vrot.slane %v8181_v57, 4 }
 0x4c9   : > { %6824 = vmatpush3.msk.msra.mxu0 %vm556_vm2, %v8150_v55 }
 0x4ca   : > { %6825 = vmatprep.subr.mxu0 %v8161_v15 }
 0x4cb   : > { %6826 = vmatpush3.msra.mxu0 %v8161_v15 }
 0x52e   : > { %v1788_v17 = vpop.permute.xlu1 %1787 }
 0x532   : > { %v1790_v2 = vpop.permute.xlu0 %1789 }
 0x533   : > { %v1784_v20 = vpop.permute.xlu1 %1783  ;;  %6830 = vmatprep.subr.msk.mxu1 %vm1585_vm6, %v1790_v2 }
 0x534   : > { %6834 = vmatprep.mubr.msk.f32.mxu1 %vm1585_vm6, %v1784_v20  ;;  %6831 = vmatpush3.xpose.msk.msra.mxu1 %vm1585_vm6, %v1790_v2 }
 0x535   : > { %6832 = vmatprep.subr.msk.mxu1 %vm1585_vm6, %v1788_v17 }
 0x537   : > { %v1786_v21 = vpop.permute.xlu1 %1785 }
 0x538   : > { %6833 = vmatpush3.xpose.msk.msra.mxu1 %vm1585_vm6, %v1788_v17 }
 0x53b   : > { %6835 = vmatmul.mubr.msk.f32.vlgmr.msra.gmra.mxu1 %vm1585_vm6, %v1786_v21 }
 0x54d   : > { %v1504_v53 = vpop.f32.mrf.mxu0 }
 0x54e   : > { %v1505_v24 = vadd.f32 %v1504_v53, %v8097_v7  ;;  %v8184_v10 = vpop.f32.mrf.mxu1 }
 0x54f   : > { %v1506_v26 = vpop.f32.mrf.mxu0 }
 0x550   : > { %v3279_v11 = vrot.slane %v1505_v24, 4  ;;  %v1507_v16 = vadd.f32 %v1506_v26, %v8100_v44  ;;  %v1571_v33 = vpop.f32.mrf.mxu1 }
 0x551   : > { %v8188_v23 = vadd.f32 %v1571_v33, %v8103_v46  ;;  %v1508_v34 = vpop.f32.mrf.mxu0 }
 0x552   : > { %v3286_v36 = vrot.slane %v1507_v16, 4  ;;  %v8192_v37 = vadd.f32 %v1508_v34, %v8097_v7  ;;  %v6815_v41 = vpop.f32.mrf.mxu1  ;;  %v8195_v30 = vsel %vm248_vm0, %v3278_v27, %v3279_v11 }
 0x553   : > { %v3400_v45 = vrot.slane %v8188_v23, 4  ;;  %v1510_v48 = vpop.f32.mrf.mxu0 }
 0x554   : > { %v8200_v50 = vsel %vm248_vm0, %v3285_v32, %v3286_v36  ;;  %v3281_v54 = vrot.slane %v8192_v37, 4  ;;  %v8204_v56 = vadd.f32 %v1510_v48, %v8100_v44  ;;  %v8222_v12 = vpop.f32.mrf.mxu1 }
 0x555   : > { %v8209_v51 = vsel %vm248_vm0, %v3399_v40, %v3400_v45  ;;  %v8211_v61 = vpop.f32.mrf.mxu0 }
 0x556   : > { %v3288_v58 = vrot.slane %v8204_v56, 4  ;;  %v8215_v0 = vsel %vm248_vm0, %v3279_v11, %v3281_v54 }
 0x557   : > { %v8217_v3 = vpop.f32.mrf.mxu0 }
 0x558   : > { %v8220_v31 = vsel %vm248_vm0, %v3286_v36, %v3288_v58 }
 0x559   : > { %v1518_v9 = vpop.f32.mrf.mxu0 }
 0x55b   : > { %v1519_v6 = vpop.f32.mrf.mxu0 }
 0x5fb   : > { %v6836_v17 = vpop.f32.mrf.mxu1 }
 0x5fc   : > { %v1875_v2 = vmul.f32 0.17677669, %v6836_v17 }
 0x5fd   : > { %v1865_v20 = vpop.f32.mrf.mxu1 }
 0x5fe   : > { %v1874_v21 = vmul.f32 0.17677669, %v1865_v20  ;;  %v1879_v25 = vsel %vm1679_vm7, %v1875_v2, -inf }
 0x5ff   : > { %1880 = vmax.xlane.f32.xlu1 %v1879_v25 }
 0x600   : > { %v1876_v53 = vsel %vm1675_vm8, %v1874_v21, -inf }
 0x601   : > { %1877 = vmax.xlane.f32.xlu0 %v1876_v53 }
 0x610   : > { %1899 = vrot.lane.b32.xlu1 %v8161_v15, %s7559_s7 }
 0x614   : > { %1993 = vrot.lane.b32.xlu1 %v8122_v63, %s7560_s8 }
 0x618   : > { %1991 = vrot.lane.b32.xlu1 %v8109_v52, %s7560_s8 }
 0x61c   : > { %1989 = vrot.lane.b32.xlu1 %v8147_v5, %s7560_s8 }
 0x688   : > { %v1881_v24 = vpop.xlane.xlu1 %1880 }
 0x689   : > { %v1883_v26 = vsub.f32 %v1875_v2, %v1881_v24 }
 0x68a   : > { %v1878_v27 = vpop.xlane.xlu0 %1877 }
 0x68b   : > { %v1886_v11 = vmul.f32 1.442695, %v1883_v26  ;;  %v1882_v16 = vsub.f32 %v1874_v21, %v1878_v27 }
 0x68c   : > { %v1900_v54 = vpop.permute.xlu1 %1899 }
 0x68d   : > { %7364 = vpow2.f32 %v1886_v11  ;;  %v1884_v33 = vmul.f32 1.442695, %v1882_v16 }
 0x68f   : > { %7366 = vpow2.f32 %v1884_v33 }
 0x690   : > { %v1994_v9 = vpop.permute.xlu1 %1993 }
 0x694   : > { %v1992_v25 = vpop.permute.xlu1 %1991 }
 0x698   : > { %v1990_v53 = vpop.permute.xlu1 %1989 }
 0x69a   : > { %v7365_v34 = vpop.eup %7364 }
 0x69b   : > { %v1891_v32 = vsel %vm1679_vm7, %v7365_v34, 0.0 }
 0x69c   : > { %v7367_v36 = vpop.eup %7366  ;;  %1892 = vadd.xlane.f32.xlu0 %v1891_v32 }
 0x69d   : > { %v1888_v41 = vsel %vm1675_vm8, %v7367_v36, 0.0 }
 0x6a0   : > { %1889 = vadd.xlane.f32.xlu0 %v1888_v41 }
 0x6b6   : > { %1901 = vrot.lane.b32.xlu0 %v8150_v55, %s7559_s7 }
 0x6ba   : > { %1987 = vrot.lane.b32.xlu0 %v8106_v47, %s7560_s8 }
 0x725   : > { %v1893_v40 = vpop.xlane.xlu0 %1892 }
 0x726   : > { %7368 = vrcp.f32 %v1893_v40 }
 0x729   : > { %v1890_v48 = vpop.xlane.xlu0 %1889 }
 0x72a   : > { %7370 = vrcp.f32 %v1890_v48 }
 0x72d   : > { %v1902_v58 = vpop.permute.xlu0 %1901 }
 0x72e   : > { %6837 = vmatprep.subr.msk.mxu1 %vm556_vm2, %v1902_v58 }
 0x72f   : > { %6838 = vmatpush3.msk.msra.mxu1 %vm556_vm2, %v1902_v58 }
 0x730   : > { %6839 = vmatprep.subr.mxu1 %v1900_v54 }
 0x731   : > { %6840 = vmatpush3.msra.mxu1 %v1900_v54  ;;  %v1988_v21 = vpop.permute.xlu0 %1987 }
 0x732   : > { %6844 = vmatprep.subr.msk.mxu1 %vm1585_vm6, %v1994_v9 }
 0x733   : > { %v7369_v6 = vpop.eup %7368 }
 0x734   : > { %v1897_v20 = vmul.f32 %v7369_v6, %v7365_v34 }
 0x737   : > { %v7371_v17 = vpop.eup %7370 }
 0x738   : > { %v1896_v2 = vmul.f32 %v7371_v17, %v7367_v36  ;;  %v6822_v36 = vpop.f32.mrf.mxu0 }
 0x739   : > { %v1674_v41 = vmul.f32 0.17677669, %v6822_v36 }
 0x73a   : > { %6841 = vmatprep.mubr.msk.f32.mxu1 %vm1675_vm8, %v1896_v2 }
 0x73b   : > { %6842 = vmatmul.mubr.msk.f32.vlgmr.msra.gmra.mxu1 %vm1675_vm8, %v1897_v20  ;;  %v1680_v40 = vsel %vm1679_vm7, %v1674_v41, -inf }
 0x73c   : > { %6845 = vmatpush3.xpose.msk.msra.mxu1 %vm1585_vm6, %v1994_v9  ;;  %6848 = vmatprep.mubr.msk.f32.mxu1 %vm1585_vm6, %v1988_v21 }
 0x73d   : > { %6846 = vmatprep.subr.msk.mxu1 %vm1585_vm6, %v1992_v25 }
 0x740   : > { %6847 = vmatpush3.xpose.msk.msra.mxu1 %vm1585_vm6, %v1992_v25 }
 0x743   : > { %6849 = vmatmul.mubr.msk.f32.vlgmr.msra.gmra.mxu1 %vm1585_vm6, %v1990_v53 }
 0x7fb   : > { %v8250_v24 = vpop.f32.mrf.mxu1 }
 0x7fd   : > { %v8252_v26 = vpop.f32.mrf.mxu1 }
 0x803   : > { %v6850_v27 = vpop.f32.mrf.mxu1 }
 0x804   : > { %v2079_v11 = vmul.f32 0.17677669, %v6850_v27 }
 0x805   : > { %v2069_v16 = vpop.f32.mrf.mxu1 }
 0x806   : > { %v2078_v33 = vmul.f32 0.17677669, %v2069_v16  ;;  %v2083_v34 = vsel %vm1679_vm7, %v2079_v11, -inf }
 0x807   : > { %2084 = vmax.xlane.f32.xlu1 %v2083_v34 }
 0x808   : > { %v2080_v32 = vsel %vm1675_vm8, %v2078_v33, -inf }
 0x809   : > { %2081 = vmax.xlane.f32.xlu0 %v2080_v32  ;;  %v1664_v32 = vpop.f32.mrf.mxu0 }
 0x80a   : > { %v1673_v36 = vmul.f32 0.17677669, %v1664_v32 }
 0x818   : > { %2102 = vrot.lane.b32.xlu1 %v8161_v15, %s7560_s8 }
 0x81c   : > { %2196 = vrot.lane.b32.xlu1 %v8122_v63, %s7561_s9 }
 0x820   : > { %2194 = vrot.lane.b32.xlu1 %v8109_v52, %s7561_s9 }
 0x824   : > { %2192 = vrot.lane.b32.xlu1 %v8147_v5, %s7561_s9 }
 0x848   : > { %1681 = vmax.xlane.f32.xlu1 %v1680_v40  ;;  %v1676_v40 = vsel %vm1675_vm8, %v1673_v36, -inf }
 0x890   : > { %v2085_v48 = vpop.xlane.xlu1 %2084 }
 0x891   : > { %v2087_v54 = vsub.f32 %v2079_v11, %v2085_v48 }
 0x892   : > { %v2082_v58 = vpop.xlane.xlu0 %2081 }
 0x893   : > { %v2090_v9 = vmul.f32 1.442695, %v2087_v54  ;;  %v2086_v6 = vsub.f32 %v2078_v33, %v2082_v58 }
 0x894   : > { %v2103_v25 = vpop.permute.xlu1 %2102 }
 0x895   : > { %7372 = vpow2.f32 %v2090_v9  ;;  %v2088_v17 = vmul.f32 1.442695, %v2086_v6 }
 0x897   : > { %7374 = vpow2.f32 %v2088_v17 }
 0x898   : > { %v2197_v53 = vpop.permute.xlu1 %2196 }
 0x89c   : > { %v2195_v27 = vpop.permute.xlu1 %2194 }
 0x8a0   : > { %v2193_v11 = vpop.permute.xlu1 %2192 }
 0x8a2   : > { %v7373_v2 = vpop.eup %7372 }
 0x8a3   : > { %v2095_v20 = vsel %vm1679_vm7, %v7373_v2, 0.0 }
 0x8a4   : > { %v7375_v52 = vpop.eup %7374  ;;  %2096 = vadd.xlane.f32.xlu0 %v2095_v20 }
 0x8a5   : > { %v2092_v21 = vsel %vm1675_vm8, %v7375_v52, 0.0 }
 0x8a8   : > { %2093 = vadd.xlane.f32.xlu0 %v2092_v21 }
 0x8be   : > { %2104 = vrot.lane.b32.xlu0 %v8150_v55, %s7560_s8 }
 0x8c2   : > { %2190 = vrot.lane.b32.xlu0 %v8106_v47, %s7561_s9 }
 0x8d1   : > { %v1682_v16 = vpop.xlane.xlu1 %1681 }
 0x8d2   : > { %v1684_v33 = vsub.f32 %v1674_v41, %v1682_v16 }
 0x8d4   : > { %v1687_v34 = vmul.f32 1.442695, %v1684_v33 }
 0x8d6   : > { %7376 = vpow2.f32 %v1687_v34 }
 0x8e1   : > { %1677 = vmax.xlane.f32.xlu0 %v1676_v40 }
 0x8e3   : > { %v8272_v48 = vpop.eup %7376 }
 0x8e4   : > { %v1692_v54 = vsel %vm1679_vm7, %v8272_v48, 0.0 }
 0x8e5   : > { %1693 = vadd.xlane.f32.xlu1 %v1692_v54 }
 0x92d   : > { %v2097_v58 = vpop.xlane.xlu0 %2096 }
 0x92e   : > { %7378 = vrcp.f32 %v2097_v58 }
 0x931   : > { %v2094_v47 = vpop.xlane.xlu0 %2093 }
 0x932   : > { %7380 = vrcp.f32 %v2094_v47 }
 0x935   : > { %v2105_v9 = vpop.permute.xlu0 %2104 }
 0x936   : > { %6851 = vmatprep.subr.msk.mxu1 %vm556_vm2, %v2105_v9 }
 0x937   : > { %6852 = vmatpush3.msk.msra.mxu1 %vm556_vm2, %v2105_v9 }
 0x938   : > { %6853 = vmatprep.subr.mxu1 %v2103_v25 }
 0x939   : > { %6854 = vmatpush3.msra.mxu1 %v2103_v25  ;;  %v2191_v21 = vpop.permute.xlu0 %2190  ;;  %v2548_v25 = vrot.slane %v8150_v55, 6 }
 0x93a   : > { %6858 = vmatprep.subr.msk.mxu1 %vm1585_vm6, %v2197_v53 }
 0x93b   : > { %v7379_v41 = vpop.eup %7378 }
 0x93c   : > { %v2101_v20 = vmul.f32 %v7379_v41, %v7373_v2  ;;  %v8294_v2 = vsel %vm565_vm5, %v2548_v25, %v2549_v42 }
 0x93f   : > { %v7381_v6 = vpop.eup %7380 }
 0x940   : > { %v2100_v17 = vmul.f32 %v7381_v6, %v7375_v52 }
 0x942   : > { %6855 = vmatprep.mubr.msk.f32.mxu1 %vm1675_vm8, %v2100_v17 }
 0x943   : > { %6856 = vmatmul.mubr.msk.f32.vlgmr.msra.gmra.mxu1 %vm1675_vm8, %v2101_v20 }
 0x944   : > { %6859 = vmatpush3.xpose.msk.msra.mxu1 %vm1585_vm6, %v2197_v53  ;;  %6862 = vmatprep.mubr.msk.f32.mxu1 %vm1585_vm6, %v2191_v21 }
 0x945   : > { %6860 = vmatprep.subr.msk.mxu1 %vm1585_vm6, %v2195_v27 }
 0x948   : > { %6861 = vmatpush3.xpose.msk.msra.mxu1 %vm1585_vm6, %v2195_v27 }
 0x949   : > { %6879 = vmatprep.subr.msk.mxu1 %vm556_vm2, %v8139_v62 }
 0x94b   : > { %6863 = vmatmul.mubr.msk.f32.vlgmr.msra.gmra.mxu1 %vm1585_vm6, %v2193_v11 }
 0x94c   : > { %6880 = vmatpush3.msk.msra.mxu1 %vm556_vm2, %v8139_v62 }
 0x94d   : > { %6881 = vmatprep.subr.mxu1 %v8294_v2 }
 0x94e   : > { %6882 = vmatpush3.msra.mxu1 %v8294_v2 }
 0x96a   : > { %v1678_v52 = vpop.xlane.xlu0 %1677 }
 0x96b   : > { %v1683_v53 = vsub.f32 %v1673_v36, %v1678_v52 }
 0x96d   : > { %v1685_v27 = vmul.f32 1.442695, %v1683_v53 }
 0x96e   : > { %v1694_v6 = vpop.xlane.xlu1 %1693 }
 0x96f   : > { %7382 = vpow2.f32 %v1685_v27 }
 0x97c   : > { %v7383_v54 = vpop.eup %7382 }
 0x97d   : > { %v1689_v58 = vsel %vm1675_vm8, %v7383_v54, 0.0 }
 0xa03   : > { %v8298_v16 = vpop.f32.mrf.mxu1 }
 0xa05   : > { %v8300_v33 = vpop.f32.mrf.mxu1 }
 0xa0b   : > { %v6864_v11 = vpop.f32.mrf.mxu1 }
 0xa0c   : > { %v2282_v40 = vmul.f32 0.17677669, %v6864_v11 }
 0xa0d   : > { %v2272_v34 = vpop.f32.mrf.mxu1 }
 0xa0e   : > { %v2281_v32 = vmul.f32 0.17677669, %v2272_v34  ;;  %v2286_v42 = vsel %vm1679_vm7, %v2282_v40, -inf }
 0xa10   : > { %v2283_v8 = vsel %vm1675_vm8, %v2281_v32, -inf }
 0xa11   : > { %2284 = vmax.xlane.f32.xlu0 %v2283_v8 }
 0xa15   : > { %2287 = vmax.xlane.f32.xlu0 %v2286_v42  ;;  %v1497_v42 = vadd.f32 %v8132_v59, %v8100_v44 }
 0xa19   : > { %1690 = vadd.xlane.f32.xlu0 %v1689_v58 }
 0xa9a   : > { %v2285_v36 = vpop.xlane.xlu0 %2284 }
 0xa9b   : > { %v2289_v47 = vsub.f32 %v2281_v32, %v2285_v36 }
 0xa9d   : > { %v2291_v9 = vmul.f32 1.442695, %v2289_v47 }
 0xa9e   : > { %v2288_v41 = vpop.xlane.xlu0 %2287 }
 0xa9f   : > { %7384 = vpow2.f32 %v2291_v9  ;;  %v2290_v17 = vsub.f32 %v2282_v40, %v2288_v41 }
 0xaa0   : > { %7386 = vrcp.f32 %v1694_v6  ;;  %v2434_v6 = vrot.slane %v8122_v63, 6 }
 0xaa1   : > { %v2293_v20 = vmul.f32 1.442695, %v2290_v17 }
 0xaa2   : > { %v1691_v21 = vpop.xlane.xlu0 %1690 }
 0xaa3   : > { %7388 = vpow2.f32 %v2293_v20 }
 0xaa4   : > { %7390 = vrcp.f32 %v1691_v21 }
 0xaac   : > { %v7385_v25 = vpop.eup %7384 }
 0xaad   : > { %v2295_v52 = vsel %vm1675_vm8, %v7385_v25, 0.0  ;;  %v7387_v53 = vpop.eup %7386 }
 0xaae   : > { %2296 = vadd.xlane.f32.xlu0 %v2295_v52  ;;  %v1698_v8 = vmul.f32 %v7387_v53, %v8272_v48  ;;  %v2437_v48 = vrot.slane %v8181_v57, 6  ;;  %v2427_v57 = vrot.slane %v8147_v5, 6 }
 0xab0   : > { %v7389_v27 = vpop.eup %7388  ;;  %v8331_v17 = vsel %vm565_vm5, %v2427_v57, %v2428_v1 }
 0xab1   : > { %v7391_v11 = vpop.eup %7390  ;;  %v2298_v34 = vsel %vm1679_vm7, %v7389_v27, 0.0 }
 0xab2   : > { %2299 = vadd.xlane.f32.xlu1 %v2298_v34  ;;  %v1697_v32 = vmul.f32 %v7391_v11, %v7383_v54  ;;  %v2435_v54 = vrot.slane %v1497_v42, 6 }
 0xab4   : > { %6827 = vmatprep.mubr.msk.f32.mxu0 %vm1675_vm8, %v1697_v32  ;;  %v8334_v20 = vsel %vm565_vm5, %v2434_v6, %v2435_v54 }
 0xab5   : > { %6828 = vmatmul.mubr.msk.f32.vlgmr.msra.gmra.mxu0 %vm1675_vm8, %v1698_v8 }
 0xac3   : > { %2305 = vrot.lane.b32.xlu1 %v8161_v15, %s7561_s9 }
 0xac4   : > { %2307 = vrot.lane.b32.xlu0 %v8150_v55, %s7561_s9  ;;  %v8320_v55 = vsel %vm565_vm5, %v2435_v54, %v2437_v48 }
 0xb37   : > { %v2297_v40 = vpop.xlane.xlu0 %2296 }
 0xb38   : > { %7392 = vrcp.f32 %v2297_v40 }
 0xb3b   : > { %v2300_v58 = vpop.xlane.xlu1 %2299  ;;  %v2308_v36 = vpop.permute.xlu0 %2307 }
 0xb3c   : > { %7394 = vrcp.f32 %v2300_v58  ;;  %6865 = vmatprep.subr.msk.mxu0 %vm556_vm2, %v2308_v36 }
 0xb3d   : > { %6866 = vmatpush3.msk.msra.mxu0 %vm556_vm2, %v2308_v36 }
 0xb3f   : > { %v2306_v47 = vpop.permute.xlu1 %2305 }
 0xb40   : > { %6867 = vmatprep.subr.mxu0 %v2306_v47 }
 0xb41   : > { %6868 = vmatpush3.msra.mxu0 %v2306_v47 }
 0xb42   : > { %6872 = vmatprep.subr.msk.mxu0 %vm1585_vm6, %v8320_v55 }
 0xb45   : > { %v7393_v59 = vpop.eup %7392 }
 0xb46   : > { %v2303_v15 = vmul.f32 %v7393_v59, %v7385_v25 }
 0xb48   : > { %6869 = vmatprep.mubr.msk.f32.mxu0 %vm1675_vm8, %v2303_v15 }
 0xb49   : > { %v7395_v9 = vpop.eup %7394 }
 0xb4a   : > { %v2304_v41 = vmul.f32 %v7395_v9, %v7389_v27 }
 0xb4c   : > { %6870 = vmatmul.mubr.msk.f32.vlgmr.msra.gmra.mxu0 %vm1675_vm8, %v2304_v41 }
 0xb4d   : > { %6873 = vmatpush3.xpose.msk.msra.mxu0 %vm1585_vm6, %v8320_v55  ;;  %6876 = vmatprep.mubr.msk.f32.mxu0 %vm1585_vm6, %v8331_v17 }
 0xb4e   : > { %6874 = vmatprep.subr.msk.mxu0 %vm1585_vm6, %v8334_v20 }
 0xb51   : > { %6875 = vmatpush3.xpose.msk.msra.mxu0 %vm1585_vm6, %v8334_v20 }
 0xb54   : > { %6877 = vmatmul.mubr.msk.f32.vlgmr.msra.gmra.mxu0 %vm1585_vm6, %v8168_v14 }
 0xb75   : > { %v8346_v63 = vpop.f32.mrf.mxu0 }
 0xb77   : > { %v8348_v4 = vpop.f32.mrf.mxu0 }
 0xc0c   : > { %v8350_v5 = vpop.f32.mrf.mxu0 }
 0xc0e   : > { %v8352_v1 = vpop.f32.mrf.mxu0 }
 0xc14   : > { %v6878_v21 = vpop.f32.mrf.mxu0 }
 0xc15   : > { %v2523_v25 = vmul.f32 0.17677669, %v6878_v21 }
 0xc16   : > { %v2513_v52 = vpop.f32.mrf.mxu0 }
 0xc17   : > { %v2522_v53 = vmul.f32 0.17677669, %v2513_v52  ;;  %v2527_v27 = vsel %vm1679_vm7, %v2523_v25, -inf }
 0xc18   : > { %2528 = vmax.xlane.f32.xlu0 %v2527_v27 }
 0xc19   : > { %v2524_v11 = vsel %vm1675_vm8, %v2522_v53, -inf }
 0xc1a   : > { %2525 = vmax.xlane.f32.xlu1 %v2524_v11 }
 0xca1   : > { %v2529_v34 = vpop.xlane.xlu0 %2528 }
 0xca2   : > { %v2531_v32 = vsub.f32 %v2523_v25, %v2529_v34 }
 0xca3   : > { %v2526_v8 = vpop.xlane.xlu1 %2525 }
 0xca4   : > { %v2534_v40 = vmul.f32 1.442695, %v2531_v32  ;;  %v2530_v42 = vsub.f32 %v2522_v53, %v2526_v8 }
 0xca6   : > { %7396 = vpow2.f32 %v2534_v40  ;;  %v2532_v58 = vmul.f32 1.442695, %v2530_v42 }
 0xca8   : > { %7398 = vpow2.f32 %v2532_v58 }
 0xcb3   : > { %v7397_v36 = vpop.eup %7396 }
 0xcb4   : > { %v2539_v48 = vsel %vm1679_vm7, %v7397_v36, 0.0 }
 0xcb5   : > { %v7399_v54 = vpop.eup %7398  ;;  %2540 = vadd.xlane.f32.xlu1 %v2539_v48 }
 0xcb6   : > { %v2536_v47 = vsel %vm1675_vm8, %v7399_v54, 0.0 }
 0xcb7   : > { %2537 = vadd.xlane.f32.xlu0 %v2536_v47 }
 0xcc6   : > { %2641 = vrot.lane.b32.xlu1 %v8334_v20, %s7559_s7 }
 0xcca   : > { %2637 = vrot.lane.b32.xlu1 %v8331_v17, %s7559_s7 }
 0xccd   : > { %2643 = vrot.lane.b32.xlu0 %v8320_v55, %s7559_s7 }
 0xcce   : > { %2639 = vrot.lane.b32.xlu1 %v8168_v14, %s7559_s7 }
 0xd3e   : > { %v2541_v59 = vpop.xlane.xlu1 %2540 }
 0xd3f   : > { %7400 = vrcp.f32 %v2541_v59 }
 0xd40   : > { %v2538_v15 = vpop.xlane.xlu0 %2537 }
 0xd41   : > { %7402 = vrcp.f32 %v2538_v15 }
 0xd42   : > { %v2642_v41 = vpop.permute.xlu1 %2641 }
 0xd44   : > { %v2644_v9 = vpop.permute.xlu0 %2643 }
 0xd45   : > { %6886 = vmatprep.subr.msk.mxu1 %vm1585_vm6, %v2644_v9 }
 0xd46   : > { %v2638_v52 = vpop.permute.xlu1 %2637 }
 0xd4a   : > { %v2640_v53 = vpop.permute.xlu1 %2639 }
 0xd4c   : > { %v7401_v57 = vpop.eup %7400 }
 0xd4d   : > { %v2545_v25 = vmul.f32 %v7401_v57, %v7397_v36 }
 0xd4e   : > { %v7403_v6 = vpop.eup %7402 }
 0xd4f   : > { %v2544_v21 = vmul.f32 %v7403_v6, %v7399_v54 }
 0xd51   : > { %6883 = vmatprep.mubr.msk.f32.mxu1 %vm1675_vm8, %v2544_v21 }
 0xd52   : > { %6884 = vmatmul.mubr.msk.f32.vlgmr.msra.gmra.mxu1 %vm1675_vm8, %v2545_v25 }
 0xd53   : > { %6887 = vmatpush3.xpose.msk.msra.mxu1 %vm1585_vm6, %v2644_v9  ;;  %6890 = vmatprep.mubr.msk.f32.mxu1 %vm1585_vm6, %v2638_v52 }
 0xd54   : > { %6888 = vmatprep.subr.msk.mxu1 %vm1585_vm6, %v2642_v41 }
 0xd57   : > { %6889 = vmatpush3.xpose.msk.msra.mxu1 %vm1585_vm6, %v2642_v41 }
 0xd5a   : > { %6891 = vmatmul.mubr.msk.f32.vlgmr.msra.gmra.mxu1 %vm1585_vm6, %v2640_v53 }
 0xe12   : > { %v8374_v27 = vpop.f32.mrf.mxu1 }
 0xe14   : > { %v8376_v11 = vpop.f32.mrf.mxu1 }
 0xe1a   : > { %v6892_v34 = vpop.f32.mrf.mxu1 }
 0xe1b   : > { %v2729_v32 = vmul.f32 0.17677669, %v6892_v34 }
 0xe1c   : > { %v2719_v8 = vpop.f32.mrf.mxu1 }
 0xe1d   : > { %v2728_v40 = vmul.f32 0.17677669, %v2719_v8  ;;  %v2733_v42 = vsel %vm1679_vm7, %v2729_v32, -inf }
 0xe1e   : > { %2734 = vmax.xlane.f32.xlu1 %v2733_v42 }
 0xe1f   : > { %v2730_v58 = vsel %vm1675_vm8, %v2728_v40, -inf }
 0xe20   : > { %2731 = vmax.xlane.f32.xlu0 %v2730_v58 }
 0xe2f   : > { %2752 = vrot.lane.b32.xlu1 %v8294_v2, %s7559_s7 }
 0xe33   : > { %2846 = vrot.lane.b32.xlu1 %v8320_v55, %s7560_s8 }
 0xe37   : > { %2844 = vrot.lane.b32.xlu1 %v8334_v20, %s7560_s8 }
 0xe3b   : > { %2842 = vrot.lane.b32.xlu1 %v8168_v14, %s7560_s8 }
 0xea7   : > { %v2735_v36 = vpop.xlane.xlu1 %2734 }
 0xea8   : > { %v2737_v48 = vsub.f32 %v2729_v32, %v2735_v36 }
 0xea9   : > { %v2732_v54 = vpop.xlane.xlu0 %2731 }
 0xeaa   : > { %v2740_v47 = vmul.f32 1.442695, %v2737_v48  ;;  %v2736_v59 = vsub.f32 %v2728_v40, %v2732_v54 }
 0xeab   : > { %v2753_v52 = vpop.permute.xlu1 %2752 }
 0xeac   : > { %7404 = vpow2.f32 %v2740_v47  ;;  %v2738_v15 = vmul.f32 1.442695, %v2736_v59 }
 0xeae   : > { %7406 = vpow2.f32 %v2738_v15 }
 0xeaf   : > { %v2847_v34 = vpop.permute.xlu1 %2846 }
 0xeb3   : > { %v2845_v36 = vpop.permute.xlu1 %2844 }
 0xeb7   : > { %v2843_v48 = vpop.permute.xlu1 %2842 }
 0xeb9   : > { %v7405_v9 = vpop.eup %7404 }
 0xeba   : > { %v2745_v41 = vsel %vm1679_vm7, %v7405_v9, 0.0 }
 0xebb   : > { %v7407_v57 = vpop.eup %7406  ;;  %2746 = vadd.xlane.f32.xlu0 %v2745_v41 }
 0xebc   : > { %v2742_v6 = vsel %vm1675_vm8, %v7407_v57, 0.0 }
 0xebf   : > { %2743 = vadd.xlane.f32.xlu0 %v2742_v6 }
 0xed5   : > { %2754 = vrot.lane.b32.xlu0 %v8139_v62, %s7559_s7 }
 0xed9   : > { %2840 = vrot.lane.b32.xlu0 %v8331_v17, %s7560_s8 }
 0xf44   : > { %v2747_v21 = vpop.xlane.xlu0 %2746 }
 0xf45   : > { %7408 = vrcp.f32 %v2747_v21 }
 0xf48   : > { %v2744_v25 = vpop.xlane.xlu0 %2743 }
 0xf49   : > { %7410 = vrcp.f32 %v2744_v25 }
 0xf4c   : > { %v2755_v53 = vpop.permute.xlu0 %2754 }
 0xf4d   : > { %6893 = vmatprep.subr.msk.mxu0 %vm556_vm2, %v2755_v53 }
 0xf4e   : > { %6894 = vmatpush3.msk.msra.mxu0 %vm556_vm2, %v2755_v53 }
 0xf4f   : > { %6895 = vmatprep.subr.mxu0 %v2753_v52 }
 0xf50   : > { %6896 = vmatpush3.msra.mxu0 %v2753_v52  ;;  %v2841_v58 = vpop.permute.xlu0 %2840 }
 0xf51   : > { %6900 = vmatprep.subr.msk.mxu0 %vm1585_vm6, %v2847_v34 }
 0xf52   : > { %v7409_v32 = vpop.eup %7408 }
 0xf53   : > { %v2751_v42 = vmul.f32 %v7409_v32, %v7405_v9 }
 0xf56   : > { %v7411_v8 = vpop.eup %7410 }
 0xf57   : > { %v2750_v40 = vmul.f32 %v7411_v8, %v7407_v57 }
 0xf59   : > { %6897 = vmatprep.mubr.msk.f32.mxu0 %vm1675_vm8, %v2750_v40 }
 0xf5a   : > { %6898 = vmatmul.mubr.msk.f32.vlgmr.msra.gmra.mxu0 %vm1675_vm8, %v2751_v42 }
 0xf5b   : > { %6901 = vmatpush3.xpose.msk.msra.mxu0 %vm1585_vm6, %v2847_v34  ;;  %6904 = vmatprep.mubr.msk.f32.mxu0 %vm1585_vm6, %v2841_v58 }
 0xf5c   : > { %6902 = vmatprep.subr.msk.mxu0 %vm1585_vm6, %v2845_v36 }
 0xf5f   : > { %6903 = vmatpush3.xpose.msk.msra.mxu0 %vm1585_vm6, %v2845_v36 }
 0xf62   : > { %6905 = vmatmul.mubr.msk.f32.vlgmr.msra.gmra.mxu0 %vm1585_vm6, %v2843_v48 }
0x101a   : > { %v8404_v54 = vpop.f32.mrf.mxu0 }
0x101c   : > { %v8406_v47 = vpop.f32.mrf.mxu0 }
0x101d   : > { %v7120_v59 = vpack.i.bf16 %v8404_v54, %v8406_v47 }
0x1022   : > { %v6906_v15 = vpop.f32.mrf.mxu0 }
0x1023   : > { %v2932_v9 = vmul.f32 0.17677669, %v6906_v15 }
0x1024   : > { %v2922_v41 = vpop.f32.mrf.mxu0 }
0x1025   : > { %v2931_v57 = vmul.f32 0.17677669, %v2922_v41  ;;  %v2936_v6 = vsel %vm1679_vm7, %v2932_v9, -inf }
0x1026   : > { %2937 = vmax.xlane.f32.xlu1 %v2936_v6 }
0x1027   : > { %v2933_v21 = vsel %vm1675_vm8, %v2931_v57, -inf }
0x1028   : > { %2934 = vmax.xlane.f32.xlu0 %v2933_v21 }
0x1037   : > { %2955 = vrot.lane.b32.xlu1 %v8294_v2, %s7560_s8 }
0x103b   : > { %3049 = vrot.lane.b32.xlu1 %v8320_v55, %s7561_s9 }
0x103f   : > { %3047 = vrot.lane.b32.xlu1 %v8334_v20, %s7561_s9 }
0x1043   : > { %3045 = vrot.lane.b32.xlu1 %v8168_v14, %s7561_s9 }
0x10af   : > { %v2938_v25 = vpop.xlane.xlu1 %2937 }
0x10b0   : > { %v2940_v52 = vsub.f32 %v2932_v9, %v2938_v25 }
0x10b1   : > { %v2935_v53 = vpop.xlane.xlu0 %2934 }
0x10b2   : > { %v2943_v34 = vmul.f32 1.442695, %v2940_v52  ;;  %v2939_v32 = vsub.f32 %v2931_v57, %v2935_v53 }
0x10b3   : > { %v2956_v36 = vpop.permute.xlu1 %2955 }
0x10b4   : > { %7412 = vpow2.f32 %v2943_v34  ;;  %v2941_v8 = vmul.f32 1.442695, %v2939_v32 }
0x10b6   : > { %7414 = vpow2.f32 %v2941_v8 }
0x10b7   : > { %v3050_v15 = vpop.permute.xlu1 %3049 }
0x10bb   : > { %v3048_v52 = vpop.permute.xlu1 %3047 }
0x10bf   : > { %v3046_v53 = vpop.permute.xlu1 %3045 }
0x10c1   : > { %v7413_v40 = vpop.eup %7412 }
0x10c2   : > { %v2948_v42 = vsel %vm1679_vm7, %v7413_v40, 0.0 }
0x10c3   : > { %v7415_v58 = vpop.eup %7414  ;;  %2949 = vadd.xlane.f32.xlu0 %v2948_v42 }
0x10c4   : > { %v2945_v55 = vsel %vm1675_vm8, %v7415_v58, 0.0 }
0x10c7   : > { %2946 = vadd.xlane.f32.xlu0 %v2945_v55 }
0x10dd   : > { %2957 = vrot.lane.b32.xlu0 %v8139_v62, %s7560_s8 }
0x10e1   : > { %3043 = vrot.lane.b32.xlu0 %v8331_v17, %s7561_s9  ;;  %v8431_v17 = vadd.f32 %v8222_v12, %v8103_v46 }
0x10e3   : > { %v3402_v25 = vrot.slane %v8431_v17, 4 }
0x10e5   : > { %v8443_v12 = vsel %vm248_vm0, %v3400_v45, %v3402_v25 }
0x114c   : > { %v2950_v14 = vpop.xlane.xlu0 %2949 }
0x114d   : > { %7416 = vrcp.f32 %v2950_v14 }
0x1150   : > { %v2947_v20 = vpop.xlane.xlu0 %2946 }
0x1151   : > { %7418 = vrcp.f32 %v2947_v20 }
0x1154   : > { %v2958_v48 = vpop.permute.xlu0 %2957 }
0x1155   : > { %6907 = vmatprep.subr.msk.mxu1 %vm556_vm2, %v2958_v48 }
0x1156   : > { %6908 = vmatpush3.msk.msra.mxu1 %vm556_vm2, %v2958_v48 }
0x1157   : > { %6909 = vmatprep.subr.mxu1 %v2956_v36 }
0x1158   : > { %6910 = vmatpush3.msra.mxu1 %v2956_v36  ;;  %v3044_v21 = vpop.permute.xlu0 %3043 }
0x1159   : > { %6914 = vmatprep.subr.msk.mxu1 %vm1585_vm6, %v3050_v15 }
0x115a   : > { %v7417_v9 = vpop.eup %7416 }
0x115b   : > { %v2954_v6 = vmul.f32 %v7417_v9, %v7413_v40 }
0x115e   : > { %v7419_v41 = vpop.eup %7418 }
0x115f   : > { %v2953_v57 = vmul.f32 %v7419_v41, %v7415_v58 }
0x1161   : > { %6911 = vmatprep.mubr.msk.f32.mxu1 %vm1675_vm8, %v2953_v57 }
0x1162   : > { %6912 = vmatmul.mubr.msk.f32.vlgmr.msra.gmra.mxu1 %vm1675_vm8, %v2954_v6 }
0x1163   : > { %6915 = vmatpush3.xpose.msk.msra.mxu1 %vm1585_vm6, %v3050_v15  ;;  %6918 = vmatprep.mubr.msk.f32.mxu1 %vm1585_vm6, %v3044_v21 }
0x1164   : > { %6916 = vmatprep.subr.msk.mxu1 %vm1585_vm6, %v3048_v52 }
0x1167   : > { %6917 = vmatpush3.xpose.msk.msra.mxu1 %vm1585_vm6, %v3048_v52 }
0x1168   : > { %6935 = vmatprep.subr.msk.mxu1 %vm556_vm2, %v8443_v12 }
0x116a   : > { %6919 = vmatmul.mubr.msk.f32.vlgmr.msra.gmra.mxu1 %vm1585_vm6, %v3046_v53 }
0x116b   : > { %6936 = vmatpush3.msk.msra.mxu1 %vm556_vm2, %v8443_v12 }
0x116c   : > { %6937 = vmatprep.subr.mxu1 %v8209_v51 }
0x116d   : > { %6938 = vmatpush3.msra.mxu1 %v8209_v51 }
0x1222   : > { %v8452_v34 = vpop.f32.mrf.mxu1 }
0x1224   : > { %v8454_v32 = vpop.f32.mrf.mxu1 }
0x1225   : > { %v7125_v23 = vpack.i.bf16 %v8452_v34, %v8454_v32 }
0x122a   : > { %v6920_v45 = vpop.f32.mrf.mxu1 }
0x122b   : > { %v3135_v8 = vmul.f32 0.17677669, %v6920_v45 }
0x122c   : > { %v3125_v40 = vpop.f32.mrf.mxu1 }
0x122d   : > { %v3134_v42 = vmul.f32 0.17677669, %v3125_v40  ;;  %v3139_v58 = vsel %vm1679_vm7, %v3135_v8, -inf }
0x122e   : > { %3140 = vmax.xlane.f32.xlu1 %v3139_v58 }
0x122f   : > { %v3136_v55 = vsel %vm1675_vm8, %v3134_v42, -inf }
0x1230   : > { %3137 = vmax.xlane.f32.xlu0 %v3136_v55 }
0x123f   : > { %3158 = vrot.lane.b32.xlu1 %v8294_v2, %s7561_s9 }
0x12b7   : > { %v3141_v14 = vpop.xlane.xlu1 %3140 }
0x12b8   : > { %v3143_v20 = vsub.f32 %v3135_v8, %v3141_v14 }
0x12b9   : > { %v3138_v36 = vpop.xlane.xlu0 %3137 }
0x12ba   : > { %v3146_v48 = vmul.f32 1.442695, %v3143_v20  ;;  %v3142_v15 = vsub.f32 %v3134_v42, %v3138_v36 }
0x12bb   : > { %v3159_v53 = vpop.permute.xlu1 %3158 }
0x12bc   : > { %7420 = vpow2.f32 %v3146_v48  ;;  %v3144_v9 = vmul.f32 1.442695, %v3142_v15 }
0x12be   : > { %7422 = vpow2.f32 %v3144_v9 }
0x12c9   : > { %v7421_v41 = vpop.eup %7420 }
0x12ca   : > { %v3151_v57 = vsel %vm1679_vm7, %v7421_v41, 0.0 }
0x12cb   : > { %v7423_v6 = vpop.eup %7422  ;;  %3152 = vadd.xlane.f32.xlu0 %v3151_v57 }
0x12cc   : > { %v3148_v21 = vsel %vm1675_vm8, %v7423_v6, 0.0 }
0x12cf   : > { %3149 = vadd.xlane.f32.xlu0 %v3148_v21 }
0x12e5   : > { %3160 = vrot.lane.b32.xlu0 %v8139_v62, %s7561_s9 }
0x1354   : > { %v3153_v2 = vpop.xlane.xlu0 %3152 }
0x1355   : > { %7424 = vrcp.f32 %v3153_v2 }
0x1358   : > { %v3150_v25 = vpop.xlane.xlu0 %3149 }
0x1359   : > { %7426 = vrcp.f32 %v3150_v25 }
0x135c   : > { %v3161_v52 = vpop.permute.xlu0 %3160 }
0x135d   : > { %6921 = vmatprep.subr.msk.mxu0 %vm556_vm2, %v3161_v52 }
0x135e   : > { %6922 = vmatpush3.msk.msra.mxu0 %vm556_vm2, %v3161_v52 }
0x135f   : > { %6923 = vmatprep.subr.mxu0 %v3159_v53 }
0x1360   : > { %6924 = vmatpush3.msra.mxu0 %v3159_v53 }
0x1361   : > { %6928 = vmatprep.subr.msk.mxu0 %vm1585_vm6, %v8220_v31 }
0x1362   : > { %v7425_v45 = vpop.eup %7424 }
0x1363   : > { %v3157_v42 = vmul.f32 %v7425_v45, %v7421_v41 }
0x1366   : > { %v7427_v8 = vpop.eup %7426 }
0x1367   : > { %v3156_v40 = vmul.f32 %v7427_v8, %v7423_v6 }
0x1369   : > { %6925 = vmatprep.mubr.msk.f32.mxu0 %vm1675_vm8, %v3156_v40 }
0x136a   : > { %6926 = vmatmul.mubr.msk.f32.vlgmr.msra.gmra.mxu0 %vm1675_vm8, %v3157_v42 }
0x136b   : > { %6929 = vmatpush3.xpose.msk.msra.mxu0 %vm1585_vm6, %v8220_v31  ;;  %6932 = vmatprep.mubr.msk.f32.mxu0 %vm1585_vm6, %v8195_v30 }
0x136c   : > { %6930 = vmatprep.subr.msk.mxu0 %vm1585_vm6, %v8200_v50 }
0x136f   : > { %6931 = vmatpush3.xpose.msk.msra.mxu0 %vm1585_vm6, %v8200_v50 }
0x1372   : > { %6933 = vmatmul.mubr.msk.f32.vlgmr.msra.gmra.mxu0 %vm1585_vm6, %v8215_v0 }
0x142a   : > { %v8482_v62 = vpop.f32.mrf.mxu0 }
0x142c   : > { %v8484_v58 = vpop.f32.mrf.mxu0 }
0x142d   : > { %v7135_v55 = vpack.i.bf16 %v8482_v62, %v8484_v58 }
0x1432   : > { %v6934_v14 = vpop.f32.mrf.mxu0 }
0x1433   : > { %v3374_v20 = vmul.f32 0.17677669, %v6934_v14 }
0x1434   : > { %v3364_v36 = vpop.f32.mrf.mxu0 }
0x1435   : > { %v3373_v48 = vmul.f32 0.17677669, %v3364_v36  ;;  %v3378_v15 = vsel %vm1679_vm7, %v3374_v20, -inf }
0x1436   : > { %3379 = vmax.xlane.f32.xlu0 %v3378_v15 }
0x1437   : > { %v3375_v9 = vsel %vm1675_vm8, %v3373_v48, -inf }
0x1438   : > { %3376 = vmax.xlane.f32.xlu1 %v3375_v9 }
0x14bf   : > { %v3380_v41 = vpop.xlane.xlu0 %3379 }
0x14c0   : > { %v3382_v57 = vsub.f32 %v3374_v20, %v3380_v41 }
0x14c1   : > { %v3377_v6 = vpop.xlane.xlu1 %3376 }
0x14c2   : > { %v3385_v21 = vmul.f32 1.442695, %v3382_v57  ;;  %v3381_v2 = vsub.f32 %v3373_v48, %v3377_v6 }
0x14c4   : > { %7428 = vpow2.f32 %v3385_v21  ;;  %v3383_v25 = vmul.f32 1.442695, %v3381_v2 }
0x14c6   : > { %7430 = vpow2.f32 %v3383_v25 }
0x14d1   : > { %v7429_v52 = vpop.eup %7428 }
0x14d2   : > { %v3390_v53 = vsel %vm1679_vm7, %v7429_v52, 0.0 }
0x14d3   : > { %v7431_v45 = vpop.eup %7430  ;;  %3391 = vadd.xlane.f32.xlu1 %v3390_v53 }
0x14d4   : > { %v3387_v8 = vsel %vm1675_vm8, %v7431_v45, 0.0 }
0x14d5   : > { %3388 = vadd.xlane.f32.xlu0 %v3387_v8 }
0x14e4   : > { %3492 = vrot.lane.b32.xlu1 %v8200_v50, %s7559_s7 }
0x14e8   : > { %3488 = vrot.lane.b32.xlu1 %v8195_v30, %s7559_s7 }
0x14eb   : > { %3494 = vrot.lane.b32.xlu0 %v8220_v31, %s7559_s7 }
0x14ec   : > { %3490 = vrot.lane.b32.xlu1 %v8215_v0, %s7559_s7 }
0x155c   : > { %v3392_v40 = vpop.xlane.xlu1 %3391 }
0x155d   : > { %7432 = vrcp.f32 %v3392_v40 }
0x155e   : > { %v3389_v42 = vpop.xlane.xlu0 %3388 }
0x155f   : > { %7434 = vrcp.f32 %v3389_v42 }
0x1560   : > { %v3493_v20 = vpop.permute.xlu1 %3492 }
0x1562   : > { %v3495_v14 = vpop.permute.xlu0 %3494 }
0x1563   : > { %6942 = vmatprep.subr.msk.mxu1 %vm1585_vm6, %v3495_v14 }
0x1564   : > { %v3489_v41 = vpop.permute.xlu1 %3488 }
0x1568   : > { %v3491_v57 = vpop.permute.xlu1 %3490 }
0x156a   : > { %v7433_v36 = vpop.eup %7432 }
0x156b   : > { %v3396_v9 = vmul.f32 %v7433_v36, %v7429_v52 }
0x156c   : > { %v7435_v48 = vpop.eup %7434 }
0x156d   : > { %v3395_v15 = vmul.f32 %v7435_v48, %v7431_v45 }
0x156f   : > { %6939 = vmatprep.mubr.msk.f32.mxu1 %vm1675_vm8, %v3395_v15 }
0x1570   : > { %6940 = vmatmul.mubr.msk.f32.vlgmr.msra.gmra.mxu1 %vm1675_vm8, %v3396_v9 }
0x1571   : > { %6943 = vmatpush3.xpose.msk.msra.mxu1 %vm1585_vm6, %v3495_v14  ;;  %6946 = vmatprep.mubr.msk.f32.mxu1 %vm1585_vm6, %v3489_v41 }
0x1572   : > { %6944 = vmatprep.subr.msk.mxu1 %vm1585_vm6, %v3493_v20 }
0x1575   : > { %6945 = vmatpush3.xpose.msk.msra.mxu1 %vm1585_vm6, %v3493_v20 }
0x1578   : > { %6947 = vmatmul.mubr.msk.f32.vlgmr.msra.gmra.mxu1 %vm1585_vm6, %v3491_v57 }
0x1630   : > { %v8508_v6 = vpop.f32.mrf.mxu1 }
0x1632   : > { %v8510_v21 = vpop.f32.mrf.mxu1 }
0x1638   : > { %v6948_v2 = vpop.f32.mrf.mxu1 }
0x1639   : > { %v3580_v25 = vmul.f32 0.17677669, %v6948_v2 }
0x163a   : > { %v3570_v52 = vpop.f32.mrf.mxu1 }
0x163b   : > { %v3579_v53 = vmul.f32 0.17677669, %v3570_v52  ;;  %v3584_v45 = vsel %vm1679_vm7, %v3580_v25, -inf }
0x163c   : > { %3585 = vmax.xlane.f32.xlu1 %v3584_v45 }
0x163d   : > { %v3581_v8 = vsel %vm1675_vm8, %v3579_v53, -inf }
0x163e   : > { %3582 = vmax.xlane.f32.xlu0 %v3581_v8 }
0x164d   : > { %3603 = vrot.lane.b32.xlu1 %v8209_v51, %s7559_s7 }
0x1651   : > { %3697 = vrot.lane.b32.xlu1 %v8220_v31, %s7560_s8 }
0x1655   : > { %3695 = vrot.lane.b32.xlu1 %v8200_v50, %s7560_s8 }
0x1659   : > { %3693 = vrot.lane.b32.xlu1 %v8215_v0, %s7560_s8 }
0x16c5   : > { %v3586_v40 = vpop.xlane.xlu1 %3585 }
0x16c6   : > { %v3588_v42 = vsub.f32 %v3580_v25, %v3586_v40 }
0x16c7   : > { %v3583_v14 = vpop.xlane.xlu0 %3582 }
0x16c8   : > { %v3591_v20 = vmul.f32 1.442695, %v3588_v42  ;;  %v3587_v36 = vsub.f32 %v3579_v53, %v3583_v14 }
0x16c9   : > { %v3604_v52 = vpop.permute.xlu1 %3603 }
0x16ca   : > { %7436 = vpow2.f32 %v3591_v20  ;;  %v3589_v48 = vmul.f32 1.442695, %v3587_v36 }
0x16cc   : > { %7438 = vpow2.f32 %v3589_v48 }
0x16cd   : > { %v3698_v45 = vpop.permute.xlu1 %3697 }
0x16d1   : > { %v3696_v36 = vpop.permute.xlu1 %3695 }
0x16d5   : > { %v3694_v48 = vpop.permute.xlu1 %3693 }
0x16d7   : > { %v7437_v15 = vpop.eup %7436 }
0x16d8   : > { %v3596_v9 = vsel %vm1679_vm7, %v7437_v15, 0.0 }
0x16d9   : > { %v7439_v41 = vpop.eup %7438  ;;  %3597 = vadd.xlane.f32.xlu0 %v3596_v9 }
0x16da   : > { %v3593_v57 = vsel %vm1675_vm8, %v7439_v41, 0.0 }
0x16dd   : > { %3594 = vadd.xlane.f32.xlu0 %v3593_v57 }
0x16f3   : > { %3605 = vrot.lane.b32.xlu0 %v8443_v12, %s7559_s7 }
0x16f7   : > { %3691 = vrot.lane.b32.xlu0 %v8195_v30, %s7560_s8 }
0x1762   : > { %v3598_v2 = vpop.xlane.xlu0 %3597 }
0x1763   : > { %7440 = vrcp.f32 %v3598_v2 }
0x1766   : > { %v3595_v25 = vpop.xlane.xlu0 %3594 }
0x1767   : > { %7442 = vrcp.f32 %v3595_v25 }
0x176a   : > { %v3606_v53 = vpop.permute.xlu0 %3605 }
0x176b   : > { %6949 = vmatprep.subr.msk.mxu0 %vm556_vm2, %v3606_v53 }
0x176c   : > { %6950 = vmatpush3.msk.msra.mxu0 %vm556_vm2, %v3606_v53 }
0x176d   : > { %6951 = vmatprep.subr.mxu0 %v3604_v52 }
0x176e   : > { %6952 = vmatpush3.msra.mxu0 %v3604_v52  ;;  %v3692_v20 = vpop.permute.xlu0 %3691 }
0x176f   : > { %6956 = vmatprep.subr.msk.mxu0 %vm1585_vm6, %v3698_v45 }
0x1770   : > { %v7441_v8 = vpop.eup %7440 }
0x1771   : > { %v3602_v14 = vmul.f32 %v7441_v8, %v7437_v15 }
0x1774   : > { %v7443_v40 = vpop.eup %7442 }
0x1775   : > { %v3601_v42 = vmul.f32 %v7443_v40, %v7439_v41 }
0x1777   : > { %6953 = vmatprep.mubr.msk.f32.mxu0 %vm1675_vm8, %v3601_v42 }
0x1778   : > { %6954 = vmatmul.mubr.msk.f32.vlgmr.msra.gmra.mxu0 %vm1675_vm8, %v3602_v14 }
0x1779   : > { %6957 = vmatpush3.xpose.msk.msra.mxu0 %vm1585_vm6, %v3698_v45  ;;  %6960 = vmatprep.mubr.msk.f32.mxu0 %vm1585_vm6, %v3692_v20 }
0x177a   : > { %6958 = vmatprep.subr.msk.mxu0 %vm1585_vm6, %v3696_v36 }
0x177d   : > { %6959 = vmatpush3.xpose.msk.msra.mxu0 %vm1585_vm6, %v3696_v36 }
0x1780   : > { %6961 = vmatmul.mubr.msk.f32.vlgmr.msra.gmra.mxu0 %vm1585_vm6, %v3694_v48 }
0x1838   : > { %v8538_v9 = vpop.f32.mrf.mxu0 }
0x183a   : > { %v8540_v15 = vpop.f32.mrf.mxu0 }
0x1840   : > { %v6962_v41 = vpop.f32.mrf.mxu0 }
0x1841   : > { %v3783_v57 = vmul.f32 0.17677669, %v6962_v41 }
0x1842   : > { %v3773_v2 = vpop.f32.mrf.mxu0 }
0x1843   : > { %v3782_v25 = vmul.f32 0.17677669, %v3773_v2  ;;  %v3787_v52 = vsel %vm1679_vm7, %v3783_v57, -inf }
0x1844   : > { %3788 = vmax.xlane.f32.xlu1 %v3787_v52 }
0x1845   : > { %v3784_v53 = vsel %vm1675_vm8, %v3782_v25, -inf }
0x1846   : > { %3785 = vmax.xlane.f32.xlu0 %v3784_v53 }
0x1855   : > { %3806 = vrot.lane.b32.xlu1 %v8209_v51, %s7560_s8 }
0x1859   : > { %3900 = vrot.lane.b32.xlu1 %v8220_v31, %s7561_s9 }
0x185d   : > { %3898 = vrot.lane.b32.xlu1 %v8200_v50, %s7561_s9 }
0x1861   : > { %3896 = vrot.lane.b32.xlu1 %v8215_v0, %s7561_s9 }
0x18cd   : > { %v3789_v45 = vpop.xlane.xlu1 %3788 }
0x18ce   : > { %v3791_v8 = vsub.f32 %v3783_v57, %v3789_v45 }
0x18cf   : > { %v3786_v40 = vpop.xlane.xlu0 %3785 }
0x18d0   : > { %v3794_v42 = vmul.f32 1.442695, %v3791_v8  ;;  %v3790_v14 = vsub.f32 %v3782_v25, %v3786_v40 }
0x18d1   : > { %v3807_v57 = vpop.permute.xlu1 %3806 }
0x18d2   : > { %7444 = vpow2.f32 %v3794_v42  ;;  %v3792_v20 = vmul.f32 1.442695, %v3790_v14 }
0x18d4   : > { %7446 = vpow2.f32 %v3792_v20  ;;  %v4243_v20 = vrot.slane %v8431_v17, 2 }
0x18d5   : > { %v3901_v25 = vpop.permute.xlu1 %3900 }
0x18d9   : > { %v3899_v42 = vpop.permute.xlu1 %3898 }
0x18df   : > { %v7445_v36 = vpop.eup %7444 }
0x18e0   : > { %v3799_v48 = vsel %vm1679_vm7, %v7445_v36, 0.0 }
0x18e1   : > { %v7447_v41 = vpop.eup %7446  ;;  %3800 = vadd.xlane.f32.xlu0 %v3799_v48 }
0x18e2   : > { %v3796_v31 = vsel %vm1675_vm8, %v7447_v41, 0.0 }
0x18e5   : > { %3797 = vadd.xlane.f32.xlu0 %v3796_v31 }
0x18fb   : > { %3808 = vrot.lane.b32.xlu0 %v8443_v12, %s7560_s8 }
0x18ff   : > { %3894 = vrot.lane.b32.xlu0 %v8195_v30, %s7561_s9  ;;  %v1580_v30 = vadd.f32 %v8184_v10, %v8103_v46  ;;  %v3897_v46 = vpop.permute.xlu1 %3896 }
0x1901   : > { %v8568_v14 = vrot.slane %v1580_v30, 2 }
0x1903   : > { %v8579_v10 = vsel %vm556_vm2, %v4243_v20, %v8568_v14 }
0x196a   : > { %v3801_v50 = vpop.xlane.xlu0 %3800 }
0x196b   : > { %7448 = vrcp.f32 %v3801_v50 }
0x196e   : > { %v3798_v0 = vpop.xlane.xlu0 %3797 }
0x196f   : > { %7450 = vrcp.f32 %v3798_v0 }
0x1972   : > { %v3809_v2 = vpop.permute.xlu0 %3808 }
0x1973   : > { %6963 = vmatprep.subr.msk.mxu1 %vm556_vm2, %v3809_v2 }
0x1974   : > { %6964 = vmatpush3.msk.msra.mxu1 %vm556_vm2, %v3809_v2 }
0x1975   : > { %6965 = vmatprep.subr.mxu1 %v3807_v57 }
0x1976   : > { %6966 = vmatpush3.msra.mxu1 %v3807_v57  ;;  %v3895_v40 = vpop.permute.xlu0 %3894 }
0x1977   : > { %6970 = vmatprep.subr.msk.mxu1 %vm1585_vm6, %v3901_v25 }
0x1978   : > { %v7449_v52 = vpop.eup %7448 }
0x1979   : > { %v3805_v8 = vmul.f32 %v7449_v52, %v7445_v36 }
0x197c   : > { %v7451_v53 = vpop.eup %7450 }
0x197d   : > { %v3804_v45 = vmul.f32 %v7451_v53, %v7447_v41 }
0x197f   : > { %6967 = vmatprep.mubr.msk.f32.mxu1 %vm1675_vm8, %v3804_v45 }
0x1980   : > { %6968 = vmatmul.mubr.msk.f32.vlgmr.msra.gmra.mxu1 %vm1675_vm8, %v3805_v8 }
0x1981   : > { %6971 = vmatpush3.xpose.msk.msra.mxu1 %vm1585_vm6, %v3901_v25  ;;  %6974 = vmatprep.mubr.msk.f32.mxu1 %vm1585_vm6, %v3895_v40 }
0x1982   : > { %6972 = vmatprep.subr.msk.mxu1 %vm1585_vm6, %v3899_v42 }
0x1985   : > { %6973 = vmatpush3.xpose.msk.msra.mxu1 %vm1585_vm6, %v3899_v42 }
0x1986   : > { %6991 = vmatprep.subr.msk.mxu1 %vm556_vm2, %v8568_v14 }
0x1988   : > { %6975 = vmatmul.mubr.msk.f32.vlgmr.msra.gmra.mxu1 %vm1585_vm6, %v3897_v46 }
0x1989   : > { %6992 = vmatpush3.msk.msra.mxu1 %vm556_vm2, %v8568_v14 }
0x198a   : > { %6993 = vmatprep.subr.mxu1 %v8579_v10 }
0x198b   : > { %6994 = vmatpush3.msra.mxu1 %v8579_v10 }
0x1a40   : > { %v8583_v17 = vpop.f32.mrf.mxu1 }
0x1a42   : > { %v8585_v36 = vpop.f32.mrf.mxu1 }
0x1a48   : > { %v6976_v48 = vpop.f32.mrf.mxu1 }
0x1a49   : > { %v3986_v41 = vmul.f32 0.17677669, %v6976_v48  ;;  %v1517_v48 = vadd.f32 %v8217_v3, %v8100_v44  ;;  %v4128_v3 = vrot.slane %v8192_v37, 2 }
0x1a4a   : > { %v3976_v31 = vpop.f32.mrf.mxu1 }
0x1a4b   : > { %v3985_v50 = vmul.f32 0.17677669, %v3976_v31  ;;  %v3990_v0 = vsel %vm1679_vm7, %v3986_v41, -inf }
0x1a4c   : > { %3991 = vmax.xlane.f32.xlu1 %v3990_v0 }
0x1a4d   : > { %v3987_v57 = vsel %vm1675_vm8, %v3985_v50, -inf }
0x1a4e   : > { %3988 = vmax.xlane.f32.xlu0 %v3987_v57 }
0x1a5d   : > { %4009 = vrot.lane.b32.xlu1 %v8209_v51, %s7561_s9 }
0x1ad5   : > { %v3992_v2 = vpop.xlane.xlu1 %3991 }
0x1ad6   : > { %v3994_v25 = vsub.f32 %v3986_v41, %v3992_v2 }
0x1ad7   : > { %v3989_v52 = vpop.xlane.xlu0 %3988 }
0x1ad8   : > { %v3997_v53 = vmul.f32 1.442695, %v3994_v25  ;;  %v3993_v45 = vsub.f32 %v3985_v50, %v3989_v52  ;;  %v8599_v50 = vrot.slane %v1517_v48, 2  ;;  %v4132_v52 = vrot.slane %v8204_v56, 2 }
0x1ad9   : > { %v4010_v31 = vpop.permute.xlu1 %4009 }
0x1ada   : > { %7452 = vpow2.f32 %v3997_v53  ;;  %v3995_v8 = vmul.f32 1.442695, %v3993_v45 }
0x1adc   : > { %7454 = vpow2.f32 %v3995_v8 }
0x1ae7   : > { %v7453_v30 = vpop.eup %7452 }
0x1ae8   : > { %v4002_v40 = vsel %vm1679_vm7, %v7453_v30, 0.0 }
0x1ae9   : > { %v7455_v42 = vpop.eup %7454  ;;  %4003 = vadd.xlane.f32.xlu0 %v4002_v40 }
0x1aea   : > { %v3999_v20 = vsel %vm1675_vm8, %v7455_v42, 0.0 }
0x1aed   : > { %4000 = vadd.xlane.f32.xlu0 %v3999_v20 }
0x1b03   : > { %4011 = vrot.lane.b32.xlu0 %v8443_v12, %s7561_s9  ;;  %v1515_v12 = vadd.f32 %v8211_v61, %v8097_v7  ;;  %v8619_v7 = vsel %vm556_vm2, %v4132_v52, %v8599_v50 }
0x1b05   : > { %v8605_v2 = vrot.slane %v1515_v12, 2 }
0x1b07   : > { %v8613_v53 = vsel %vm556_vm2, %v4128_v3, %v8605_v2 }
0x1b72   : > { %v4004_v51 = vpop.xlane.xlu0 %4003 }
0x1b73   : > { %7456 = vrcp.f32 %v4004_v51 }
0x1b76   : > { %v4001_v46 = vpop.xlane.xlu0 %4000 }
0x1b77   : > { %7458 = vrcp.f32 %v4001_v46 }
0x1b7a   : > { %v4012_v41 = vpop.permute.xlu0 %4011 }
0x1b7b   : > { %6977 = vmatprep.subr.msk.mxu0 %vm556_vm2, %v4012_v41 }
0x1b7c   : > { %6978 = vmatpush3.msk.msra.mxu0 %vm556_vm2, %v4012_v41 }
0x1b7d   : > { %6979 = vmatprep.subr.mxu0 %v4010_v31 }
0x1b7e   : > { %6980 = vmatpush3.msra.mxu0 %v4010_v31 }
0x1b7f   : > { %6984 = vmatprep.subr.msk.mxu0 %vm1585_vm6, %v8599_v50 }
0x1b80   : > { %v7457_v0 = vpop.eup %7456 }
0x1b81   : > { %v4008_v25 = vmul.f32 %v7457_v0, %v7453_v30 }
0x1b84   : > { %v7459_v57 = vpop.eup %7458 }
0x1b85   : > { %v4007_v44 = vmul.f32 %v7459_v57, %v7455_v42 }
0x1b87   : > { %6981 = vmatprep.mubr.msk.f32.mxu0 %vm1675_vm8, %v4007_v44 }
0x1b88   : > { %6982 = vmatmul.mubr.msk.f32.vlgmr.msra.gmra.mxu0 %vm1675_vm8, %v4008_v25 }
0x1b89   : > { %6985 = vmatpush3.xpose.msk.msra.mxu0 %vm1585_vm6, %v8599_v50  ;;  %6988 = vmatprep.mubr.msk.f32.mxu0 %vm1585_vm6, %v8613_v53 }
0x1b8a   : > { %6986 = vmatprep.subr.msk.mxu0 %vm1585_vm6, %v8619_v7 }
0x1b8d   : > { %6987 = vmatpush3.xpose.msk.msra.mxu0 %vm1585_vm6, %v8619_v7 }
0x1b90   : > { %6989 = vmatmul.mubr.msk.f32.vlgmr.msra.gmra.mxu0 %vm1585_vm6, %v8605_v2 }
0x1c48   : > { %v8629_v37 = vpop.f32.mrf.mxu0 }
0x1c4a   : > { %v8631_v56 = vpop.f32.mrf.mxu0 }
0x1c50   : > { %v6990_v61 = vpop.f32.mrf.mxu0 }
0x1c51   : > { %v4219_v45 = vmul.f32 0.17677669, %v6990_v61 }
0x1c52   : > { %v4209_v8 = vpop.f32.mrf.mxu0 }
0x1c53   : > { %v4218_v30 = vmul.f32 0.17677669, %v4209_v8  ;;  %v4223_v40 = vsel %vm1679_vm7, %v4219_v45, -inf }
0x1c54   : > { %4224 = vmax.xlane.f32.xlu0 %v4223_v40 }
0x1c55   : > { %v4220_v42 = vsel %vm1675_vm8, %v4218_v30, -inf }
0x1c56   : > { %4221 = vmax.xlane.f32.xlu1 %v4220_v42 }
0x1cdd   : > { %v4225_v20 = vpop.xlane.xlu0 %4224 }
0x1cde   : > { %v4227_v51 = vsub.f32 %v4219_v45, %v4225_v20 }
0x1cdf   : > { %v4222_v46 = vpop.xlane.xlu1 %4221 }
0x1ce0   : > { %v4230_v48 = vmul.f32 1.442695, %v4227_v51  ;;  %v4226_v41 = vsub.f32 %v4218_v30, %v4222_v46 }
0x1ce2   : > { %7460 = vpow2.f32 %v4230_v48  ;;  %v4228_v31 = vmul.f32 1.442695, %v4226_v41 }
0x1ce4   : > { %7462 = vpow2.f32 %v4228_v31 }
0x1cef   : > { %v7461_v12 = vpop.eup %7460 }
0x1cf0   : > { %v4235_v0 = vsel %vm1679_vm7, %v7461_v12, 0.0 }
0x1cf1   : > { %v7463_v57 = vpop.eup %7462  ;;  %4236 = vadd.xlane.f32.xlu1 %v4235_v0 }
0x1cf2   : > { %v4232_v44 = vsel %vm1675_vm8, %v7463_v57, 0.0 }
0x1cf3   : > { %4233 = vadd.xlane.f32.xlu0 %v4232_v44 }
0x1d02   : > { %4334 = vrot.lane.b32.xlu1 %v8619_v7, %s7559_s7 }
0x1d06   : > { %4330 = vrot.lane.b32.xlu1 %v8613_v53, %s7559_s7 }
0x1d09   : > { %4336 = vrot.lane.b32.xlu0 %v8599_v50, %s7559_s7 }
0x1d0a   : > { %4332 = vrot.lane.b32.xlu1 %v8605_v2, %s7559_s7 }
0x1d7a   : > { %v4237_v3 = vpop.xlane.xlu1 %4236 }
0x1d7b   : > { %7464 = vrcp.f32 %v4237_v3 }
0x1d7c   : > { %v4234_v25 = vpop.xlane.xlu0 %4233 }
0x1d7d   : > { %7466 = vrcp.f32 %v4234_v25 }
0x1d7e   : > { %v4335_v61 = vpop.permute.xlu1 %4334 }
0x1d80   : > { %v4337_v52 = vpop.permute.xlu0 %4336 }
0x1d81   : > { %6998 = vmatprep.subr.msk.mxu1 %vm1585_vm6, %v4337_v52 }
0x1d82   : > { %v4331_v42 = vpop.permute.xlu1 %4330 }
0x1d86   : > { %v4333_v20 = vpop.permute.xlu1 %4332 }
0x1d88   : > { %v7465_v45 = vpop.eup %7464 }
0x1d89   : > { %v4241_v40 = vmul.f32 %v7465_v45, %v7461_v12 }
0x1d8a   : > { %v7467_v8 = vpop.eup %7466 }
0x1d8b   : > { %v4240_v30 = vmul.f32 %v7467_v8, %v7463_v57 }
0x1d8d   : > { %6995 = vmatprep.mubr.msk.f32.mxu1 %vm1675_vm8, %v4240_v30 }
0x1d8e   : > { %6996 = vmatmul.mubr.msk.f32.vlgmr.msra.gmra.mxu1 %vm1675_vm8, %v4241_v40 }
0x1d8f   : > { %6999 = vmatpush3.xpose.msk.msra.mxu1 %vm1585_vm6, %v4337_v52  ;;  %7002 = vmatprep.mubr.msk.f32.mxu1 %vm1585_vm6, %v4331_v42 }
0x1d90   : > { %7000 = vmatprep.subr.msk.mxu1 %vm1585_vm6, %v4335_v61 }
0x1d93   : > { %7001 = vmatpush3.xpose.msk.msra.mxu1 %vm1585_vm6, %v4335_v61 }
0x1d96   : > { %7003 = vmatmul.mubr.msk.f32.vlgmr.msra.gmra.mxu1 %vm1585_vm6, %v4333_v20 }
0x1e4e   : > { %v8653_v51 = vpop.f32.mrf.mxu1 }
0x1e50   : > { %v8655_v46 = vpop.f32.mrf.mxu1 }
0x1e56   : > { %v7004_v48 = vpop.f32.mrf.mxu1 }
0x1e57   : > { %v4422_v41 = vmul.f32 0.17677669, %v7004_v48 }
0x1e58   : > { %v4412_v31 = vpop.f32.mrf.mxu1 }
0x1e59   : > { %v4421_v12 = vmul.f32 0.17677669, %v4412_v31  ;;  %v4426_v0 = vsel %vm1679_vm7, %v4422_v41, -inf }
0x1e5a   : > { %4427 = vmax.xlane.f32.xlu1 %v4426_v0 }
0x1e5b   : > { %v4423_v57 = vsel %vm1675_vm8, %v4421_v12, -inf }
0x1e5c   : > { %4424 = vmax.xlane.f32.xlu0 %v4423_v57 }
0x1e6b   : > { %4445 = vrot.lane.b32.xlu1 %v8579_v10, %s7559_s7 }
0x1e6f   : > { %4539 = vrot.lane.b32.xlu1 %v8599_v50, %s7560_s8 }
0x1e73   : > { %4537 = vrot.lane.b32.xlu1 %v8619_v7, %s7560_s8 }
0x1e77   : > { %4535 = vrot.lane.b32.xlu1 %v8605_v2, %s7560_s8 }
0x1ee3   : > { %v4428_v44 = vpop.xlane.xlu1 %4427 }
0x1ee4   : > { %v4430_v3 = vsub.f32 %v4422_v41, %v4428_v44 }
0x1ee5   : > { %v4425_v25 = vpop.xlane.xlu0 %4424 }
0x1ee6   : > { %v4433_v52 = vmul.f32 1.442695, %v4430_v3  ;;  %v4429_v61 = vsub.f32 %v4421_v12, %v4425_v25 }
0x1ee7   : > { %v4446_v41 = vpop.permute.xlu1 %4445 }
0x1ee8   : > { %7468 = vpow2.f32 %v4433_v52  ;;  %v4431_v45 = vmul.f32 1.442695, %v4429_v61 }
0x1eea   : > { %7470 = vpow2.f32 %v4431_v45 }
0x1eeb   : > { %v4540_v12 = vpop.permute.xlu1 %4539 }
0x1eef   : > { %v4538_v52 = vpop.permute.xlu1 %4537 }
0x1ef3   : > { %v4536_v61 = vpop.permute.xlu1 %4535 }
0x1ef5   : > { %v7469_v8 = vpop.eup %7468 }
0x1ef6   : > { %v4438_v30 = vsel %vm1679_vm7, %v7469_v8, 0.0 }
0x1ef7   : > { %v7471_v40 = vpop.eup %7470  ;;  %4439 = vadd.xlane.f32.xlu0 %v4438_v30 }
0x1ef8   : > { %v4435_v42 = vsel %vm1675_vm8, %v7471_v40, 0.0 }
0x1efb   : > { %4436 = vadd.xlane.f32.xlu0 %v4435_v42 }
0x1f11   : > { %4447 = vrot.lane.b32.xlu0 %v8568_v14, %s7559_s7 }
0x1f15   : > { %4533 = vrot.lane.b32.xlu0 %v8613_v53, %s7560_s8 }
0x1f80   : > { %v4440_v20 = vpop.xlane.xlu0 %4439 }
0x1f81   : > { %7472 = vrcp.f32 %v4440_v20 }
0x1f84   : > { %v4437_v48 = vpop.xlane.xlu0 %4436 }
0x1f85   : > { %7474 = vrcp.f32 %v4437_v48 }
0x1f88   : > { %v4448_v31 = vpop.permute.xlu0 %4447 }
0x1f89   : > { %7005 = vmatprep.subr.msk.mxu0 %vm556_vm2, %v4448_v31 }
0x1f8a   : > { %7006 = vmatpush3.msk.msra.mxu0 %vm556_vm2, %v4448_v31 }
0x1f8b   : > { %7007 = vmatprep.subr.mxu0 %v4446_v41 }
0x1f8c   : > { %7008 = vmatpush3.msra.mxu0 %v4446_v41  ;;  %v4534_v25 = vpop.permute.xlu0 %4533 }
0x1f8d   : > { %7012 = vmatprep.subr.msk.mxu0 %vm1585_vm6, %v4540_v12 }
0x1f8e   : > { %v7473_v0 = vpop.eup %7472 }
0x1f8f   : > { %v4444_v3 = vmul.f32 %v7473_v0, %v7469_v8 }
0x1f92   : > { %v7475_v57 = vpop.eup %7474 }
0x1f93   : > { %v4443_v44 = vmul.f32 %v7475_v57, %v7471_v40 }
0x1f95   : > { %7009 = vmatprep.mubr.msk.f32.mxu0 %vm1675_vm8, %v4443_v44 }
0x1f96   : > { %7010 = vmatmul.mubr.msk.f32.vlgmr.msra.gmra.mxu0 %vm1675_vm8, %v4444_v3 }
0x1f97   : > { %7013 = vmatpush3.xpose.msk.msra.mxu0 %vm1585_vm6, %v4540_v12  ;;  %7016 = vmatprep.mubr.msk.f32.mxu0 %vm1585_vm6, %v4534_v25 }
0x1f98   : > { %7014 = vmatprep.subr.msk.mxu0 %vm1585_vm6, %v4538_v52 }
0x1f9b   : > { %7015 = vmatpush3.xpose.msk.msra.mxu0 %vm1585_vm6, %v4538_v52 }
0x1f9e   : > { %7017 = vmatmul.mubr.msk.f32.vlgmr.msra.gmra.mxu0 %vm1585_vm6, %v4536_v61 }
0x2056   : > { %v8683_v45 = vpop.f32.mrf.mxu0 }
0x2058   : > { %v8685_v8 = vpop.f32.mrf.mxu0 }
0x2059   : > { %v7155_v30 = vpack.i.bf16 %v8683_v45, %v8685_v8 }
0x205e   : > { %v7018_v40 = vpop.f32.mrf.mxu0 }
0x205f   : > { %v4625_v42 = vmul.f32 0.17677669, %v7018_v40 }
0x2060   : > { %v4615_v20 = vpop.f32.mrf.mxu0 }
0x2061   : > { %v4624_v48 = vmul.f32 0.17677669, %v4615_v20  ;;  %v4629_v41 = vsel %vm1679_vm7, %v4625_v42, -inf }
0x2062   : > { %4630 = vmax.xlane.f32.xlu1 %v4629_v41 }
0x2063   : > { %v4626_v31 = vsel %vm1675_vm8, %v4624_v48, -inf }
0x2064   : > { %4627 = vmax.xlane.f32.xlu0 %v4626_v31 }
0x2073   : > { %4648 = vrot.lane.b32.xlu1 %v8579_v10, %s7560_s8 }
0x2077   : > { %4742 = vrot.lane.b32.xlu1 %v8599_v50, %s7561_s9 }
0x207b   : > { %4740 = vrot.lane.b32.xlu1 %v8619_v7, %s7561_s9 }
0x207f   : > { %4738 = vrot.lane.b32.xlu1 %v8605_v2, %s7561_s9 }
0x20eb   : > { %v4631_v12 = vpop.xlane.xlu1 %4630 }
0x20ec   : > { %v4633_v0 = vsub.f32 %v4625_v42, %v4631_v12 }
0x20ed   : > { %v4628_v57 = vpop.xlane.xlu0 %4627 }
0x20ee   : > { %v4636_v44 = vmul.f32 1.442695, %v4633_v0  ;;  %v4632_v3 = vsub.f32 %v4624_v48, %v4628_v57 }
0x20ef   : > { %v4649_v42 = vpop.permute.xlu1 %4648 }
0x20f0   : > { %7476 = vpow2.f32 %v4636_v44  ;;  %v4634_v25 = vmul.f32 1.442695, %v4632_v3 }
0x20f2   : > { %7478 = vpow2.f32 %v4634_v25 }
0x20f3   : > { %v4743_v48 = vpop.permute.xlu1 %4742 }
0x20f7   : > { %v4741_v57 = vpop.permute.xlu1 %4740 }
0x20fb   : > { %v4739_v44 = vpop.permute.xlu1 %4738 }
0x20fd   : > { %v7477_v52 = vpop.eup %7476 }
0x20fe   : > { %v4641_v61 = vsel %vm1679_vm7, %v7477_v52, 0.0 }
0x20ff   : > { %v7479_v40 = vpop.eup %7478  ;;  %4642 = vadd.xlane.f32.xlu0 %v4641_v61 }
0x2100   : > { %v4638_v50 = vsel %vm1675_vm8, %v7479_v40, 0.0 }
0x2103   : > { %4639 = vadd.xlane.f32.xlu0 %v4638_v50 }
0x2119   : > { %4650 = vrot.lane.b32.xlu0 %v8568_v14, %s7560_s8 }
0x211d   : > { %4736 = vrot.lane.b32.xlu0 %v8613_v53, %s7561_s9 }
0x2188   : > { %v4643_v2 = vpop.xlane.xlu0 %4642 }
0x2189   : > { %7480 = vrcp.f32 %v4643_v2 }
0x218c   : > { %v4640_v7 = vpop.xlane.xlu0 %4639 }
0x218d   : > { %7482 = vrcp.f32 %v4640_v7 }
0x2190   : > { %v4651_v20 = vpop.permute.xlu0 %4650 }
0x2191   : > { %7019 = vmatprep.subr.msk.mxu1 %vm556_vm2, %v4651_v20 }
0x2192   : > { %7020 = vmatpush3.msk.msra.mxu1 %vm556_vm2, %v4651_v20 }
0x2193   : > { %7021 = vmatprep.subr.mxu1 %v4649_v42 }
0x2194   : > { %7022 = vmatpush3.msra.mxu1 %v4649_v42  ;;  %v4737_v53 = vpop.permute.xlu0 %4736  ;;  %v7145_v42 = vpack.i.bf16 %v8538_v9, %v8252_v26  ;;  %v7140_v9 = vpack.i.bf16 %v8298_v16, %v8585_v36 }
0x2195   : > { %7026 = vmatprep.subr.msk.mxu1 %vm1585_vm6, %v4743_v48 }
0x2196   : > { %v7481_v41 = vpop.eup %7480 }
0x2197   : > { %v4647_v0 = vmul.f32 %v7481_v41, %v7477_v52 }
0x219a   : > { %v7483_v31 = vpop.eup %7482 }
0x219b   : > { %v4646_v12 = vmul.f32 %v7483_v31, %v7479_v40 }
0x219d   : > { %7023 = vmatprep.mubr.msk.f32.mxu1 %vm1675_vm8, %v4646_v12 }
0x219e   : > { %7024 = vmatmul.mubr.msk.f32.vlgmr.msra.gmra.mxu1 %vm1675_vm8, %v4647_v0 }
0x219f   : > { %7027 = vmatpush3.xpose.msk.msra.mxu1 %vm1585_vm6, %v4743_v48  ;;  %7030 = vmatprep.mubr.msk.f32.mxu1 %vm1585_vm6, %v4737_v53 }
0x21a0   : > { %7028 = vmatprep.subr.msk.mxu1 %vm1585_vm6, %v4741_v57 }
0x21a3   : > { %7029 = vmatpush3.xpose.msk.msra.mxu1 %vm1585_vm6, %v4741_v57 }
0x21a6   : > { %7031 = vmatmul.mubr.msk.f32.vlgmr.msra.gmra.mxu1 %vm1585_vm6, %v4739_v44 }
0x21a7   : > { %5380 = vmatprep.mubr.bf16.mxu1 %v7558_v60 }
0x225e   : > { %v7025_v3 = vpop.f32.mrf.mxu1 }
0x2260   : > { %v4727_v25 = vpop.f32.mrf.mxu1 }
0x2266   : > { %v7032_v52 = vpop.f32.mrf.mxu1 }
0x2267   : > { %v4828_v61 = vmul.f32 0.17677669, %v7032_v52 }
0x2268   : > { %v4818_v40 = vpop.f32.mrf.mxu1 }
0x2269   : > { %v4827_v50 = vmul.f32 0.17677669, %v4818_v40  ;;  %v4832_v2 = vsel %vm1679_vm7, %v4828_v61, -inf }
0x226a   : > { %4833 = vmax.xlane.f32.xlu1 %v4832_v2 }
0x226b   : > { %v4829_v7 = vsel %vm1675_vm8, %v4827_v50, -inf }
0x226c   : > { %4830 = vmax.xlane.f32.xlu0 %v4829_v7 }
0x227b   : > { %4851 = vrot.lane.b32.xlu1 %v8579_v10, %s7561_s9  ;;  %v7150_v10 = vpack.i.bf16 %v8350_v5, %v8631_v56 }
0x227f   : > { %7121 = vrot.lane.b32.xlu1 %v7120_v59, %s7561_s9 }
0x2283   : > { %7126 = vrot.lane.b32.xlu1 %v7125_v23, %s7560_s8 }
0x2287   : > { %7136 = vrot.lane.b32.xlu1 %v7135_v55, %s7559_s7  ;;  %v7130_v55 = vpack.i.bf16 %v8250_v24, %v8540_v15 }
0x228b   : > { %7146 = vrot.lane.b32.xlu1 %v7145_v42, %s7561_s9 }
0x228f   : > { %2403 = vrot.lane.b32.xlu1 %v8300_v33, %s7560_s8 }
0x2293   : > { %7156 = vrot.lane.b32.xlu1 %v7155_v30, %s7561_s9 }
0x22f3   : > { %v4834_v54 = vpop.xlane.xlu1 %4833 }
0x22f4   : > { %v4836_v47 = vsub.f32 %v4828_v61, %v4834_v54 }
0x22f5   : > { %v4831_v59 = vpop.xlane.xlu0 %4830 }
0x22f6   : > { %v4839_v34 = vmul.f32 1.442695, %v4836_v47  ;;  %v4835_v32 = vsub.f32 %v4827_v50, %v4831_v59  ;;  %v7243_v50 = vld [vmem:[%s9260_s1 + $0x170] sm:$0xff]  }
0x22f7   : > { %v4852_v24 = vpop.permute.xlu1 %4851 }
0x22f8   : > { %7484 = vpow2.f32 %v4839_v34  ;;  %v4837_v23 = vmul.f32 1.442695, %v4835_v32 }
0x22fa   : > { %7486 = vpow2.f32 %v4837_v23 }
0x22fb   : > { %v8759_v15 = vpop.permute.xlu1 %7121 }
0x22fc   : > { %v7123_v8 = vunpack.i.l.bf16 %v8759_v15 }
0x22fe   : > { %v3270_v12 = vsel %vm1585_vm6, %v8376_v11, %v7123_v8 }
0x22ff   : > { %v8761_v36 = vpop.permute.xlu1 %7126 }
0x2300   : > { %v7128_v30 = vunpack.i.l.bf16 %v8761_v36 }
0x2302   : > { %v3272_v44 = vsel %vm2419_vm9, %v3270_v12, %v7128_v30 }
0x2303   : > { %v8763_v5 = vpop.permute.xlu1 %7136 }
0x2304   : > { %v7138_v48 = vunpack.i.l.bf16 %v8763_v5 }
0x2305   : > { %v7485_v62 = vpop.eup %7484 }
0x2306   : > { %v4844_v26 = vsel %vm1679_vm7, %v7485_v62, 0.0 }
0x2307   : > { %v7487_v58 = vpop.eup %7486  ;;  %4845 = vadd.xlane.f32.xlu0 %v4844_v26  ;;  %v8772_v20 = vpop.permute.xlu1 %7146  ;;  %v7245_v26 = vld [vmem:[%s9260_s1 + $0x160] sm:$0xff]  }
0x2308   : > { %v4841_v33 = vsel %vm1675_vm8, %v7487_v58, 0.0  ;;  %v7148_v0 = vunpack.i.l.bf16 %v8772_v20 }
0x230a   : > { %v2417_v11 = vsel %vm1585_vm6, %v8348_v4, %v7148_v0 }
0x230b   : > { %4842 = vadd.xlane.f32.xlu0 %v4841_v33  ;;  %v2404_v2 = vpop.permute.xlu1 %2403 }
0x230c   : > { %v2420_v34 = vsel %vm2419_vm9, %v2417_v11, %v2404_v2 }
0x2321   : > { %4853 = vrot.lane.b32.xlu0 %v8568_v14, %s7561_s9  ;;  %v7160_v14 = vpack.i.bf16 %v4727_v25, %v8583_v17  ;;  %v3274_v25 = vsel %vm2422_vm10, %v3272_v44, %v7138_v48  ;;  %v8835_v44 = vld [vmem:[%s9262_s3] sm:$0xff] }
0x2322   : > { %v4971_v54 = vrot.slane %v3274_v25, 2 }
0x2325   : > { %7131 = vrot.lane.b32.xlu0 %v7130_v55, %s7561_s9  ;;  %v7247_v55 = vld [vmem:[%s9260_s1 + $0x150] sm:$0xff]  }
0x2329   : > { %7141 = vrot.lane.b32.xlu0 %v7140_v9, %s7560_s8 }
0x232d   : > { %7151 = vrot.lane.b32.xlu0 %v7150_v10, %s7559_s7  ;;  %v7124_v10 = vunpack.i.h.bf16 %v8759_v15 }
0x2331   : > { %2411 = vrot.lane.b32.xlu0 %v8352_v1, %s7559_s7  ;;  %v7242_v1 = vld [vmem:[%s9260_s1 + $0x178] sm:$0xff]  }
0x2335   : > { %7161 = vrot.lane.b32.xlu0 %v7160_v14, %s7560_s8 }
0x2339   : > { %4951 = vrot.lane.b32.xlu0 %v7025_v3, %s7560_s8  ;;  %s6196_s8 = sshll.u32 %s9265_s16, 2 }
0x233a   : > { %s195_s11 = scalar_lea.vmem %s9263_s4, %s6196_s8 }
0x2390   : > { %v4846_v16 = vpop.xlane.xlu0 %4845 }
0x2391   : > { %7488 = vrcp.f32 %v4846_v16  ;;  %v7139_v16 = vunpack.i.h.bf16 %v8763_v5 }
0x2394   : > { %v4843_v45 = vpop.xlane.xlu0 %4842 }
0x2395   : > { %7490 = vrcp.f32 %v4843_v45 }
0x2398   : > { %v4854_v56 = vpop.permute.xlu0 %4853 }
0x2399   : > { %7033 = vmatprep.subr.msk.mxu0 %vm556_vm2, %v4854_v56 }
0x239a   : > { %7034 = vmatpush3.msk.msra.mxu0 %vm556_vm2, %v4854_v56  ;;  %v7248_v56 = vld [vmem:[%s9260_s1 + $0x148] sm:$0xff]  }
0x239b   : > { %7035 = vmatprep.subr.mxu0 %v4852_v24 }
0x239c   : > { %7036 = vmatpush3.msra.mxu0 %v4852_v24  ;;  %v7132_v17 = vpop.permute.xlu0 %7131  ;;  %v7129_v24 = vunpack.i.h.bf16 %v8761_v36 }
0x239d   : > { %7040 = vmatprep.subr.bf16.mxu0 %v7242_v1  ;;  %v7134_v53 = vunpack.i.h.bf16 %v7132_v17  ;;  %v7133_v33 = vunpack.i.l.bf16 %v7132_v17  ;;  %v3271_v17 = vsel %vm1585_vm6, %v8374_v27, %v7124_v10 }
0x239e   : > { %v7489_v31 = vpop.eup %7488  ;;  %v3273_v36 = vsel %vm2419_vm9, %v3271_v17, %v7129_v24 }
0x239f   : > { %v4850_v40 = vmul.f32 %v7489_v31, %v7485_v62  ;;  %v2418_v7 = vsel %vm1585_vm6, %v8346_v63, %v7134_v53  ;;  %v7244_v63 = vld [vmem:[%s9260_s1 + $0x168] sm:$0xff]   ;;  %v4121_v45 = vsel %vm1585_vm6, %v8510_v21, %v7133_v33  ;;  %v3275_v5 = vsel %vm2422_vm10, %v3273_v36, %v7139_v16  ;;  %v7249_v21 = vld [vmem:[%s9260_s1 + $0x140] sm:$0xff]  }
0x23a0   : > { %v7142_v41 = vpop.permute.xlu0 %7141  ;;  %v4972_v30 = vrot.slane %v3275_v5, 2  ;;  %v5017_v53 = vsub.s32 6, %v7937_v49 }
0x23a1   : > { %v7144_v3 = vunpack.i.h.bf16 %v7142_v41  ;;  %v7143_v9 = vunpack.i.l.bf16 %v7142_v41 }
0x23a2   : > { %v7491_v57 = vpop.eup %7490  ;;  %v4973_v48 = vsel %vm556_vm2, %v4971_v54, %v4972_v30 }
0x23a3   : > { %v4849_v52 = vmul.f32 %v7491_v57, %v7487_v58  ;;  %v2421_v47 = vsel %vm2419_vm9, %v2418_v7, %v7144_v3  ;;  %v7246_v58 = vld [vmem:[%s9260_s1 + $0x158] sm:$0xff]   ;;  %v5018_v3 = vrot.slane %v8835_v44, %v5017_v53 }
0x23a4   : > { %v7152_v61 = vpop.permute.xlu0 %7151 }
0x23a5   : > { %v7154_v42 = vunpack.i.h.bf16 %v7152_v61  ;;  %7037 = vmatprep.mubr.msk.f32.mxu0 %vm1675_vm8, %v4849_v52  ;;  %v7153_v14 = vunpack.i.l.bf16 %v7152_v61 }
0x23a6   : > { %7038 = vmatmul.mubr.msk.f32.vlgmr.msra.gmra.mxu0 %vm1675_vm8, %v4850_v40 }
0x23a7   : > { %7041 = vmatpush3.bf16.msra.mxu0 %v7242_v1  ;;  %v2424_v59 = vsel %vm2422_vm10, %v2421_v47, %v7154_v42  ;;  %v4123_v1 = vsel %vm2419_vm9, %v4121_v45, %v7143_v9  ;;  %v7157_v47 = vpop.permute.xlu1 %7156 }
0x23a8   : > { %v2412_v32 = vpop.permute.xlu0 %2411  ;;  %v4992_v23 = vsel %vm556_vm2, %v2424_v59, %v4971_v54  ;;  %7042 = vmatprep.subr.bf16.mxu0 %v7243_v50  ;;  %v8818_v15 = vsel %vm2422_vm10, %v4123_v1, %v7153_v14 }
0x23a9   : > { %v2423_v4 = vsel %vm2422_vm10, %v2420_v34, %v2412_v32  ;;  %v4979_v8 = vrot.slane %v8818_v15, 4  ;;  %v7149_v34 = vunpack.i.h.bf16 %v8772_v20  ;;  %v7158_v32 = vunpack.i.l.bf16 %v7157_v47 }
0x23aa   : > { %v4995_v62 = vpack.c.bf16 %v4992_v23, %v2423_v4 }
0x23ab   : > { %7043 = vmatpush3.bf16.msra.mxu0 %v7243_v50  ;;  %v4993_v27 = vsel %vm248_vm0, %v4972_v30, %v4979_v8 }
0x23ac   : > { %7056 = vmatprep.mubr.bf16.mxu0 %v4995_v62  ;;  %7044 = vmatprep.subr.bf16.mxu0 %v7244_v63  ;;  %v4996_v41 = vpack.c.bf16 %v4993_v27, %v4973_v48  ;;  %v7162_v59 = vpop.permute.xlu0 %7161 }
0x23ad   : > { %v7164_v23 = vunpack.i.h.bf16 %v7162_v59 }
0x23af   : > { %7045 = vmatpush3.bf16.msra.mxu0 %v7244_v63  ;;  %v7159_v63 = vunpack.i.h.bf16 %v7157_v47 }
0x23b0   : > { %7046 = vmatprep.subr.bf16.mxu0 %v7245_v26  ;;  %v4952_v62 = vpop.permute.xlu0 %4951 }
0x23b1   : > { %v4964_v20 = vsel %vm1585_vm6, %v8653_v51, %v7159_v63  ;;  %v7262_v63 = vld [vmem:[%s9261_s2 + $0x84] ss:$20 sps:$4 sm:$0xff]  }
0x23b2   : > { %v4966_v10 = vsel %vm2419_vm9, %v4964_v20, %v4952_v62  ;;  %v7270_v62 = vld [vmem:[%s9261_s2 + $0x38] ss:$20 sps:$4 sm:$0xff]  }
0x23b3   : > { %7047 = vmatpush3.bf16.msra.mxu0 %v7245_v26 }
0x23b4   : > { %7048 = vmatprep.subr.bf16.mxu0 %v7246_v58 }
0x23b7   : > { %7049 = vmatpush3.bf16.msra.mxu0 %v7246_v58 }
0x23b8   : > { %7050 = vmatprep.subr.bf16.mxu0 %v7247_v55 }
0x23bb   : > { %7051 = vmatpush3.bf16.msra.mxu0 %v7247_v55 }
0x23bc   : > { %7052 = vmatprep.subr.bf16.mxu0 %v7248_v56 }
0x23bf   : > { %7053 = vmatpush3.bf16.msra.mxu0 %v7248_v56 }
0x23c0   : > { %7054 = vmatprep.subr.bf16.mxu0 %v7249_v21 }
0x23c3   : > { %7055 = vmatpush3.bf16.msra.mxu0 %v7249_v21 }
0x23c6   : > { %7057 = vmatmul.mubr.bf16.vlgmr.msra.gmra.mxu0 %v4996_v41 }
0x2466   : > { %v7039_v31 = vpop.f32.mrf.mxu0 }
0x2468   : > { %v4930_v12 = vpop.f32.mrf.mxu0 }
0x2469   : > { %v7165_v0 = vpack.i.bf16 %v4930_v12, %v8629_v37 }
0x246b   : > { %7166 = vrot.lane.b32.xlu1 %v7165_v0, %s7559_s7 }
0x246f   : > { %4959 = vrot.lane.b32.xlu1 %v7039_v31, %s7559_s7 }
0x2486   : > { %v7058_v57 = vpop.f32.mrf.mxu0 }
0x2487   : > { %v5110_v37 = vadd.f32 %v7058_v57, %v5018_v3 }
0x2488   : > { %v5101_v25 = vpop.f32.mrf.mxu0 }
0x2489   : > { %v5102_v52 = vadd.f32 %v5101_v25, %v5018_v3  ;;  %v5133_v11 = vadd.f32 %v5110_v37, %v8071_v29  ;;  %v4122_v29 = vsel %vm1585_vm6, %v8508_v6, %v7149_v34  ;;  %v7258_v34 = vld [vmem:[%s9261_s2 + $0xd8] ss:$20 sps:$4 sm:$0xff]  }
0x248a   : > { %v7059_v61 = vpop.f32.mrf.mxu0 }
0x248b   : > { %v5131_v40 = vadd.f32 %v5102_v52, %v8067_v19  ;;  %v5113_v7 = vadd.f32 %v7059_v61, %v5018_v3  ;;  %v7163_v19 = vunpack.i.l.bf16 %v7162_v59 }
0x248c   : > { %v5104_v50 = vpop.f32.mrf.mxu0 }
0x248d   : > { %v5105_v2 = vadd.f32 %v5104_v50, %v5018_v3  ;;  %5138 = vadd.xlane.f32.xlu0 %v5131_v40  ;;  %v5134_v54 = vadd.f32 %v5113_v7, %v8065_v18  ;;  %v4124_v33 = vsel %vm2419_vm9, %v4122_v29, %v7163_v19  ;;  %v7259_v19 = vld [vmem:[%s9261_s2 + $0xac] ss:$20 sps:$4 sm:$0xff]  }
0x248e   : > { %v7267_v29 = vld [vmem:[%s9261_s2 + $0x60] ss:$20 sps:$4 sm:$0xff]  }
0x248f   : > { %v5132_v42 = vadd.f32 %v5105_v2, %v8069_v28  ;;  %v4963_v28 = vsel %vm1585_vm6, %v8655_v46, %v7158_v32  ;;  %v7256_v32 = vld [vmem:[%s9261_s2 + $0xd4] ss:$20 sps:$4 sm:$0xff]  }
0x2490   : > { %v4965_v58 = vsel %vm2419_vm9, %v4963_v28, %v7164_v23  ;;  %v7261_v23 = vld [vmem:[%s9261_s2 + $0xb0] ss:$20 sps:$4 sm:$0xff]  }
0x2491   : > { %5142 = vadd.xlane.f32.xlu0 %v5133_v11  ;;  %v7265_v28 = vld [vmem:[%s9261_s2 + $0x5c] ss:$20 sps:$4 sm:$0xff]  }
0x2493   : > { %5140 = vadd.xlane.f32.xlu1 %v5132_v42 }
0x2495   : > { %5144 = vadd.xlane.f32.xlu0 %v5134_v54 }
0x24dd   : > { %v7167_v4 = vpop.permute.xlu1 %7166 }
0x24de   : > { %v7169_v26 = vunpack.i.h.bf16 %v7167_v4  ;;  %v7168_v18 = vunpack.i.l.bf16 %v7167_v4  ;;  %v7264_v4 = vld [vmem:[%s9261_s2 + $0x88] ss:$20 sps:$4 sm:$0xff]  }
0x24e0   : > { %v4126_v55 = vsel %vm2422_vm10, %v4124_v33, %v7168_v18  ;;  %v4967_v9 = vsel %vm2422_vm10, %v4965_v58, %v7169_v26  ;;  %v7268_v26 = vld [vmem:[%s9261_s2 + $0x34] ss:$20 sps:$4 sm:$0xff]   ;;  %v7273_v18 = vld [vmem:[%s9261_s2 + $0x10] ss:$20 sps:$4 sm:$0xff]   ;;  %v7271_v58 = vld [vmem:[%s9261_s2 + $0xc] ss:$20 sps:$4 sm:$0xff]  }
0x24e1   : > { %v4980_v6 = vrot.slane %v4126_v55, 4  ;;  %v4987_v14 = vrot.slane %v4967_v9, 6  ;;  %v4960_v24 = vpop.permute.xlu1 %4959 }
0x24e2   : > { %v4968_v46 = vsel %vm2422_vm10, %v4966_v10, %v4960_v24 }
0x24e3   : > { %v4988_v16 = vrot.slane %v4968_v46, 6  ;;  %v4981_v45 = vsel %vm248_vm0, %v4979_v8, %v4980_v6  ;;  %v4994_v56 = vsel %vm565_vm5, %v4980_v6, %v4987_v14 }
0x24e4   : > { %v4997_v1 = vpack.c.bf16 %v4994_v56, %v4981_v45 }
0x24e5   : > { %v4989_v17 = vsel %vm565_vm5, %v4987_v14, %v4988_v16 }
0x24e6   : > { %7060 = vmatprep.mubr.bf16.mxu0 %v4997_v1  ;;  %v4998_v51 = vpack.c.bf16 %v4989_v17, %v4989_v17 }
0x24e8   : > { %7061 = vmatmul.mubr.bf16.gmra.mxu0 %v4998_v51 }
0x2516   : > { %v5139_v15 = vpop.xlane.xlu0 %5138 }
0x2517   : > { %v5152_v48 = vmul.f32 0.0078125, %v5139_v15 }
0x2519   : > { %v8861_v52 = vsub.f32 %v5131_v40, %v5152_v48 }
0x251a   : > { %v5143_v36 = vpop.xlane.xlu0 %5142 }
0x251b   : > { %v5154_v61 = vmul.f32 0.0078125, %v5143_v36 }
0x251c   : > { %v5141_v21 = vpop.xlane.xlu1 %5140 }
0x251d   : > { %v5153_v31 = vmul.f32 0.0078125, %v5141_v21  ;;  %v8867_v47 = vsub.f32 %v5133_v11, %v5154_v61  ;;  %v7250_v11 = vld [vmem:[%s9261_s2 + $0x124] ss:$20 sps:$4 sm:$0xff]  }
0x251e   : > { %v5145_v0 = vpop.xlane.xlu0 %5144 }
0x251f   : > { %v8863_v37 = vsub.f32 %v5132_v42, %v5153_v31  ;;  %v5155_v50 = vmul.f32 0.0078125, %v5145_v0  ;;  %v5168_v40 = vmul.f32 %v8867_v47, %v8867_v47  ;;  %v7255_v42 = vld [vmem:[%s9261_s2 + $0x100] ss:$20 sps:$4 sm:$0xff]  }
0x2521   : > { %v8869_v59 = vsub.f32 %v5134_v54, %v5155_v50  ;;  %v7253_v54 = vld [vmem:[%s9261_s2 + $0xfc] ss:$20 sps:$4 sm:$0xff]  }
0x25a8   : > { %v7062_v5 = vpop.f32.mrf.mxu0 }
0x25a9   : > { %v5126_v12 = vadd.f32 %v7062_v5, %v5018_v3 }
0x25aa   : > { %v5117_v30 = vpop.f32.mrf.mxu0 }
0x25ab   : > { %v5118_v27 = vadd.f32 %v5117_v30, %v5018_v3  ;;  %v5137_v2 = vadd.f32 %v5126_v12, %v8079_v35  ;;  %v5169_v35 = vmul.f32 %v8869_v59, %v8869_v59  ;;  %v5217_v12 = vsub.s32 7, %v7937_v49 }
0x25ac   : > { %v7063_v41 = vpop.f32.mrf.mxu0 }
0x25ad   : > { %v5135_v8 = vadd.f32 %v5118_v27, %v8081_v38  ;;  %v5166_v38 = vmul.f32 %v8861_v52, %v8861_v52  ;;  %v8948_v0 = vrot.slane %v8835_v44, %v5217_v12 }
0x25ae   : > { %v5120_v57 = vpop.f32.mrf.mxu0 }
0x25af   : > { %v5121_v25 = vadd.f32 %v5120_v57, %v5018_v3  ;;  %5146 = vadd.xlane.f32.xlu0 %v5135_v8  ;;  %v5167_v3 = vmul.f32 %v8863_v37, %v8863_v37 }
0x25b1   : > { %v5136_v7 = vadd.f32 %v5121_v25, %v8083_v39  ;;  %v7252_v39 = vld [vmem:[%s9261_s2 + $0x128] ss:$20 sps:$4 sm:$0xff]  }
0x25b2   : > { %5348 = vmatprep.subr.bf16.mxu1 %v7252_v39 }
0x25b3   : > { %5148 = vadd.xlane.f32.xlu1 %v5136_v7  ;;  %5150 = vadd.xlane.f32.xlu0 %v5137_v2 }
0x25b4   : > { %5349 = vmatpush1.bf16.msra.mxu1 %v7250_v11 }
0x25b5   : > { %5350 = vmatprep.subr.bf16.mxu1 %v7255_v42 }
0x25b7   : > { %5173 = vadd.xlane.f32.xlu1 %v5166_v38  ;;  %5175 = vadd.xlane.f32.xlu0 %v5167_v3 }
0x25b8   : > { %5351 = vmatpush1.bf16.msra.mxu1 %v7253_v54 }
0x25b9   : > { %5352 = vmatprep.subr.bf16.mxu1 %v7258_v34  ;;  %v7275_v34 = vld [vmem:[%s9260_s1 + $0x1b8] sm:$0xff]  }
0x25bb   : > { %5177 = vadd.xlane.f32.xlu1 %v5168_v40  ;;  %5179 = vadd.xlane.f32.xlu0 %v5169_v35 }
0x25bc   : > { %5353 = vmatpush1.bf16.msra.mxu1 %v7256_v32  ;;  %v7276_v32 = vld [vmem:[%s9260_s1 + $0x1f0] sm:$0xff]  }
0x25bd   : > { %5354 = vmatprep.subr.bf16.mxu1 %v7261_v23  ;;  %v7277_v23 = vld [vmem:[%s9260_s1 + $0x1b0] sm:$0xff]  }
0x25c0   : > { %5355 = vmatpush1.bf16.msra.mxu1 %v7259_v19  ;;  %v7278_v19 = vld [vmem:[%s9260_s1 + $0x1e8] sm:$0xff]  }
0x25c1   : > { %5356 = vmatprep.subr.bf16.mxu1 %v7264_v4  ;;  %v7280_v4 = vld [vmem:[%s9260_s1 + $0x1e0] sm:$0xff]  }
0x25c4   : > { %5357 = vmatpush1.bf16.msra.mxu1 %v7262_v63  ;;  %v7279_v63 = vld [vmem:[%s9260_s1 + $0x1a8] sm:$0xff]  }
0x25c5   : > { %5358 = vmatprep.subr.bf16.mxu1 %v7267_v29  ;;  %v7281_v29 = vld [vmem:[%s9260_s1 + $0x1a0] sm:$0xff]  }
0x25c8   : > { %5359 = vmatpush1.bf16.msra.mxu1 %v7265_v28  ;;  %v7282_v28 = vld [vmem:[%s9260_s1 + $0x1d8] sm:$0xff]  }
0x25c9   : > { %5360 = vmatprep.subr.bf16.mxu1 %v7270_v62  ;;  %v7283_v62 = vld [vmem:[%s9260_s1 + $0x198] sm:$0xff]  }
0x25cc   : > { %5361 = vmatpush1.bf16.msra.mxu1 %v7268_v26  ;;  %v7284_v26 = vld [vmem:[%s9260_s1 + $0x1d0] sm:$0xff]  }
0x25cd   : > { %5362 = vmatprep.subr.bf16.mxu1 %v7273_v18  ;;  %v7285_v18 = vld [vmem:[%s9260_s1 + $0x190] sm:$0xff]  }
0x25d0   : > { %5363 = vmatpush1.bf16.msra.mxu1 %v7271_v58  ;;  %v7286_v58 = vld [vmem:[%s9260_s1 + $0x1c8] sm:$0xff]  }
0x2638   : > { %v5147_v33 = vpop.xlane.xlu0 %5146 }
0x2639   : > { %v5156_v20 = vmul.f32 0.0078125, %v5147_v33  ;;  %v7287_v33 = vld [vmem:[%s9260_s1 + $0x188] sm:$0xff]  }
0x263b   : > { %v8927_v55 = vsub.f32 %v5135_v8, %v5156_v20  ;;  %v8943_v8 = vld [vmem:[%s9262_s3 + $0x8] sm:$0xff]  ;;  %v7288_v20 = vld [vmem:[%s9260_s1 + $0x1c0] sm:$0xff]  }
0x263c   : > { %v5149_v9 = vpop.xlane.xlu1 %5148  ;;  %v5151_v10 = vpop.xlane.xlu0 %5150  ;;  %v8954_v50 = vrot.slane %v8943_v8, %v1113_v43 }
0x263d   : > { %v5157_v6 = vmul.f32 0.0078125, %v5149_v9  ;;  %v5158_v14 = vmul.f32 0.0078125, %v5151_v10  ;;  %v5170_v24 = vmul.f32 %v8927_v55, %v8927_v55  ;;  %v7289_v9 = vld [vmem:[%s9260_s1 + $0x180] sm:$0xff]  }
0x263f   : > { %v8931_v46 = vsub.f32 %v5136_v7, %v5157_v6  ;;  %v8933_v16 = vsub.f32 %v5137_v2, %v5158_v14  ;;  %5181 = vadd.xlane.f32.xlu1 %v5170_v24 }
0x2640   : > { %v5174_v45 = vpop.xlane.xlu1 %5173  ;;  %v5176_v56 = vpop.xlane.xlu0 %5175 }
0x2641   : > { %v5187_v1 = vmul.f32 0.0078125, %v5174_v45  ;;  %v5188_v17 = vmul.f32 0.0078125, %v5176_v56  ;;  %v5171_v51 = vmul.f32 %v8931_v46, %v8931_v46  ;;  %v5172_v15 = vmul.f32 %v8933_v16, %v8933_v16 }
0x2643   : > { %v5194_v36 = vadd.f32 1e-05, %v5187_v1  ;;  %v5195_v5 = vadd.f32 1e-05, %v5188_v17  ;;  %5183 = vadd.xlane.f32.xlu0 %v5171_v51  ;;  %5185 = vadd.xlane.f32.xlu1 %v5172_v15 }
0x2644   : > { %v5178_v21 = vpop.xlane.xlu1 %5177  ;;  %v5180_v30 = vpop.xlane.xlu0 %5179 }
0x2645   : > { %7492 = vrsqrt.f32 %v5194_v36  ;;  %v5189_v27 = vmul.f32 0.0078125, %v5178_v21  ;;  %v5190_v48 = vmul.f32 0.0078125, %v5180_v30 }
0x2646   : > { %7494 = vrsqrt.f32 %v5195_v5 }
0x2647   : > { %v5196_v41 = vadd.f32 1e-05, %v5189_v27  ;;  %v5197_v31 = vadd.f32 1e-05, %v5190_v48 }
0x2649   : > { %7496 = vrsqrt.f32 %v5196_v41 }
0x264a   : > { %7498 = vrsqrt.f32 %v5197_v31 }
0x2652   : > { %v7493_v57 = vpop.eup %7492 }
0x2653   : > { %v7495_v25 = vpop.eup %7494  ;;  %v5208_v61 = vmul.f32 %v7493_v57, %v8861_v52 }
0x2654   : > { %v5209_v2 = vmul.f32 %v7495_v25, %v8863_v37 }
0x2655   : > { %v5219_v7 = vmul.f32 %v8948_v0, %v5208_v61  ;;  %v5238_v61 = vrot.slane %v8943_v8, 1 }
0x2656   : > { %v7497_v38 = vpop.eup %7496  ;;  %v5220_v3 = vmul.f32 %v8948_v0, %v5209_v2  ;;  %v9052_v2 = vrot.slane %v8943_v8, %v7960_v13 }
0x2657   : > { %v7499_v40 = vpop.eup %7498  ;;  %v8960_v44 = vadd.f32 %v8954_v50, %v5219_v7  ;;  %v5210_v35 = vmul.f32 %v7497_v38, %v8867_v47  ;;  %v9055_v7 = vrot.slane %v5238_v61, %v7960_v13 }
0x2658   : > { %v8964_v52 = vadd.f32 %v8954_v50, %v5220_v3  ;;  %v5211_v39 = vmul.f32 %v7499_v40, %v8869_v59  ;;  %v7274_v59 = vld [vmem:[%s9260_s1 + $0x1f8] sm:$0xff]  }
0x2659   : > { %v5221_v37 = vmul.f32 %v8948_v0, %v5210_v35  ;;  %6692 = vmatprep.subr.bf16.mxu0 %v7274_v59 }
0x265a   : > { %v5240_v43 = vpack.c.bf16 %v8964_v52, %v8960_v44  ;;  %v5222_v11 = vmul.f32 %v8948_v0, %v5211_v39  ;;  %6693 = vmatpush3.bf16.msra.mxu0 %v7275_v34 }
0x265b   : > { %v8973_v42 = vadd.f32 %v8954_v50, %v5221_v37  ;;  %6694 = vmatprep.subr.bf16.mxu0 %v7276_v32 }
0x265c   : > { %5381 = vmatmul.mubr.bf16.vlgmr.msra.gmra.mxu1 %v5240_v43  ;;  %v8976_v47 = vadd.f32 %v8954_v50, %v5222_v11 }
0x265d   : > { %5390 = vmatprep.mubr.bf16.mxu1 %v7558_v60 }
0x265e   : > { %v5241_v54 = vpack.c.bf16 %v8976_v47, %v8973_v42  ;;  %6695 = vmatpush3.bf16.msra.mxu0 %v7277_v23 }
0x265f   : > { %6696 = vmatprep.subr.bf16.mxu0 %v7278_v19 }
0x2662   : > { %6697 = vmatpush3.bf16.msra.mxu0 %v7279_v63 }
0x2663   : > { %6698 = vmatprep.subr.bf16.mxu0 %v7280_v4 }
0x2664   : > { %5391 = vmatmul.mubr.bf16.gmra.mxu1 %v5241_v54 }
0x2665   : > { %5400 = vmatprep.mubr.bf16.mxu1 %v7558_v60 }
0x2666   : > { %6699 = vmatpush3.bf16.msra.mxu0 %v7281_v29 }
0x2667   : > { %6700 = vmatprep.subr.bf16.mxu0 %v7282_v28 }
0x266a   : > { %6701 = vmatpush3.bf16.msra.mxu0 %v7283_v62 }
0x266b   : > { %6702 = vmatprep.subr.bf16.mxu0 %v7284_v26 }
0x266e   : > { %6703 = vmatpush3.bf16.msra.mxu0 %v7285_v18 }
0x266f   : > { %6704 = vmatprep.subr.bf16.mxu0 %v7286_v58 }
0x2672   : > { %6705 = vmatpush3.bf16.msra.mxu0 %v7287_v33 }
0x2673   : > { %6706 = vmatprep.subr.bf16.mxu0 %v7288_v20 }
0x2676   : > { %6707 = vmatpush3.bf16.msra.mxu0 %v7289_v9 }
0x26c8   : > { %v5182_v10 = vpop.xlane.xlu1 %5181 }
0x26c9   : > { %v5191_v6 = vmul.f32 0.0078125, %v5182_v10 }
0x26cb   : > { %v5198_v14 = vadd.f32 1e-05, %v5191_v6 }
0x26cc   : > { %v5186_v24 = vpop.xlane.xlu1 %5185  ;;  %v5184_v45 = vpop.xlane.xlu0 %5183 }
0x26cd   : > { %7500 = vrsqrt.f32 %v5198_v14  ;;  %v5193_v56 = vmul.f32 0.0078125, %v5186_v24  ;;  %v5192_v1 = vmul.f32 0.0078125, %v5184_v45 }
0x26cf   : > { %v5200_v17 = vadd.f32 1e-05, %v5193_v56  ;;  %v5199_v51 = vadd.f32 1e-05, %v5192_v1 }
0x26d1   : > { %7502 = vrsqrt.f32 %v5200_v17 }
0x26d2   : > { %7504 = vrsqrt.f32 %v5199_v51 }
0x26da   : > { %v7501_v15 = vpop.eup %7500 }
0x26db   : > { %v5212_v36 = vmul.f32 %v7501_v15, %v8927_v55 }
0x26dd   : > { %v5223_v27 = vmul.f32 %v8948_v0, %v5212_v36 }
0x26de   : > { %v7503_v5 = vpop.eup %7502 }
0x26df   : > { %v7505_v21 = vpop.eup %7504  ;;  %v5214_v41 = vmul.f32 %v7503_v5, %v8933_v16  ;;  %v9035_v31 = vadd.f32 %v8954_v50, %v5223_v27 }
0x26e0   : > { %v5213_v30 = vmul.f32 %v7505_v21, %v8931_v46 }
0x26e1   : > { %v5225_v55 = vmul.f32 %v8948_v0, %v5214_v41 }
0x26e2   : > { %v5224_v48 = vmul.f32 %v8948_v0, %v5213_v30 }
0x26e3   : > { %v9045_v46 = vadd.f32 %v8954_v50, %v5225_v55 }
0x26e4   : > { %v9038_v57 = vadd.f32 %v8954_v50, %v5224_v48 }
0x26e5   : > { %v5243_v16 = vpack.c.bf16 %v9045_v46, %v9045_v46 }
0x26e6   : > { %v5242_v25 = vpack.c.bf16 %v9038_v57, %v9035_v31 }
0x26e8   : > { %5401 = vmatmul.mubr.bf16.gmra.mxu1 %v5242_v25 }
0x26e9   : > { %5410 = vmatprep.mubr.bf16.mxu1 %v7558_v60 }
0x26f0   : > { %5411 = vmatmul.mubr.bf16.gmra.mxu1 %v5243_v16 }
0x271c   : > { %v5382_v0 = vpop.f32.mrf.mxu1 }
0x271d   : > { %v9058_v38 = vadd.f32 %v5382_v0, %v9052_v2 }
0x271e   : > { %v5384_v60 = vpop.f32.mrf.mxu1 }
0x271f   : > { %v5419_v50 = vmul.f32 %v9058_v38, %v9058_v38  ;;  %v9063_v3 = vadd.f32 %v5384_v60, %v9055_v7 }
0x2720   : > { %v5386_v40 = vpop.f32.mrf.mxu1 }
0x2721   : > { %v5433_v35 = vmul.f32 %v5419_v50, %v9058_v38  ;;  %v5420_v39 = vmul.f32 %v9063_v3, %v9063_v3  ;;  %v9069_v13 = vadd.f32 %v5386_v40, %v9052_v2 }
0x2722   : > { %v5388_v43 = vpop.f32.mrf.mxu1 }
0x2723   : > { %v5447_v37 = vmul.f32 0.044715, %v5433_v35  ;;  %v5434_v11 = vmul.f32 %v5420_v39, %v9063_v3  ;;  %v5421_v54 = vmul.f32 %v9069_v13, %v9069_v13  ;;  %v9075_v59 = vadd.f32 %v5388_v43, %v9055_v7 }
0x2724   : > { %v5392_v34 = vpop.f32.mrf.mxu1 }
0x2725   : > { %v5461_v32 = vadd.f32 %v5447_v37, %v9058_v38  ;;  %v5448_v23 = vmul.f32 0.044715, %v5434_v11  ;;  %v5435_v19 = vmul.f32 %v5421_v54, %v9069_v13  ;;  %v5422_v63 = vmul.f32 %v9075_v59, %v9075_v59 }
0x2726   : > { %v9082_v4 = vadd.f32 %v5392_v34, %v9052_v2  ;;  %v5394_v29 = vpop.f32.mrf.mxu1 }
0x2727   : > { %v5475_v28 = vmul.f32 0.7978846, %v5461_v32  ;;  %v5462_v62 = vadd.f32 %v5448_v23, %v9063_v3  ;;  %v5449_v26 = vmul.f32 0.044715, %v5435_v19  ;;  %v5436_v18 = vmul.f32 %v5422_v63, %v9075_v59 }
0x2728   : > { %v5423_v58 = vmul.f32 %v9082_v4, %v9082_v4  ;;  %v9089_v33 = vadd.f32 %v5394_v29, %v9055_v7  ;;  %v5396_v20 = vpop.f32.mrf.mxu1 }
0x2729   : > { %v5476_v9 = vmul.f32 0.7978846, %v5462_v62  ;;  %v5463_v10 = vadd.f32 %v5449_v26, %v9069_v13  ;;  %v5450_v6 = vmul.f32 0.044715, %v5436_v18  ;;  %7506 = vtanh.f32 %v5475_v28 }
0x272a   : > { %v5437_v14 = vmul.f32 %v5423_v58, %v9082_v4  ;;  %v5424_v24 = vmul.f32 %v9089_v33, %v9089_v33  ;;  %v5397_v45 = vadd.f32 %v5396_v20, %v9052_v2  ;;  %v5398_v56 = vpop.f32.mrf.mxu1 }
0x272b   : > { %7508 = vtanh.f32 %v5476_v9  ;;  %v5477_v1 = vmul.f32 0.7978846, %v5463_v10  ;;  %v5464_v17 = vadd.f32 %v5450_v6, %v9075_v59  ;;  %v5399_v51 = vadd.f32 %v5398_v56, %v9055_v7 }
0x272c   : > { %v5451_v15 = vmul.f32 0.044715, %v5437_v14  ;;  %v5438_v36 = vmul.f32 %v5424_v24, %v9089_v33  ;;  %v5425_v5 = vmul.f32 %v5397_v45, %v5397_v45 }
0x272d   : > { %7510 = vtanh.f32 %v5477_v1  ;;  %v5478_v21 = vmul.f32 0.7978846, %v5464_v17  ;;  %v5426_v30 = vmul.f32 %v5399_v51, %v5399_v51 }
0x272e   : > { %v5465_v27 = vadd.f32 %v5451_v15, %v9082_v4  ;;  %v5452_v48 = vmul.f32 0.044715, %v5438_v36  ;;  %v5439_v41 = vmul.f32 %v5425_v5, %v5397_v45 }
0x272f   : > { %7512 = vtanh.f32 %v5478_v21  ;;  %v5440_v25 = vmul.f32 %v5426_v30, %v5399_v51 }
0x2730   : > { %v5479_v55 = vmul.f32 0.7978846, %v5465_v27  ;;  %v5466_v16 = vadd.f32 %v5452_v48, %v9089_v33  ;;  %v5453_v61 = vmul.f32 0.044715, %v5439_v41 }
0x2731   : > { %v5454_v0 = vmul.f32 0.044715, %v5440_v25 }
0x2732   : > { %7514 = vtanh.f32 %v5479_v55  ;;  %v5480_v60 = vmul.f32 0.7978846, %v5466_v16  ;;  %v5467_v50 = vadd.f32 %v5453_v61, %v5397_v45 }
0x2733   : > { %v5468_v40 = vadd.f32 %v5454_v0, %v5399_v51 }
0x2734   : > { %7516 = vtanh.f32 %v5480_v60  ;;  %v5481_v35 = vmul.f32 0.7978846, %v5467_v50 }
0x2735   : > { %v5482_v39 = vmul.f32 0.7978846, %v5468_v40 }
0x2736   : > { %7518 = vtanh.f32 %v5481_v35  ;;  %v7507_v43 = vpop.eup %7506 }
0x2737   : > { %7520 = vtanh.f32 %v5482_v39  ;;  %v5503_v34 = vadd.f32 1.0, %v7507_v43 }
0x2738   : > { %v7509_v37 = vpop.eup %7508 }
0x2739   : > { %v5504_v11 = vadd.f32 1.0, %v7509_v37  ;;  %v5517_v28 = vmul.f32 0.5, %v5503_v34 }
0x273a   : > { %v7511_v54 = vpop.eup %7510 }
0x273b   : > { %v5505_v32 = vadd.f32 1.0, %v7511_v54  ;;  %v5518_v29 = vmul.f32 0.5, %v5504_v11  ;;  %v5531_v10 = vmul.f32 %v5517_v28, %v9058_v38 }
0x273c   : > { %v7513_v23 = vpop.eup %7512 }
0x273d   : > { %v5519_v19 = vmul.f32 0.5, %v5505_v32  ;;  %v5506_v63 = vadd.f32 1.0, %v7513_v23  ;;  %v5532_v20 = vmul.f32 %v5518_v29, %v9063_v3 }
0x273f   : > { %v7515_v62 = vpop.eup %7514  ;;  %v5520_v26 = vmul.f32 0.5, %v5506_v63  ;;  %v5533_v18 = vmul.f32 %v5519_v19, %v9069_v13 }
0x2740   : > { %v5507_v14 = vadd.f32 1.0, %v7515_v62 }
0x2741   : > { %v7517_v58 = vpop.eup %7516  ;;  %v5534_v9 = vmul.f32 %v5520_v26, %v9075_v59  ;;  %v5545_v17 = vpack.c.bf16 %v5533_v18, %v5531_v10 }
0x2742   : > { %v5508_v6 = vadd.f32 1.0, %v7517_v58  ;;  %v5521_v21 = vmul.f32 0.5, %v5507_v14 }
0x2743   : > { %v7519_v24 = vpop.eup %7518  ;;  %v5546_v56 = vpack.c.bf16 %v5534_v9, %v5532_v20 }
0x2744   : > { %v7521_v1 = vpop.eup %7520  ;;  %v5509_v15 = vadd.f32 1.0, %v7519_v24  ;;  %v5522_v5 = vmul.f32 0.5, %v5508_v6  ;;  %v5535_v38 = vmul.f32 %v5521_v21, %v9082_v4 }
0x2745   : > { %5717 = vmatprep.mubr.bf16.mxu0 %v5546_v56  ;;  %v5510_v36 = vadd.f32 1.0, %v7521_v1 }
0x2746   : > { %5718 = vmatmul.mubr.bf16.vlgmr.msra.gmra.mxu0 %v5545_v17  ;;  %v5523_v13 = vmul.f32 0.5, %v5509_v15  ;;  %v5536_v3 = vmul.f32 %v5522_v5, %v9089_v33 }
0x2747   : > { %v5524_v30 = vmul.f32 0.5, %v5510_v36 }
0x2748   : > { %v5537_v27 = vmul.f32 %v5523_v13, %v5397_v45 }
0x2749   : > { %v5538_v59 = vmul.f32 %v5524_v30, %v5399_v51 }
0x274a   : > { %v5547_v41 = vpack.c.bf16 %v5537_v27, %v5535_v38 }
0x274b   : > { %v5548_v48 = vpack.c.bf16 %v5538_v59, %v5536_v3 }
0x274d   : > { %5725 = vmatprep.mubr.bf16.mxu0 %v5548_v48 }
0x274e   : > { %5726 = vmatmul.mubr.bf16.gmra.mxu0 %v5547_v41 }
0x27a8   : > { %v5402_v25 = vpop.f32.mrf.mxu1 }
0x27a9   : > { %v9108_v55 = vadd.f32 %v5402_v25, %v9052_v2 }
0x27aa   : > { %v5404_v16 = vpop.f32.mrf.mxu1 }
0x27ab   : > { %v5427_v61 = vmul.f32 %v9108_v55, %v9108_v55  ;;  %v5405_v0 = vadd.f32 %v5404_v16, %v9055_v7 }
0x27ac   : > { %v5406_v45 = vpop.f32.mrf.mxu1 }
0x27ad   : > { %v5441_v33 = vmul.f32 %v5427_v61, %v9108_v55  ;;  %v5428_v51 = vmul.f32 %v5405_v0, %v5405_v0  ;;  %v5407_v4 = vadd.f32 %v5406_v45, %v9052_v2 }
0x27ae   : > { %v5408_v60 = vpop.f32.mrf.mxu1 }
0x27af   : > { %v5455_v50 = vmul.f32 0.044715, %v5441_v33  ;;  %v5442_v40 = vmul.f32 %v5428_v51, %v5405_v0  ;;  %v5429_v35 = vmul.f32 %v5407_v4, %v5407_v4  ;;  %v5409_v39 = vadd.f32 %v5408_v60, %v9055_v7 }
0x27b0   : > { %v5412_v43 = vpop.f32.mrf.mxu1 }
0x27b1   : > { %v5469_v37 = vadd.f32 %v5455_v50, %v9108_v55  ;;  %v5456_v11 = vmul.f32 0.044715, %v5442_v40  ;;  %v5443_v54 = vmul.f32 %v5429_v35, %v5407_v4  ;;  %v5430_v34 = vmul.f32 %v5409_v39, %v5409_v39 }
0x27b2   : > { %v5413_v32 = vadd.f32 %v5412_v43, %v9052_v2  ;;  %v5414_v23 = vpop.f32.mrf.mxu1 }
0x27b3   : > { %v5483_v19 = vmul.f32 0.7978846, %v5469_v37  ;;  %v5470_v63 = vadd.f32 %v5456_v11, %v5405_v0  ;;  %v5457_v29 = vmul.f32 0.044715, %v5443_v54  ;;  %v5444_v28 = vmul.f32 %v5430_v34, %v5409_v39 }
0x27b4   : > { %v5431_v62 = vmul.f32 %v5413_v32, %v5413_v32  ;;  %v5415_v26 = vadd.f32 %v5414_v23, %v9055_v7  ;;  %v5416_v18 = vpop.f32.mrf.mxu1 }
0x27b5   : > { %v5484_v58 = vmul.f32 0.7978846, %v5470_v63  ;;  %v5471_v20 = vadd.f32 %v5457_v29, %v5407_v4  ;;  %v5458_v9 = vmul.f32 0.044715, %v5444_v28  ;;  %7522 = vtanh.f32 %v5483_v19 }
0x27b6   : > { %v5445_v10 = vmul.f32 %v5431_v62, %v5413_v32  ;;  %v5432_v6 = vmul.f32 %v5415_v26, %v5415_v26  ;;  %v5417_v14 = vpop.f32.mrf.mxu1 }
0x27b7   : > { %7524 = vtanh.f32 %v5484_v58  ;;  %v5485_v24 = vmul.f32 0.7978846, %v5471_v20  ;;  %v5472_v56 = vadd.f32 %v5458_v9, %v5409_v39 }
0x27b8   : > { %v5459_v2 = vmul.f32 0.044715, %v5445_v10  ;;  %v5446_v1 = vmul.f32 %v5432_v6, %v5415_v26 }
0x27b9   : > { %7526 = vtanh.f32 %v5485_v24  ;;  %v5486_v17 = vmul.f32 0.7978846, %v5472_v56 }
0x27ba   : > { %v5473_v15 = vadd.f32 %v5459_v2, %v5413_v32  ;;  %v5460_v36 = vmul.f32 0.044715, %v5446_v1 }
0x27bb   : > { %7528 = vtanh.f32 %v5486_v17 }
0x27bc   : > { %v5487_v5 = vmul.f32 0.7978846, %v5473_v15  ;;  %v5474_v7 = vadd.f32 %v5460_v36, %v5415_v26 }
0x27be   : > { %7530 = vtanh.f32 %v5487_v5  ;;  %v5488_v21 = vmul.f32 0.7978846, %v5474_v7 }
0x27c0   : > { %7532 = vtanh.f32 %v5488_v21 }
0x27c2   : > { %v7523_v13 = vpop.eup %7522 }
0x27c3   : > { %v5511_v59 = vadd.f32 1.0, %v7523_v13 }
0x27c4   : > { %v7525_v30 = vpop.eup %7524 }
0x27c5   : > { %v5512_v27 = vadd.f32 1.0, %v7525_v30  ;;  %v5525_v61 = vmul.f32 0.5, %v5511_v59 }
0x27c6   : > { %v7527_v3 = vpop.eup %7526 }
0x27c7   : > { %v5513_v38 = vadd.f32 1.0, %v7527_v3  ;;  %v5526_v25 = vmul.f32 0.5, %v5512_v27  ;;  %v5539_v43 = vmul.f32 %v5525_v61, %v9108_v55  ;;  %v5588_v55 = vrot.slane %v8943_v8, %v8091_v22 }
0x27c8   : > { %v7529_v48 = vpop.eup %7528 }
0x27c9   : > { %v5514_v41 = vadd.f32 1.0, %v7529_v48  ;;  %v5527_v16 = vmul.f32 0.5, %v5513_v38  ;;  %v5540_v40 = vmul.f32 %v5526_v25, %v5405_v0 }
0x27cb   : > { %v7531_v45 = vpop.eup %7530  ;;  %v5528_v33 = vmul.f32 0.5, %v5514_v41  ;;  %v5541_v51 = vmul.f32 %v5527_v16, %v5407_v4 }
0x27cc   : > { %v5515_v60 = vadd.f32 1.0, %v7531_v45 }
0x27cd   : > { %v7533_v50 = vpop.eup %7532  ;;  %v5542_v35 = vmul.f32 %v5528_v33, %v5409_v39  ;;  %v5549_v54 = vpack.c.bf16 %v5541_v51, %v5539_v43 }
0x27ce   : > { %v5516_v37 = vadd.f32 1.0, %v7533_v50  ;;  %v5529_v23 = vmul.f32 0.5, %v5515_v60 }
0x27cf   : > { %v5550_v11 = vpack.c.bf16 %v5542_v35, %v5540_v40 }
0x27d0   : > { %v5530_v34 = vmul.f32 0.5, %v5516_v37  ;;  %v5543_v29 = vmul.f32 %v5529_v23, %v5413_v32 }
0x27d1   : > { %5733 = vmatprep.mubr.bf16.mxu0 %v5550_v11 }
0x27d2   : > { %5734 = vmatmul.mubr.bf16.gmra.mxu0 %v5549_v54  ;;  %v5544_v19 = vmul.f32 %v5530_v34, %v5415_v26  ;;  %v5551_v28 = vpack.c.bf16 %v5543_v29, %v5543_v29 }
0x27d4   : > { %v5552_v63 = vpack.c.bf16 %v5544_v19, %v5544_v19 }
0x27d6   : > { %5741 = vmatprep.mubr.bf16.mxu0 %v5552_v63 }
0x27da   : > { %5742 = vmatmul.mubr.bf16.gmra.mxu0 %v5551_v28 }
0x2806   : > { %v6708_v4 = vpop.f32.mrf.mxu0 }
0x2808   : > { %v6709_v62 = vpop.f32.mrf.mxu0 }
0x2809   : > { %v6710_v18 = vadd.f32 %v6709_v62, %v6708_v4 }
0x280a   : > { %v6711_v0 = vpop.f32.mrf.mxu0 }
0x280c   : > { %v6712_v39 = vpop.f32.mrf.mxu0 }
0x280d   : > { %v6713_v58 = vadd.f32 %v6712_v39, %v6711_v0 }
0x280e   : > { %v6714_v20 = vpop.f32.mrf.mxu0 }
0x280f   : > { %v5723_v9 = vadd.f32 %v6713_v58, %v5588_v55  ;;  %v7290_v58 = vld [vmem:[%s9260_s1 + $0x238] sm:$0xff]  }
0x2810   : > { %v6715_v10 = vpop.f32.mrf.mxu0 }
0x2811   : > { %v6716_v6 = vadd.f32 %v6715_v10, %v6714_v20  ;;  %v5750_v26 = vadd.f32 %v5723_v9, %v8964_v52  ;;  %v7562_v20 = vmov 0.0   ;;  %v7291_v9 = vld [vmem:[%s9260_s1 + $0x230] sm:$0xff]   ;;  %v7292_v10 = vld [vmem:[%s9260_s1 + $0x228] sm:$0xff]  }
0x2812   : > { %v6717_v14 = vpop.f32.mrf.mxu0  ;;  %7064 = vmatprep.subr.bf16.mxu1 %v7562_v20  ;;  %7084 = vmatprep.subr.bf16.mxu0 %v7562_v20 }
0x2813   : > { %v5728_v32 = vadd.f32 %v6716_v6, %v5588_v55  ;;  %5758 = vadd.xlane.f32.xlu0 %v5750_v26  ;;  %7065 = vmatpush3.bf16.msra.mxu1 %v7290_v58  ;;  %v7293_v6 = vld [vmem:[%s9260_s1 + $0x220] sm:$0xff]  }
0x2814   : > { %v6718_v24 = vpop.f32.mrf.mxu0  ;;  %7066 = vmatprep.subr.bf16.mxu1 %v7562_v20  ;;  %7080 = vmatprep.mubr.msk.bf16.mxu1 %vm7563_vm11, %v7562_v20 }
0x2815   : > { %v6719_v56 = vadd.f32 %v6718_v24, %v6717_v14  ;;  %v5751_v2 = vadd.f32 %v5728_v32, %v8973_v42  ;;  %v5720_v42 = vadd.f32 %v6710_v18, %v5588_v55  ;;  %7100 = vmatprep.mubr.msk.bf16.mxu0 %vm7563_vm11, %v7562_v20  ;;  %v7295_v14 = vld [vmem:[%s9260_s1 + $0x210] sm:$0xff]   ;;  %v7296_v32 = vld [vmem:[%s9260_s1 + $0x208] sm:$0xff]   ;;  %v7297_v24 = vld [vmem:[%s9260_s1 + $0x200] sm:$0xff]  }
0x2817   : > { %v5731_v1 = vadd.f32 %v6719_v56, %v5588_v55  ;;  %5760 = vadd.xlane.f32.xlu0 %v5751_v2  ;;  %v5749_v33 = vadd.f32 %v5720_v42, %v8960_v44  ;;  %7067 = vmatpush3.bf16.msra.mxu1 %v7291_v9  ;;  %v7298_v56 = vld [vmem:[%s9260_s1 + $0x278] sm:$0xff]   ;;  %v5835_v42 = vsub.s32 4, %v7937_v49 }
0x2818   : > { %7068 = vmatprep.subr.bf16.mxu1 %v7562_v20  ;;  %7085 = vmatpush3.bf16.msra.mxu0 %v7298_v56 }
0x2819   : > { %v5752_v17 = vadd.f32 %v5731_v1, %v8976_v47  ;;  %7086 = vmatprep.subr.bf16.mxu0 %v7562_v20  ;;  %v7300_v1 = vld [vmem:[%s9260_s1 + $0x268] sm:$0xff]  }
0x281b   : > { %5762 = vadd.xlane.f32.xlu1 %v5752_v17  ;;  %7069 = vmatpush3.bf16.msra.mxu1 %v7292_v10 }
0x281c   : > { %7070 = vmatprep.subr.bf16.mxu1 %v7562_v20 }
0x281f   : > { %7071 = vmatpush3.bf16.msra.mxu1 %v7293_v6 }
0x2820   : > { %7072 = vmatprep.subr.bf16.mxu1 %v7562_v20 }
0x2892   : > { %v6720_v22 = vpop.f32.mrf.mxu0 }
0x2894   : > { %v6721_v15 = vpop.f32.mrf.mxu0 }
0x2895   : > { %v6722_v36 = vadd.f32 %v6721_v15, %v6720_v22  ;;  %v7302_v22 = vld [vmem:[%s9260_s1 + $0x258] sm:$0xff]   ;;  %v7303_v15 = vld [vmem:[%s9260_s1 + $0x250] sm:$0xff]  }
0x2896   : > { %v6723_v5 = vpop.f32.mrf.mxu0 }
0x2897   : > { %v5736_v7 = vadd.f32 %v6722_v36, %v5588_v55 }
0x2898   : > { %v6724_v21 = vpop.f32.mrf.mxu0 }
0x2899   : > { %v6725_v13 = vadd.f32 %v6724_v21, %v6723_v5  ;;  %v5753_v52 = vadd.f32 %v5736_v7, %v9035_v31 }
0x289a   : > { %v6726_v30 = vpop.f32.mrf.mxu0 }
0x289b   : > { %v5739_v27 = vadd.f32 %v6725_v13, %v5588_v55  ;;  %5764 = vadd.xlane.f32.xlu1 %v5753_v52 }
0x289c   : > { %v6727_v3 = vpop.f32.mrf.mxu0  ;;  %v5759_v59 = vpop.xlane.xlu0 %5758 }
0x289d   : > { %v6728_v38 = vadd.f32 %v6727_v3, %v6726_v30  ;;  %v5754_v48 = vadd.f32 %v5739_v27, %v9038_v57  ;;  %v5771_v61 = vmul.f32 0.0078125, %v5759_v59 }
0x289e   : > { %v6729_v47 = vpop.f32.mrf.mxu0 }
0x289f   : > { %v5744_v41 = vadd.f32 %v6728_v38, %v5588_v55  ;;  %5766 = vadd.xlane.f32.xlu0 %v5754_v48  ;;  %v9131_v50 = vsub.f32 %v5750_v26, %v5771_v61  ;;  %v7294_v26 = vld [vmem:[%s9260_s1 + $0x218] sm:$0xff]  }
0x28a0   : > { %v6730_v25 = vpop.f32.mrf.mxu0  ;;  %v5761_v16 = vpop.xlane.xlu0 %5760  ;;  %7073 = vmatpush3.bf16.msra.mxu1 %v7294_v26 }
0x28a1   : > { %v5772_v45 = vmul.f32 0.0078125, %v5761_v16  ;;  %v5755_v31 = vadd.f32 %v5744_v41, %v9045_v46  ;;  %v5785_v44 = vmul.f32 %v9131_v50, %v9131_v50  ;;  %7074 = vmatprep.subr.bf16.mxu1 %v7562_v20  ;;  %v5836_v25 = vrot.slane %v8943_v8, %v5835_v42 }
0x28a2   : > { %v5846_v16 = vsub.s32 5, %v7937_v49 }
0x28a3   : > { %v9129_v51 = vsub.f32 %v5751_v2, %v5772_v45  ;;  %5756 = vadd.xlane.f32.xlu0 %v5749_v33  ;;  %5768 = vadd.xlane.f32.xlu1 %v5755_v31  ;;  %v7299_v2 = vld [vmem:[%s9260_s1 + $0x270] sm:$0xff]  }
0x28a4   : > { %v5763_v60 = vpop.xlane.xlu1 %5762  ;;  %7075 = vmatpush3.bf16.msra.mxu1 %v7295_v14  ;;  %7087 = vmatpush3.bf16.msra.mxu0 %v7299_v2 }
0x28a5   : > { %v5773_v40 = vmul.f32 0.0078125, %v5763_v60  ;;  %v5786_v57 = vmul.f32 %v9129_v51, %v9129_v51  ;;  %7076 = vmatprep.subr.bf16.mxu1 %v7562_v20  ;;  %7088 = vmatprep.subr.bf16.mxu0 %v7562_v20 }
0x28a7   : > { %v9135_v35 = vsub.f32 %v5752_v17, %v5773_v40  ;;  %5795 = vadd.xlane.f32.xlu1 %v5786_v57  ;;  %v7301_v17 = vld [vmem:[%s9260_s1 + $0x260] sm:$0xff]   ;;  %v5847_v57 = vrot.slane %v8943_v8, %v5846_v16 }
0x28a8   : > { %7077 = vmatpush3.bf16.msra.mxu1 %v7296_v32  ;;  %7089 = vmatpush3.bf16.msra.mxu0 %v7300_v1 }
0x28a9   : > { %v5787_v43 = vmul.f32 %v9135_v35, %v9135_v35  ;;  %7078 = vmatprep.subr.bf16.mxu1 %v7562_v20  ;;  %7090 = vmatprep.subr.bf16.mxu0 %v7562_v20 }
0x28ab   : > { %5797 = vadd.xlane.f32.xlu0 %v5787_v43  ;;  %5793 = vadd.xlane.f32.xlu1 %v5785_v44 }
0x28ac   : > { %7079 = vmatpush3.bf16.msra.mxu1 %v7297_v24  ;;  %7091 = vmatpush3.bf16.msra.mxu0 %v7301_v17 }
0x28ad   : > { %7092 = vmatprep.subr.bf16.mxu0 %v7562_v20 }
0x28b0   : > { %7093 = vmatpush3.bf16.msra.mxu0 %v7302_v22 }
0x28b1   : > { %7094 = vmatprep.subr.bf16.mxu0 %v7562_v20 }
0x28b4   : > { %7095 = vmatpush3.bf16.msra.mxu0 %v7303_v15 }
0x28b5   : > { %7096 = vmatprep.subr.bf16.mxu0 %v7562_v20 }
0x2924   : > { %v5765_v46 = vpop.xlane.xlu1 %5764 }
0x2925   : > { %v5774_v37 = vmul.f32 0.0078125, %v5765_v46 }
0x2927   : > { %v9141_v11 = vsub.f32 %v5753_v52, %v5774_v37 }
0x2928   : > { %v5767_v54 = vpop.xlane.xlu0 %5766 }
0x2929   : > { %v5775_v34 = vmul.f32 0.0078125, %v5767_v54  ;;  %v5788_v23 = vmul.f32 %v9141_v11, %v9141_v11 }
0x292b   : > { %v9145_v19 = vsub.f32 %v5754_v48, %v5775_v34  ;;  %5799 = vadd.xlane.f32.xlu0 %v5788_v23 }
0x292c   : > { %v5769_v63 = vpop.xlane.xlu1 %5768  ;;  %v5757_v29 = vpop.xlane.xlu0 %5756 }
0x292d   : > { %v5776_v28 = vmul.f32 0.0078125, %v5769_v63  ;;  %v5770_v4 = vmul.f32 0.0078125, %v5757_v29  ;;  %v5789_v62 = vmul.f32 %v9145_v19, %v9145_v19 }
0x292f   : > { %v9149_v18 = vsub.f32 %v5755_v31, %v5776_v28  ;;  %v9151_v0 = vsub.f32 %v5749_v33, %v5770_v4  ;;  %5801 = vadd.xlane.f32.xlu1 %v5789_v62 }
0x2930   : > { %v5796_v36 = vpop.xlane.xlu1 %5795 }
0x2931   : > { %v5790_v39 = vmul.f32 %v9149_v18, %v9149_v18  ;;  %v5784_v55 = vmul.f32 %v9151_v0, %v9151_v0  ;;  %v5807_v13 = vmul.f32 0.0078125, %v5796_v36 }
0x2933   : > { %5803 = vadd.xlane.f32.xlu0 %v5790_v39  ;;  %5791 = vadd.xlane.f32.xlu1 %v5784_v55  ;;  %v5814_v27 = vadd.f32 1e-05, %v5807_v13 }
0x2934   : > { %v5798_v5 = vpop.xlane.xlu0 %5797  ;;  %v5794_v7 = vpop.xlane.xlu1 %5793 }
0x2935   : > { %v5808_v21 = vmul.f32 0.0078125, %v5798_v5  ;;  %v5806_v52 = vmul.f32 0.0078125, %v5794_v7 }
0x2937   : > { %v5815_v30 = vadd.f32 1e-05, %v5808_v21  ;;  %v5813_v3 = vadd.f32 1e-05, %v5806_v52 }
0x2939   : > { %7534 = vrsqrt.f32 %v5815_v30 }
0x293a   : > { %7536 = vrsqrt.f32 %v5814_v27 }
0x293b   : > { %7538 = vrsqrt.f32 %v5813_v3 }
0x2946   : > { %v7535_v59 = vpop.eup %7534 }
0x2947   : > { %v7537_v38 = vpop.eup %7536  ;;  %v5829_v47 = vmul.f32 %v7535_v59, %v9135_v35 }
0x2948   : > { %v7539_v48 = vpop.eup %7538  ;;  %v5828_v61 = vmul.f32 %v7537_v38, %v9129_v51 }
0x2949   : > { %v5827_v33 = vmul.f32 %v7539_v48, %v9131_v50  ;;  %v5840_v31 = vmul.f32 %v5836_v25, %v5829_v47 }
0x294a   : > { %v5839_v43 = vmul.f32 %v5836_v25, %v5828_v61 }
0x294b   : > { %v5838_v46 = vmul.f32 %v5836_v25, %v5827_v33  ;;  %v5851_v35 = vadd.f32 %v5847_v57, %v5840_v31 }
0x294c   : > { %v5850_v23 = vadd.f32 %v5847_v57, %v5839_v43 }
0x294d   : > { %v5849_v29 = vadd.f32 %v5847_v57, %v5838_v46  ;;  %v5869_v28 = vrot.slane %v5851_v35, 6 }
0x294e   : > { %v5867_v62 = vrot.slane %v5850_v23, 6 }
0x294f   : > { %v5866_v39 = vrot.slane %v5849_v29, 6 }
0x2950   : > { %v5870_v8 = vsel %vm565_vm5, %v5867_v62, %v5869_v28 }
0x2951   : > { %v5868_v58 = vsel %vm565_vm5, %v5866_v39, %v5867_v62  ;;  %v5873_v9 = vsel %vm556_vm2, %v5870_v8, 0.0 }
0x2952   : > { %v5874_v26 = vadd.f32 %v5873_v9, %v5868_v58  ;;  %v7304_v9 = vld [vmem:[%s9260_s1 + $0x248] sm:$0xff]  }
0x2953   : > { %7097 = vmatpush3.bf16.msra.mxu0 %v7304_v9 }
0x2954   : > { %v5875_v2 = vrot.slane %v5874_v26, 4  ;;  %7098 = vmatprep.subr.bf16.mxu0 %v7562_v20 }
0x2956   : > { %v5876_v13 = vadd.f32 %v5875_v2, %v5874_v26 }
0x29b4   : > { %v5800_v41 = vpop.xlane.xlu0 %5799 }
0x29b5   : > { %v5809_v45 = vmul.f32 0.0078125, %v5800_v41 }
0x29b7   : > { %v5816_v60 = vadd.f32 1e-05, %v5809_v45 }
0x29b8   : > { %v5802_v40 = vpop.xlane.xlu1 %5801 }
0x29b9   : > { %7540 = vrsqrt.f32 %v5816_v60  ;;  %v5810_v44 = vmul.f32 0.0078125, %v5802_v40 }
0x29bb   : > { %v5817_v37 = vadd.f32 1e-05, %v5810_v44 }
0x29bc   : > { %v5792_v54 = vpop.xlane.xlu1 %5791  ;;  %v5804_v34 = vpop.xlane.xlu0 %5803 }
0x29bd   : > { %7542 = vrsqrt.f32 %v5817_v37  ;;  %v5805_v63 = vmul.f32 0.0078125, %v5792_v54  ;;  %v5811_v51 = vmul.f32 0.0078125, %v5804_v34 }
0x29bf   : > { %v5812_v50 = vadd.f32 1e-05, %v5805_v63  ;;  %v5818_v4 = vadd.f32 1e-05, %v5811_v51 }
0x29c1   : > { %7544 = vrsqrt.f32 %v5812_v50 }
0x29c2   : > { %7546 = vrsqrt.f32 %v5818_v4 }
0x29c6   : > { %v7541_v55 = vpop.eup %7540 }
0x29c7   : > { %v5830_v10 = vmul.f32 %v7541_v55, %v9141_v11  ;;  %v5883_v11 = vrot.slane %v5851_v35, 4 }
0x29c9   : > { %v5841_v6 = vmul.f32 %v5836_v25, %v5830_v10  ;;  %v7305_v10 = vld [vmem:[%s9260_s1 + $0x240] sm:$0xff]  }
0x29ca   : > { %v7543_v14 = vpop.eup %7542  ;;  %7099 = vmatpush3.bf16.msra.mxu0 %v7305_v10 }
0x29cb   : > { %v5831_v32 = vmul.f32 %v7543_v14, %v9145_v19  ;;  %v5852_v24 = vadd.f32 %v5847_v57, %v5841_v6  ;;  %v5855_v19 = vsel %vm556_vm2, %v5849_v29, 0.0  ;;  %v7549_v6 = vld [vmem:[%s9262_s3 + $0x8] sm:$0xff] }
0x29cc   : > { %v5937_v26 = vrot.slane %v7549_v6, %v5017_v53  ;;  %v6047_v20 = vrot.slane %v7549_v6, %v5217_v12 }
0x29cd   : > { %v5842_v56 = vmul.f32 %v5836_v25, %v5831_v32  ;;  %v5884_v36 = vrot.slane %v5852_v24, 4 }
0x29ce   : > { %v7545_v1 = vpop.eup %7544 }
0x29cf   : > { %v7547_v17 = vpop.eup %7546  ;;  %v5853_v22 = vadd.f32 %v5847_v57, %v5842_v56  ;;  %v5826_v15 = vmul.f32 %v7545_v1, %v9151_v0  ;;  %v5885_v3 = vsel %vm248_vm0, %v5883_v11, %v5884_v36  ;;  %v5877_v0 = vrot.slane %v5876_v13, 2 }
0x29d0   : > { %v5832_v5 = vmul.f32 %v7547_v17, %v9149_v18 }
0x29d1   : > { %v5886_v7 = vrot.slane %v5853_v22, 4  ;;  %v5837_v21 = vmul.f32 %v5836_v25, %v5826_v15  ;;  %v5899_v47 = vrot.slane %v5853_v22, 2  ;;  %v5878_v31 = vadd.f32 %v5877_v0, %v5876_v13 }
0x29d2   : > { %v5843_v52 = vmul.f32 %v5836_v25, %v5832_v5 }
0x29d3   : > { %v5887_v30 = vsel %vm248_vm0, %v5884_v36, %v5886_v7  ;;  %v5848_v27 = vadd.f32 %v5847_v57, %v5837_v21  ;;  %v5879_v46 = vrot.slane %v5878_v31, 1 }
0x29d4   : > { %v5854_v59 = vadd.f32 %v5847_v57, %v5843_v52  ;;  %v5890_v42 = vsel %vm556_vm2, %v5887_v30, 0.0 }
0x29d5   : > { %v5856_v38 = vadd.f32 %v5855_v19, %v5848_v27  ;;  %v5891_v48 = vadd.f32 %v5890_v42, %v5885_v3  ;;  %v5880_v51 = vadd.f32 %v5879_v46, %v5878_v31 }
0x29d6   : > { %v5900_v18 = vrot.slane %v5854_v59, 2 }
0x29d7   : > { %v5857_v41 = vrot.slane %v5856_v38, 4  ;;  %v5892_v16 = vrot.slane %v5891_v48, 4 }
0x29d8   : > { %v5901_v61 = vsel %vm556_vm2, %v5899_v47, %v5900_v18  ;;  %v5904_v25 = vsel %vm556_vm2, %v5900_v18, 0.0 }
0x29d9   : > { %v5858_v45 = vadd.f32 %v5857_v41, %v5856_v38  ;;  %v5905_v33 = vadd.f32 %v5904_v25, %v5901_v61  ;;  %v5893_v60 = vadd.f32 %v5892_v16, %v5891_v48 }
0x29db   : > { %v5859_v40 = vrot.slane %v5858_v45, 2  ;;  %v5894_v43 = vrot.slane %v5893_v60, 2  ;;  %v5906_v57 = vrot.slane %v5905_v33, 4 }
0x29dd   : > { %v5860_v44 = vadd.f32 %v5859_v40, %v5858_v45  ;;  %v5895_v35 = vadd.f32 %v5894_v43, %v5893_v60  ;;  %v5907_v37 = vadd.f32 %v5906_v57, %v5905_v33 }
0x29df   : > { %v5861_v54 = vrot.slane %v5860_v44, 1  ;;  %v5896_v34 = vrot.slane %v5895_v35, 1  ;;  %v5908_v23 = vrot.slane %v5907_v37, 2 }
0x29e1   : > { %v5862_v63 = vadd.f32 %v5861_v54, %v5860_v44  ;;  %v5897_v29 = vadd.f32 %v5896_v34, %v5895_v35  ;;  %v5909_v28 = vadd.f32 %v5908_v23, %v5907_v37 }
0x29e3   : > { %v5910_v50 = vrot.slane %v5909_v28, 1  ;;  %v5912_v4 = vsel %vm486_vm3, %v5862_v63, %v5880_v51 }
0x29e4   : > { %v5913_v62 = vsel %vm565_vm5, %v5912_v4, %v5897_v29 }
0x29e5   : > { %v5911_v39 = vadd.f32 %v5910_v50, %v5909_v28 }
0x29e7   : > { %v5915_v8 = vsel %vm5914_vm12, %v5913_v62, %v5911_v39 }
0x29e8   : > { %v5916_v55 = vmul.f32 0.071428575, %v5915_v8 }
0x29ea   : > { %v5917_v58 = vpack.c.bf16 %v5916_v55, %v5916_v55 }
0x29ec   : > { %7081 = vmatmul.mubr.bf16.vlgmr.msra.gmra.mxu1 %v5917_v58 }
0x2aac   : > { %v6020_v14 = vpop.f32.mrf.mxu1 }
0x2aad   : > { %v6021_v32 = vadd.f32 %v6020_v14, %v5937_v26 }
0x2aae   : > { %v7082_v24 = vpop.f32.mrf.mxu1 }
0x2aaf   : > { %v6026_v56 = vmax.f32 %v6021_v32, 0.0 }
0x2ab0   : > { %v6023_v2 = vpop.f32.mrf.mxu1 }
0x2ab1   : > { %v6027_v1 = vpack.c.bf16 %v6026_v56, %v6026_v56 }
0x2ab2   : > { %v7083_v17 = vpop.f32.mrf.mxu1 }
0x2ab3   : > { %7101 = vmatmul.mubr.bf16.vlgmr.msra.gmra.mxu0 %v6027_v1 }
0x2b73   : > { %v6130_v22 = vpop.f32.mrf.mxu0 }
0x2b74   : > { %v6131_v15 = vadd.f32 %v6130_v22, %v6047_v20 }
0x2b75   : > { %v7102_v36 = vpop.f32.mrf.mxu0 }
0x2b76   : > { %6136 = vst [vmem:[%s195_s11] sm:$0xf] %v6131_v15 }
0x2b77   : > { %v6133_v53 = vpop.f32.mrf.mxu0 }
0x2b79   : > { %v7103_v5 = vpop.f32.mrf.mxu0 }
0x2b7a PF: > { %s14_s15 = sadd.s32 1, %s7556_s15  }
0x2b7b   : > { %p11_p4 = scmp.ge.s32.totalorder %s14_s15, 4  }
0x2b7d   :  { %13 = sbr.rel (!%p11_p4) target bundleno = 1 (0x1), region = 66 }

</bundles_post_ra>
